<compile_context>
chip_gen: v7x
topology: tpu7x:2x2x1
jax: 0.10.0
libtpu: 0.0.40
codegen_flags: <defaults>
</compile_context>

<pallas_src>
import functools
import math

import jax
import jax.numpy as jnp
from jax.experimental import pallas as pl
from jax.experimental.pallas import tpu as pltpu


# ----------------------------------------------------------------------------
# Pallas kernels
# ----------------------------------------------------------------------------

def _make_conv_kernel(*, stride, OH, OW, relu, has_res):
    """Fused 3x3 conv (+BN shift)(+residual)(+ReLU) with in-kernel im2col.

    refs = [phase_0, ..., phase_{P-1}, w9, shift, (res), out]
      stride 1: one phase  = padded x, block (1, H+2, W+2, Cin)
      stride 2: four phases = x_pad[a::2, b::2],  block (1, OH+1, OW+1, Cin)
      w9    : (9, Cin, Cout) bf16, BN scale already folded in
      shift : (1, Cout) f32
      res   : (1, OH, OW, Cout) bf16 (optional)
      out   : (1, OH, OW, Cout) bf16
    """
    taps = []
    for ki in range(3):
        for kj in range(3):
            if stride == 1:
                taps.append((0, ki, kj))
            else:  # phase decomposition: x_pad[2*oh+ki, 2*ow+kj] = phase[ki%2,kj%2][oh+ki//2, ow+kj//2]
                taps.append((2 * (ki % 2) + (kj % 2), ki // 2, kj // 2))
    nph = 1 if stride == 1 else 4
    # Flattening (OH, OW, C) -> (OH*OW, C) is layout-friendly only if OW is a multiple
    # of the sublane count; otherwise keep the (cheap, known-good) per-row path.
    whole = (OW % 8 == 0)

    def kernel(*refs):
        phase_refs = refs[:nph]
        w_ref = refs[nph]
        sh_ref = refs[nph + 1]
        res_ref = refs[nph + 2] if has_res else None
        o_ref = refs[-1]

        shift = sh_ref[...]                                   # (1, Cout) f32, hoisted

        if whole:
            # one rectangular window per tap -> 9 big matmuls (M = OH*OW)
            acc = None
            for t, (p, di, dj) in enumerate(taps):
                win = phase_refs[p][0, di:di + OH, dj:dj + OW, :]          # (OH, OW, Cin)
                win = win.reshape(OH * OW, win.shape[-1])                  # layout no-op
                part = jnp.dot(win, w_ref[t],
                               preferred_element_type=jnp.float32)         # MXU, f32 acc
                acc = part if acc is None else acc + part
            y = acc + shift
            if has_res:
                y = y + res_ref[0].reshape(OH * OW, -1).astype(jnp.float32)
            if relu:
                y = jnp.maximum(y, 0.0)
            o_ref[0] = y.reshape(OH, OW, -1).astype(o_ref.dtype)
        else:
            for oh in range(OH):                              # static unroll (OH <= 4 here)
                acc = None
                for t, (p, di, dj) in enumerate(taps):
                    win = phase_refs[p][0, oh + di, dj:dj + OW, :]         # (OW, Cin) bf16
                    part = jnp.dot(win, w_ref[t],
                                   preferred_element_type=jnp.float32)
                    acc = part if acc is None else acc + part
                y = acc + shift
                if has_res:
                    y = y + res_ref[0, oh].astype(jnp.float32)
                if relu:
                    y = jnp.maximum(y, 0.0)
                o_ref[0, oh] = y.astype(o_ref.dtype)
    return kernel


def _mix_pool_fc_kernel(a_ref, b_ref, w_ref, bias_ref, o_ref, *, inv_hw):
    """o = mean_hw(a * b) @ W + bias   -- fused expert-mix + avg-pool + packed classifier."""
    prod = a_ref[...].astype(jnp.float32) * b_ref[...].astype(jnp.float32)  # (N, HW, Cp)
    pooled = jnp.sum(prod, axis=1) * inv_hw                                  # (N, Cp)
    o_ref[...] = jnp.dot(pooled, w_ref[...],
                         preferred_element_type=jnp.float32) + bias_ref[...]


def mix_pool_fc(a, b, w, bias):
    N, HW, C = a.shape
    NC = w.shape[1]
    return pl.pallas_call(
        functools.partial(_mix_pool_fc_kernel, inv_hw=1.0 / HW),
        out_shape=jax.ShapeDtypeStruct((N, NC), jnp.float32),
        grid=(1,),
        in_specs=[
            pl.BlockSpec((N, HW, C), lambda i: (0, 0, 0)),
            pl.BlockSpec((N, HW, C), lambda i: (0, 0, 0)),
            pl.BlockSpec((C, NC), lambda i: (0, 0)),
            pl.BlockSpec((1, NC), lambda i: (0, 0)),
        ],
        out_specs=pl.BlockSpec((N, NC), lambda i: (0, 0)),
        compiler_params=pltpu.CompilerParams(dimension_semantics=("arbitrary",)),
    )(a, b, w, bias)


# ----------------------------------------------------------------------------
# Conv wrapper (glue is only a spatial pad / phase split -- no im2col in HBM)
# ----------------------------------------------------------------------------

def conv_bn(x, cp, *, stride, relu, residual=None):
    """3x3 conv (pad=1) + folded-BN shift (+residual) (+ReLU), NHWC bf16 in/out."""
    w, shift = cp["w"], cp["shift"]            # (3,3,cin,cout) bf16 / (1,cout) f32
    cin, cout = w.shape[2], w.shape[3]
    N, H, W, C = x.shape
    assert C == cin
    OH = (H - 1) // stride + 1
    OW = (W - 1) // stride + 1

    xp = jnp.pad(x, ((0, 0), (1, 1), (1, 1), (0, 0)))
    if stride == 1:
        phases = [xp]
    else:
        phases = [xp[:, a::2, b::2, :] for a in range(2) for b in range(2)]
    w9 = w.reshape(9, cin, cout)

    kernel = _make_conv_kernel(stride=stride, OH=OH, OW=OW, relu=relu,
                               has_res=residual is not None)

    in_specs = [pl.BlockSpec((1,) + p.shape[1:], lambda n: (n, 0, 0, 0)) for p in phases]
    in_specs += [pl.BlockSpec(w9.shape, lambda n: (0, 0, 0)),
                 pl.BlockSpec(shift.shape, lambda n: (0, 0))]
    args = list(phases) + [w9, shift]
    if residual is not None:
        in_specs.append(pl.BlockSpec((1, OH, OW, cout), lambda n: (n, 0, 0, 0)))
        args.append(residual)

    return pl.pallas_call(
        kernel,
        out_shape=jax.ShapeDtypeStruct((N, OH, OW, cout), jnp.bfloat16),
        grid=(N,),
        in_specs=in_specs,
        out_specs=pl.BlockSpec((1, OH, OW, cout), lambda n: (n, 0, 0, 0)),
        compiler_params=pltpu.CompilerParams(dimension_semantics=("parallel",)),
    )(*args)


def basic_block(x, bp):
    """CIFAR BasicBlock: relu(bn1(conv1)) -> relu(bn2(conv2) + shortcut). Works on
    plain or expert-packed channel stacks (bp['experts'] > 1)."""
    out = conv_bn(x, bp["conv1"], stride=bp["stride"], relu=True)
    if bp["stride"] != 1 or bp["cin_pe"] != bp["cout_pe"]:
        # option-A shortcut: subsample by 2, zero-pad channels by planes//4 each side
        # (valid for this net's in=planes/2 ratio), replicate across packed experts.
        pc = bp["cout_pe"] // 4
        sc = jnp.pad(x[:, ::2, ::2, :], ((0, 0), (0, 0), (0, 0), (pc, pc)))
        if bp["experts"] > 1:
            sc = jnp.tile(sc, (1, 1, 1, bp["experts"]))
    else:
        sc = x
    return conv_bn(out, bp["conv2"], stride=1, relu=True, residual=sc)


# ----------------------------------------------------------------------------
# Deterministic parameter construction (mirrors ResNet_MoE.__init__)
# ----------------------------------------------------------------------------

def kaiming_conv(key, cin, cout):
    fan_in = 9 * cin
    return jax.random.normal(key, (3, 3, cin, cout), jnp.float32) * math.sqrt(2.0 / fan_in)


def bn_affine(c, eps=1e-5):
    # TODO(synk): BatchNorm uses inference-mode statistics (running_mean=0, running_var=1,
    # gamma=1, beta=0); training-mode batch statistics are not implemented.
    gamma = jnp.ones((c,), jnp.float32)
    beta = jnp.zeros((c,), jnp.float32)
    mean = jnp.zeros((c,), jnp.float32)
    var = jnp.ones((c,), jnp.float32)
    scale = gamma / jnp.sqrt(var + eps)
    return scale, beta - mean * scale


def init_params(key, num_blocks, num_experts, num_classes):
    params = {}
    key, k = jax.random.split(key)
    params["conv1_w"] = kaiming_conv(k, 3, 16)
    params["bn1"] = bn_affine(16)

    def make_layer(key, in_planes, planes, nblocks, stride):
        strides = [stride] + [1] * (nblocks - 1)
        blocks = []
        cur = in_planes
        for s in strides:
            key, k1, k2 = jax.random.split(key, 3)
            blocks.append(dict(w1=kaiming_conv(k1, cur, planes), bn1=bn_affine(planes),
                               w2=kaiming_conv(k2, planes, planes), bn2=bn_affine(planes),
                               in_planes=cur, planes=planes, stride=s))
            cur = planes
        return blocks, key

    params["layer1"], key = make_layer(key, 16, 16, num_blocks[0], 1)
    params["layer2"], key = make_layer(key, 16, 32, num_blocks[1], 2)
    params["layer3s"] = []
    for _ in range(num_experts):
        l3, key = make_layer(key, 32, 64, num_blocks[2], 2)
        params["layer3s"].append(l3)

    depth = list(reversed([i + 1 for i in range(len(num_blocks) - 1)]))     # [2, 1]
    exp_depth = [depth[i % len(depth)] for i in range(num_experts)]
    feat_dim = 16
    params["shallow_exps"] = []
    for d in exp_depth:
        input_dim = feat_dim * 2 ** (d % len(depth))
        convs = []
        for kk in range(d):
            cin = input_dim * 2 ** kk
            cout = input_dim * 2 ** (kk + 1)
            key, kc = jax.random.split(key)
            # matches StridedConv(use_relu = (k != 1)) in the reference
            convs.append(dict(w=kaiming_conv(kc, cin, cout), bn=bn_affine(cout),
                              relu=(kk != 1)))
        params["shallow_exps"].append(convs)

    params["classifiers"] = []
    for _ in range(num_experts):
        key, kw, kb = jax.random.split(key, 3)
        w = jax.random.normal(kw, (64, num_classes), jnp.float32) * math.sqrt(2.0 / 64)
        bound = 1.0 / math.sqrt(64)
        b = jax.random.uniform(kb, (num_classes,), jnp.float32, -bound, bound)
        params["classifiers"].append((w, b))

    params["s"] = 1.0  # use_norm=False -> plain nn.Linear classifiers, s = 1
    return params


def prepare_params(raw, num_experts, num_classes):
    """Fold BN scales into bf16 conv weights and pack the experts (lane-dense Cout)."""
    E = num_experts

    def fold(w, bn):
        scale, shift = bn
        wf = (w * scale.reshape(1, 1, 1, -1)).astype(jnp.bfloat16)
        return dict(w=wf, shift=shift.reshape(1, -1).astype(jnp.float32))

    def prep_block(b, experts=1):
        return dict(conv1=fold(b["w1"], b["bn1"]), conv2=fold(b["w2"], b["bn2"]),
                    stride=b["stride"], cin_pe=b["in_planes"], cout_pe=b["planes"],
                    experts=experts)

    p = {"conv1": fold(raw["conv1_w"], raw["bn1"]),
         "layer1": [prep_block(b) for b in raw["layer1"]],
         "layer2": [prep_block(b) for b in raw["layer2"]]}

    def block_diag_conv(ws):
        c, f = ws[0].shape[2], ws[0].shape[3]
        out = jnp.zeros((3, 3, c * len(ws), f * len(ws)), ws[0].dtype)
        for e, w in enumerate(ws):
            out = out.at[:, :, c * e:c * (e + 1), f * e:f * (e + 1)].set(w)
        return out

    def concat_bn(bns):
        return (jnp.concatenate([s for s, _ in bns]),
                jnp.concatenate([sh for _, sh in bns]))

    # pack all experts' layer3 along output channels (64*E lanes per store)
    layer3 = []
    nb3 = len(raw["layer3s"][0])
    for j in range(nb3):
        bj = [raw["layer3s"][e][j] for e in range(E)]
        if j == 0:
            w1 = jnp.concatenate([b["w1"] for b in bj], axis=3)   # shared (unpacked) input
        else:
            w1 = block_diag_conv([b["w1"] for b in bj])
        w2 = block_diag_conv([b["w2"] for b in bj])
        layer3.append(dict(
            conv1=fold(w1, concat_bn([b["bn1"] for b in bj])),
            conv2=fold(w2, concat_bn([b["bn2"] for b in bj])),
            stride=bj[0]["stride"], cin_pe=bj[0]["in_planes"], cout_pe=bj[0]["planes"],
            experts=E))
    p["layer3"] = layer3

    p["shallow"] = [[dict(relu=c["relu"], **fold(c["w"], c["bn"])) for c in convs]
                    for convs in raw["shallow_exps"]]

    # block-diagonal packed classifier: (64*E, E*num_classes)
    feat = 64
    wcls = jnp.zeros((feat * E, num_classes * E), jnp.float32)
    bcls = []
    for e, (w, b) in enumerate(raw["classifiers"]):
        wcls = wcls.at[feat * e:feat * (e + 1),
                       num_classes * e:num_classes * (e + 1)].set(w)
        bcls.append(b)
    p["cls_w"] = wcls
    p["cls_b"] = jnp.concatenate(bcls).reshape(1, num_classes * E)
    p["num_classes"] = num_classes
    p["s"] = raw["s"]
    return p


# ----------------------------------------------------------------------------
# Forward pass (mirrors ResNet_MoE.forward with crt=False, use_norm=False)
# ----------------------------------------------------------------------------

def forward(params, x_nchw, num_experts):
    x = jnp.transpose(x_nchw, (0, 2, 3, 1)).astype(jnp.bfloat16)   # NCHW -> NHWC bf16
    out = conv_bn(x, params["conv1"], stride=1, relu=True)

    out1 = out
    for bp in params["layer1"]:
        out1 = basic_block(out1, bp)
    out2 = out1
    for bp in params["layer2"]:
        out2 = basic_block(out2, bp)

    # all experts' layer3 run as ONE channel-packed stack -> (N, 4, 4, 64*E)
    o3 = out2
    for bp in params["layer3"]:
        o3 = basic_block(o3, bp)

    shallow_inputs = [out1, out2]
    sh_outs = []
    for i in range(num_experts):
        sh = shallow_inputs[i % len(shallow_inputs)]
        for cp in params["shallow"][i]:
            sh = conv_bn(sh, cp, stride=2, relu=cp["relu"])
        sh_outs.append(sh)                                          # (N, 4, 4, 64)
    sh_packed = jnp.concatenate(sh_outs, axis=-1)                   # (N, 4, 4, 64*E)

    # fused: (out3 * shallow) -> global avg-pool -> packed classifiers
    N, Hf, Wf, Cp = o3.shape
    logits = mix_pool_fc(o3.reshape(N, Hf * Wf, Cp),
                         sh_packed.reshape(N, Hf * Wf, Cp),
                         params["cls_w"], params["cls_b"])
    logits = params["s"] * logits
    nc = params["num_classes"]

    # TODO(synk): use_norm=True (NormedLinear) and crt=True (rt_classifiers) branches are
    # not exercised by the default forward path and are not implemented.
    return [logits[:, i * nc:(i + 1) * nc] for i in range(num_experts)]


if __name__ == "__main__":
    key = jax.random.PRNGKey(0)
    pkey, xkey = jax.random.split(key)

    num_blocks = [1, 1, 1]
    num_experts = 3
    num_classes = 10

    raw = init_params(pkey, num_blocks, num_experts, num_classes)
    params = prepare_params(raw, num_experts, num_classes)
    x = jax.random.normal(xkey, (2, 3, 16, 16), jnp.float32)   # NCHW, like PyTorch

    outs = forward(params, x, num_experts)
    outs = [jax.block_until_ready(o) for o in outs]

    assert len(outs) == num_experts
    assert all(o.shape == (2, num_classes) for o in outs)
    assert all(bool(jnp.all(jnp.isfinite(o))) for o in outs)
    print("KERNEL_OK")
</pallas_src>

<mosaic_0001>
module attributes {stable_mosaic.version = 11 : i64} {
  func.func @kernel(%arg0: i32, %arg1: memref<1x18x18x3xbf16, #tpu.memory_space<vmem>>, %arg2: memref<9x3x16xbf16, #tpu.memory_space<vmem>>, %arg3: memref<1x16xf32, #tpu.memory_space<vmem>>, %arg4: memref<1x16x16x16xbf16, #tpu.memory_space<vmem>>) attributes {dimension_semantics = [#tpu.dimension_semantics<parallel>], iteration_bounds = array<i64: 2>, scalar_prefetch = 0 : i64, scratch_operands = 0 : i64, tpu.core_type = #tpu.core_type<tc>, window_params = [{transform_indices = @transform_0, window_bounds = array<i64: 1, 18, 18, 3>}, {pipeline_mode = #tpu.pipeline_mode<synchronous>, transform_indices = @transform_1, window_bounds = array<i64: 9, 3, 16>}, {pipeline_mode = #tpu.pipeline_mode<synchronous>, transform_indices = @transform_2, window_bounds = array<i64: 1, 16>}, {transform_indices = @transform_3, window_bounds = array<i64: 1, 16, 16, 16>}]} {
    %c0 = arith.constant 0 : index
    %c0_0 = arith.constant 0 : index
    %0 = vector.load %arg3[%c0, %c0_0] : memref<1x16xf32, #tpu.memory_space<vmem>>, vector<1x16xf32>
    %c0_1 = arith.constant 0 : index
    %c0_2 = arith.constant 0 : index
    %c0_3 = arith.constant 0 : index
    %c0_4 = arith.constant 0 : index
    %1 = vector.load %arg1[%c0_1, %c0_2, %c0_3, %c0_4] : memref<1x18x18x3xbf16, #tpu.memory_space<vmem>>, vector<1x16x16x3xbf16>
    %2 = vector.shape_cast %1 : vector<1x16x16x3xbf16> to vector<16x16x3xbf16>
    %3 = vector.shape_cast %2 : vector<16x16x3xbf16> to vector<256x3xbf16>
    %c0_5 = arith.constant 0 : index
    %c0_6 = arith.constant 0 : index
    %c0_7 = arith.constant 0 : index
    %4 = vector.load %arg2[%c0_5, %c0_6, %c0_7] : memref<9x3x16xbf16, #tpu.memory_space<vmem>>, vector<1x3x16xbf16>
    %5 = vector.shape_cast %4 : vector<1x3x16xbf16> to vector<3x16xbf16>
    %cst = arith.constant dense<0.000000e+00> : vector<256x16xf32>
    %6 = tpu.matmul %3, %5, %cst {dimension_numbers = #tpu.dot_dimension_numbers<[1], [0], [0], [1], [0, 0, 1, 1], [], []>} : vector<256x3xbf16>, vector<3x16xbf16>, vector<256x16xf32> -> vector<256x16xf32>
    %c0_8 = arith.constant 0 : index
    %c0_9 = arith.constant 0 : index
    %c1 = arith.constant 1 : index
    %c0_10 = arith.constant 0 : index
    %7 = vector.load %arg1[%c0_8, %c0_9, %c1, %c0_10] : memref<1x18x18x3xbf16, #tpu.memory_space<vmem>>, vector<1x16x16x3xbf16>
    %8 = vector.shape_cast %7 : vector<1x16x16x3xbf16> to vector<16x16x3xbf16>
    %9 = vector.shape_cast %8 : vector<16x16x3xbf16> to vector<256x3xbf16>
    %c1_11 = arith.constant 1 : index
    %c0_12 = arith.constant 0 : index
    %c0_13 = arith.constant 0 : index
    %10 = vector.load %arg2[%c1_11, %c0_12, %c0_13] : memref<9x3x16xbf16, #tpu.memory_space<vmem>>, vector<1x3x16xbf16>
    %11 = vector.shape_cast %10 : vector<1x3x16xbf16> to vector<3x16xbf16>
    %cst_14 = arith.constant dense<0.000000e+00> : vector<256x16xf32>
    %12 = tpu.matmul %9, %11, %cst_14 {dimension_numbers = #tpu.dot_dimension_numbers<[1], [0], [0], [1], [0, 0, 1, 1], [], []>} : vector<256x3xbf16>, vector<3x16xbf16>, vector<256x16xf32> -> vector<256x16xf32>
    %13 = arith.addf %6, %12 : vector<256x16xf32>
    %c0_15 = arith.constant 0 : index
    %c0_16 = arith.constant 0 : index
    %c2 = arith.constant 2 : index
    %c0_17 = arith.constant 0 : index
    %14 = vector.load %arg1[%c0_15, %c0_16, %c2, %c0_17] : memref<1x18x18x3xbf16, #tpu.memory_space<vmem>>, vector<1x16x16x3xbf16>
    %15 = vector.shape_cast %14 : vector<1x16x16x3xbf16> to vector<16x16x3xbf16>
    %16 = vector.shape_cast %15 : vector<16x16x3xbf16> to vector<256x3xbf16>
    %c2_18 = arith.constant 2 : index
    %c0_19 = arith.constant 0 : index
    %c0_20 = arith.constant 0 : index
    %17 = vector.load %arg2[%c2_18, %c0_19, %c0_20] : memref<9x3x16xbf16, #tpu.memory_space<vmem>>, vector<1x3x16xbf16>
    %18 = vector.shape_cast %17 : vector<1x3x16xbf16> to vector<3x16xbf16>
    %cst_21 = arith.constant dense<0.000000e+00> : vector<256x16xf32>
    %19 = tpu.matmul %16, %18, %cst_21 {dimension_numbers = #tpu.dot_dimension_numbers<[1], [0], [0], [1], [0, 0, 1, 1], [], []>} : vector<256x3xbf16>, vector<3x16xbf16>, vector<256x16xf32> -> vector<256x16xf32>
    %20 = arith.addf %13, %19 : vector<256x16xf32>
    %c0_22 = arith.constant 0 : index
    %c1_23 = arith.constant 1 : index
    %c0_24 = arith.constant 0 : index
    %c0_25 = arith.constant 0 : index
    %21 = vector.load %arg1[%c0_22, %c1_23, %c0_24, %c0_25] : memref<1x18x18x3xbf16, #tpu.memory_space<vmem>>, vector<1x16x16x3xbf16>
    %22 = vector.shape_cast %21 : vector<1x16x16x3xbf16> to vector<16x16x3xbf16>
    %23 = vector.shape_cast %22 : vector<16x16x3xbf16> to vector<256x3xbf16>
    %c3 = arith.constant 3 : index
    %c0_26 = arith.constant 0 : index
    %c0_27 = arith.constant 0 : index
    %24 = vector.load %arg2[%c3, %c0_26, %c0_27] : memref<9x3x16xbf16, #tpu.memory_space<vmem>>, vector<1x3x16xbf16>
    %25 = vector.shape_cast %24 : vector<1x3x16xbf16> to vector<3x16xbf16>
    %cst_28 = arith.constant dense<0.000000e+00> : vector<256x16xf32>
    %26 = tpu.matmul %23, %25, %cst_28 {dimension_numbers = #tpu.dot_dimension_numbers<[1], [0], [0], [1], [0, 0, 1, 1], [], []>} : vector<256x3xbf16>, vector<3x16xbf16>, vector<256x16xf32> -> vector<256x16xf32>
    %27 = arith.addf %20, %26 : vector<256x16xf32>
    %c0_29 = arith.constant 0 : index
    %c1_30 = arith.constant 1 : index
    %c1_31 = arith.constant 1 : index
    %c0_32 = arith.constant 0 : index
    %28 = vector.load %arg1[%c0_29, %c1_30, %c1_31, %c0_32] : memref<1x18x18x3xbf16, #tpu.memory_space<vmem>>, vector<1x16x16x3xbf16>
    %29 = vector.shape_cast %28 : vector<1x16x16x3xbf16> to vector<16x16x3xbf16>
    %30 = vector.shape_cast %29 : vector<16x16x3xbf16> to vector<256x3xbf16>
    %c4 = arith.constant 4 : index
    %c0_33 = arith.constant 0 : index
    %c0_34 = arith.constant 0 : index
    %31 = vector.load %arg2[%c4, %c0_33, %c0_34] : memref<9x3x16xbf16, #tpu.memory_space<vmem>>, vector<1x3x16xbf16>
    %32 = vector.shape_cast %31 : vector<1x3x16xbf16> to vector<3x16xbf16>
    %cst_35 = arith.constant dense<0.000000e+00> : vector<256x16xf32>
    %33 = tpu.matmul %30, %32, %cst_35 {dimension_numbers = #tpu.dot_dimension_numbers<[1], [0], [0], [1], [0, 0, 1, 1], [], []>} : vector<256x3xbf16>, vector<3x16xbf16>, vector<256x16xf32> -> vector<256x16xf32>
    %34 = arith.addf %27, %33 : vector<256x16xf32>
    %c0_36 = arith.constant 0 : index
    %c1_37 = arith.constant 1 : index
    %c2_38 = arith.constant 2 : index
    %c0_39 = arith.constant 0 : index
    %35 = vector.load %arg1[%c0_36, %c1_37, %c2_38, %c0_39] : memref<1x18x18x3xbf16, #tpu.memory_space<vmem>>, vector<1x16x16x3xbf16>
    %36 = vector.shape_cast %35 : vector<1x16x16x3xbf16> to vector<16x16x3xbf16>
    %37 = vector.shape_cast %36 : vector<16x16x3xbf16> to vector<256x3xbf16>
    %c5 = arith.constant 5 : index
    %c0_40 = arith.constant 0 : index
    %c0_41 = arith.constant 0 : index
    %38 = vector.load %arg2[%c5, %c0_40, %c0_41] : memref<9x3x16xbf16, #tpu.memory_space<vmem>>, vector<1x3x16xbf16>
    %39 = vector.shape_cast %38 : vector<1x3x16xbf16> to vector<3x16xbf16>
    %cst_42 = arith.constant dense<0.000000e+00> : vector<256x16xf32>
    %40 = tpu.matmul %37, %39, %cst_42 {dimension_numbers = #tpu.dot_dimension_numbers<[1], [0], [0], [1], [0, 0, 1, 1], [], []>} : vector<256x3xbf16>, vector<3x16xbf16>, vector<256x16xf32> -> vector<256x16xf32>
    %41 = arith.addf %34, %40 : vector<256x16xf32>
    %c0_43 = arith.constant 0 : index
    %c2_44 = arith.constant 2 : index
    %c0_45 = arith.constant 0 : index
    %c0_46 = arith.constant 0 : index
    %42 = vector.load %arg1[%c0_43, %c2_44, %c0_45, %c0_46] : memref<1x18x18x3xbf16, #tpu.memory_space<vmem>>, vector<1x16x16x3xbf16>
    %43 = vector.shape_cast %42 : vector<1x16x16x3xbf16> to vector<16x16x3xbf16>
    %44 = vector.shape_cast %43 : vector<16x16x3xbf16> to vector<256x3xbf16>
    %c6 = arith.constant 6 : index
    %c0_47 = arith.constant 0 : index
    %c0_48 = arith.constant 0 : index
    %45 = vector.load %arg2[%c6, %c0_47, %c0_48] : memref<9x3x16xbf16, #tpu.memory_space<vmem>>, vector<1x3x16xbf16>
    %46 = vector.shape_cast %45 : vector<1x3x16xbf16> to vector<3x16xbf16>
    %cst_49 = arith.constant dense<0.000000e+00> : vector<256x16xf32>
    %47 = tpu.matmul %44, %46, %cst_49 {dimension_numbers = #tpu.dot_dimension_numbers<[1], [0], [0], [1], [0, 0, 1, 1], [], []>} : vector<256x3xbf16>, vector<3x16xbf16>, vector<256x16xf32> -> vector<256x16xf32>
    %48 = arith.addf %41, %47 : vector<256x16xf32>
    %c0_50 = arith.constant 0 : index
    %c2_51 = arith.constant 2 : index
    %c1_52 = arith.constant 1 : index
    %c0_53 = arith.constant 0 : index
    %49 = vector.load %arg1[%c0_50, %c2_51, %c1_52, %c0_53] : memref<1x18x18x3xbf16, #tpu.memory_space<vmem>>, vector<1x16x16x3xbf16>
    %50 = vector.shape_cast %49 : vector<1x16x16x3xbf16> to vector<16x16x3xbf16>
    %51 = vector.shape_cast %50 : vector<16x16x3xbf16> to vector<256x3xbf16>
    %c7 = arith.constant 7 : index
    %c0_54 = arith.constant 0 : index
    %c0_55 = arith.constant 0 : index
    %52 = vector.load %arg2[%c7, %c0_54, %c0_55] : memref<9x3x16xbf16, #tpu.memory_space<vmem>>, vector<1x3x16xbf16>
    %53 = vector.shape_cast %52 : vector<1x3x16xbf16> to vector<3x16xbf16>
    %cst_56 = arith.constant dense<0.000000e+00> : vector<256x16xf32>
    %54 = tpu.matmul %51, %53, %cst_56 {dimension_numbers = #tpu.dot_dimension_numbers<[1], [0], [0], [1], [0, 0, 1, 1], [], []>} : vector<256x3xbf16>, vector<3x16xbf16>, vector<256x16xf32> -> vector<256x16xf32>
    %55 = arith.addf %48, %54 : vector<256x16xf32>
    %c0_57 = arith.constant 0 : index
    %c2_58 = arith.constant 2 : index
    %c2_59 = arith.constant 2 : index
    %c0_60 = arith.constant 0 : index
    %56 = vector.load %arg1[%c0_57, %c2_58, %c2_59, %c0_60] : memref<1x18x18x3xbf16, #tpu.memory_space<vmem>>, vector<1x16x16x3xbf16>
    %57 = vector.shape_cast %56 : vector<1x16x16x3xbf16> to vector<16x16x3xbf16>
    %58 = vector.shape_cast %57 : vector<16x16x3xbf16> to vector<256x3xbf16>
    %c8 = arith.constant 8 : index
    %c0_61 = arith.constant 0 : index
    %c0_62 = arith.constant 0 : index
    %59 = vector.load %arg2[%c8, %c0_61, %c0_62] : memref<9x3x16xbf16, #tpu.memory_space<vmem>>, vector<1x3x16xbf16>
    %60 = vector.shape_cast %59 : vector<1x3x16xbf16> to vector<3x16xbf16>
    %cst_63 = arith.constant dense<0.000000e+00> : vector<256x16xf32>
    %61 = tpu.matmul %58, %60, %cst_63 {dimension_numbers = #tpu.dot_dimension_numbers<[1], [0], [0], [1], [0, 0, 1, 1], [], []>} : vector<256x3xbf16>, vector<3x16xbf16>, vector<256x16xf32> -> vector<256x16xf32>
    %62 = arith.addf %55, %61 : vector<256x16xf32>
    %63 = vector.broadcast %0 : vector<1x16xf32> to vector<256x16xf32>
    %64 = arith.addf %62, %63 : vector<256x16xf32>
    %cst_64 = arith.constant 0.000000e+00 : f32
    %65 = vector.broadcast %cst_64 : f32 to vector<256x16xf32>
    %66 = arith.maximumf %64, %65 : vector<256x16xf32>
    %67 = vector.shape_cast %66 : vector<256x16xf32> to vector<16x16x16xf32>
    %68 = arith.truncf %67 : vector<16x16x16xf32> to vector<16x16x16xbf16>
    %c0_65 = arith.constant 0 : index
    %c0_66 = arith.constant 0 : index
    %c0_67 = arith.constant 0 : index
    %c0_68 = arith.constant 0 : index
    %69 = vector.load %arg4[%c0_65, %c0_66, %c0_67, %c0_68] : memref<1x16x16x16xbf16, #tpu.memory_space<vmem>>, vector<1x16x16x16xbf16>
    %70 = vector.shape_cast %69 : vector<1x16x16x16xbf16> to vector<16x16x16xbf16>
    %71 = vector.shape_cast %68 : vector<16x16x16xbf16> to vector<1x16x16x16xbf16>
    tpu.vector_store %arg4[%c0_65, %c0_66, %c0_67, %c0_68], %71 {strides = array<i32>} : memref<1x16x16x16xbf16, #tpu.memory_space<vmem>>, vector<1x16x16x16xbf16>,
    return
  }
  func.func @transform_0(%arg0: i32) -> (i32, i32, i32, i32) {
    %c0_i32 = arith.constant 0 : i32
    %c0_i32_0 = arith.constant 0 : i32
    %c0_i32_1 = arith.constant 0 : i32
    %c0_i32_2 = arith.constant 0 : i32
    return %arg0, %c0_i32, %c0_i32_0, %c0_i32_1 : i32, i32, i32, i32
  }
  func.func @transform_1(%arg0: i32) -> (i32, i32, i32) {
    %c0_i32 = arith.constant 0 : i32
    %c0_i32_0 = arith.constant 0 : i32
    %c0_i32_1 = arith.constant 0 : i32
    %c0_i32_2 = arith.constant 0 : i32
    return %c0_i32, %c0_i32_0, %c0_i32_1 : i32, i32, i32
  }
  func.func @transform_2(%arg0: i32) -> (i32, i32) {
    %c0_i32 = arith.constant 0 : i32
    %c0_i32_0 = arith.constant 0 : i32
    %c0_i32_1 = arith.constant 0 : i32
    return %c0_i32, %c0_i32_0 : i32, i32
  }
  func.func @transform_3(%arg0: i32) -> (i32, i32, i32, i32) {
    %c0_i32 = arith.constant 0 : i32
    %c0_i32_0 = arith.constant 0 : i32
    %c0_i32_1 = arith.constant 0 : i32
    %c0_i32_2 = arith.constant 0 : i32
    return %arg0, %c0_i32, %c0_i32_0, %c0_i32_1 : i32, i32, i32, i32
  }
}

</mosaic_0001>

<bundles_post_ra>
// kernel: tpu_custom_call.1
= control target key start
LH: loop header
LB: loop body
LE: loop exit
PB: predicated region body
PF: predicated region fallthrough
CT: control target
= control target key end

     0   :  { %8 = vsyncpa [#allocation3], 0  ;;  %s8547_s0 = inlined_call_operand.vmem [shape: bf16[2,18,18,3], index: 0, kind: input, shape index: {}]   ;;  %s8548_s1 = inlined_call_operand.vmem [shape: bf16[9,3,16], index: 1, kind: input, shape index: {}]   ;;  %s8549_s2 = inlined_call_operand.vmem [shape: f32[1,16], index: 2, kind: input, shape index: {}]   ;;  %s8550_s3 = inlined_call_operand.hbm [shape: bf16[2,16,16,16], index: 3, kind: output, shape index: {}]  }
   0x1   :  { %10 = vsyncpa [#allocation3 + $0x1], 0  ;;  %s6603_s12 = smov 0   ;;  %s6605_s13 = smov 0  }
   0x2   :  { %s6607_s14 = smov 0   ;;  %s6609_s15 = smov 0  }
   0x3 LB: > { %s6624_s16 = sadd.s32 4294967295, %s6577_s15   ;;  %s5040_s17 = sadd.s32 4294967294, %s6577_s15   ;;  %s6577_s15 = sphi %s6609_s15, %s8633_s15   ;;  %s6573_s14 = sphi %s6607_s14, %s8632_s14   ;;  %s6569_s13 = sphi %s6605_s13, %s8631_s13   ;;  %s6565_s12 = sphi %s6603_s12, %s8630_s12  }
   0x4   : > { %s6628_s18 = sadd.s32 1, %s6577_s15   ;;  %s91_s19 = sadd.s32 1, %s6573_s14 }
   0x5   : > { %s88_s20 = ssub.s32 %s6577_s15, %s6628_s18  ;;  %p101_p0 = scmp.ne.s32.totalorder %s6573_s14, %s6569_s13 }
   0x6   : > { %p89_p1 = scmp.eq.s32.totalorder %s88_s20, 0  ;;  %p102_p2 = scmp.eq.s32.totalorder %s6624_s16, 1 }
   0x7   : > { %p107_p3 = scmp.ne.s32.totalorder %s6569_s13, %s6565_s12  ;;  %p108_p4 = scmp.eq.s32.totalorder %s5040_s17, 1 }
   0x8   : > { %s6639_s21 = scalar_select %p89_p1, %s6573_s14, %s91_s19  }
   0x9   : > { %p6641_p5 = por %p102_p2, %p101_p0  ;;  %p6645_p6 = por %p108_p4, %p107_p3 }
   0xa   : > { %p5043_p7 = scmp.ge.s32.totalorder %s6577_s15, 1  ;;  %p140_p8 = scmp.lt.s32.totalorder %s6577_s15, 3 }
   0xc   : > { %p141_p9 = pnand %p5043_p7, %p140_p8 }
   0xe   : > { %144 = sbr.rel (%p141_p9) target bundleno = 612 (0x264), region = 32 }
  0x15   : > { %v5046_v0 = vld [vmem:[%s8548_s1 + $0x2] sm:$0x3]  ;;  %vm706_vm0 = vcmask 1040384   ;;  %vm707_vm1 = vcmask 1041408   ;;  %p164_p10 = scmp.lt.s32.totalorder %s6624_s16, 1  ;;  %v6579_v1 = vmov 65535  }
  0x16   : > { %v708_v2 = vsel %vm706_vm0, 4294967295, %v6579_v1  ;;  %v5273_v3 = vld [vmem:[%s8548_s1 + $0x8] sm:$0x3]  ;;  %v203_v5 = vld [vmem:[%s8548_s1] sm:$0x3]  ;;  %vm657_vm4 = vcmask 23552  }
  0x17   : > { %v6658_v4 = vsel %vm707_vm1, %v708_v2, 0  ;;  %s165_s28 = scalar_select %p164_p10, %s6624_s16, 1  ;;  %v5338_v9 = vld [vmem:[%s8548_s1 + $0xa] sm:$0x3]  ;;  %vm220_vm2 = vsmask.f32 3328 }
  0x18   : > { %v711_v6 = vand.u32 %v5046_v0, %v6658_v4  ;;  %v6666_v7 = vand.u32 %v5273_v3, %v6658_v4  ;;  %v6669_v8 = vand.u32 %v6658_v4, %v203_v5  ;;  %v6675_v10 = vand.u32 %v5338_v9, %v6658_v4  ;;  %v5403_v26 = vld [vmem:[%s8548_s1 + $0xc] sm:$0x3]  ;;  %v5127_v31 = vld [vmem:[%s8548_s1 + $0x4] sm:$0x3]  ;;  %s161_s29 = sand.u32 1, %s6569_s13   ;;  %s5652_s7 = sshll.u32 %s6624_s16, 11 }
  0x19   : > { %s6370_s6 = smul.u32 216, %s165_s28  ;;  %vm221_vm3 = vsmask.f32 7440  ;;  %v6714_v42 = vand.u32 %v5403_v26, %v6658_v4  ;;  %v6717_v46 = vand.u32 %v5127_v31, %v6658_v4  ;;  %vm1214_vm6 = vcmask 1042432   ;;  %s5044_s5 = sshll.u32 %s161_s29, 7 }
  0x1a   : > { %8569 = vst [vmem:[#allocation5_spill] sm:$0xff] %v6666_v7  ;;  %5806 = vmatprep.subr.bf16.mxu1 %v711_v6  ;;  %5942 = vmatprep.subr.bf16.mxu0 %v6666_v7  ;;  %vm6708_vm5 = vmor %vm220_vm2, %vm221_vm3  ;;  %vm1215_vm7 = vcmask 1046532   ;;  %vm4931_vm9 = vcmask 125952   ;;  %s8494_s11 = scalar_lea.hbm %s8550_s3, %s5652_s7  ;;  %s8506_s16 = scalar_lea.sflag [#allocation3], %s161_s29 }
  0x1b   : > { %5807 = vmatpush3.bf16.msra.mxu1 %v711_v6  ;;  %5943 = vmatpush3.bf16.msra.mxu0 %v6666_v7  ;;  %s6682_s9 = scalar_lea.vmem %s8547_s0, %s6370_s6  ;;  %vm6929_vm8 = vmor %vm1214_vm6, %vm1215_vm7  ;;  %s8395_s6 = scalar_lea.vmem [#allocation2], %s5044_s5 }
  0x1c   : > { %v171_v11 = vld [vmem:[%s6682_s9] sm:$0xf]  ;;  %v172_v12 = vld [vmem:[%s6682_s9 + $0x4] sm:$0xf]  ;;  %v204_v13 = vld [vmem:[%s6682_s9 + $0x8] sm:$0x1]  ;;  %5840 = vmatprep.subr.bf16.mxu1 %v6669_v8  ;;  %5976 = vmatprep.subr.bf16.mxu0 %v6675_v10 }
  0x1d   : > { %v224_v14 = vshrl.u32 %v171_v11, 16  ;;  %v227_v15 = vshll.u32 %v171_v11, 16  ;;  %v233_v16 = vshll.u32 %v172_v12, 16  ;;  %v237_v17 = vshrl.u32 %v172_v12, 16  ;;  %v5225_v18 = vld [vmem:[%s6682_s9 + $0xc] sm:$0xf] }
  0x1e   : > { %v243_v19 = vshll.u32 %v204_v13, 16  ;;  %v6691_v20 = vld [vmem:[%s6682_s9 + $0x10] sm:$0xf]  ;;  %v6694_v21 = vld [vmem:[%s6682_s9 + $0x14] sm:$0x1]  ;;  %v2031_v28 = vshrl.u32 %v5225_v18, 16 }
  0x1f   : > { %v226_v22 = vrot.slane %v224_v14, 4  ;;  %v229_v23 = vrot.slane %v227_v15, 5  ;;  %v235_v24 = vrot.slane %v233_v16, 5  ;;  %v239_v25 = vrot.slane %v237_v17, 4  ;;  %v173_v36 = vld [vmem:[%s6682_s9 + $0xc] sm:$0xf] }
  0x20   : > { %v245_v27 = vrot.slane %v243_v19, 5  ;;  %v2034_v29 = vshll.u32 %v5225_v18, 16  ;;  %v2040_v30 = vshll.u32 %v6691_v20, 16  ;;  %v2044_v34 = vshrl.u32 %v6691_v20, 16  ;;  %v174_v41 = vld [vmem:[%s6682_s9 + $0x10] sm:$0xf] }
  0x21   : > { %v230_v32 = vor.u32 %v229_v23, %v226_v22  ;;  %v240_v33 = vor.u32 %v239_v25, %v235_v24  ;;  %v2050_v35 = vshll.u32 %v6694_v21, 16  ;;  %v2033_v38 = vrot.slane %v2031_v28, 4  ;;  %v205_v49 = vld [vmem:[%s6682_s9 + $0x14] sm:$0x1]  ;;  %v5228_v60 = vld [vmem:[%s6682_s9 + $0x18] sm:$0xf] }
  0x22   : > { %v2036_v39 = vrot.slane %v2034_v29, 5  ;;  %v2042_v40 = vrot.slane %v2040_v30, 5  ;;  %v2046_v45 = vrot.slane %v2044_v34, 4  ;;  %v248_v50 = vshrl.u32 %v173_v36, 16  ;;  %v6726_v1 = vld [vmem:[%s6682_s9 + $0x1c] sm:$0xf] }
  0x23   : > { %v231_v43 = vrot.slane %v230_v32, 4  ;;  %v241_v44 = vrot.slane %v240_v33, 4  ;;  %v2052_v48 = vrot.slane %v2050_v35, 5  ;;  %v251_v51 = vshll.u32 %v173_v36, 16  ;;  %v6734_v9 = vld [vmem:[%s6682_s9 + $0x20] sm:$0x1] }
  0x24   : > { %v2037_v47 = vor.u32 %v2036_v39, %v2033_v38  ;;  %v2047_v54 = vor.u32 %v2046_v45, %v2042_v40  ;;  %v257_v55 = vshll.u32 %v174_v41, 16  ;;  %v250_v58 = vrot.slane %v248_v50, 4  ;;  %v175_v25 = vld [vmem:[%s6682_s9 + $0x18] sm:$0xf]  ;;  %v176_v30 = vld [vmem:[%s6682_s9 + $0x1c] sm:$0xf] }
  0x25   : > { %v236_v52 = vsel %vm6708_vm5, %v231_v43, %v235_v24  ;;  %v246_v53 = vsel %vm6708_vm5, %v241_v44, %v245_v27  ;;  %v253_v59 = vrot.slane %v251_v51, 5  ;;  %v261_v63 = vshrl.u32 %v174_v41, 16  ;;  %v206_v38 = vld [vmem:[%s6682_s9 + $0x20] sm:$0x1]  ;;  %s4978_s8 = sshll.u32 %s8395_s6, 4  ;;  %s6580_s19 = smov [#allocation2]   ;;  %s8496_s8 = int_to_ptr.vmem [resolvable:$true] %s4978_s8 }
  0x26   : > { %v5047_v56 = vcombine.low %v236_v52, %v246_v53  ;;  %v2038_v57 = vrot.slane %v2037_v47, 4  ;;  %v2048_v61 = vrot.slane %v2047_v54, 4  ;;  %v259_v62 = vrot.slane %v257_v55, 5  ;;  %v5231_v47 = vld [vmem:[%s6682_s9 + $0x24] sm:$0xf]  ;;  %s6515_s17 = scalar_lea.vmem %s8496_s8, 2048 }
  0x27   : > { %v267_v0 = vshll.u32 %v205_v49, 16  ;;  %v2774_v3 = vrot.slane %v6691_v20, 5  ;;  %v2777_v5 = vrot.slane %v6694_v21, 5  ;;  %v254_v6 = vor.u32 %v253_v59, %v250_v58  ;;  %v6757_v52 = vld [vmem:[%s6682_s9 + $0x28] sm:$0xf]  ;;  %p6516_p11 = scmp.ne.s32.totalorder %s8496_s8, %s6515_s17  ;;  %s6519_s20 = sshll.u32 %s6580_s19, 4  ;;  %s6520_s20 = int_to_ptr.vmem [resolvable:$false] %s6519_s20 }
  0x28   : > { %5808 = vmatprep.mubr.msk.bf16.mxu1 %vm657_vm4, %v5047_v56  ;;  %v2043_v2 = vsel %vm6708_vm5, %v2038_v57, %v2042_v40  ;;  %v2053_v11 = vsel %vm6708_vm5, %v2048_v61, %v2052_v48  ;;  %v263_v12 = vrot.slane %v261_v63, 4  ;;  %v2055_v14 = vshrl.u32 %v5228_v60, 16  ;;  %v6763_v59 = vld [vmem:[%s6682_s9 + $0x2c] sm:$0x1]  ;;  %v6962_v21 = vld [vmem:[%s6682_s9 + $0x7c] sm:$0xf]  ;;  %p6522_p0 = scmp.lt.s32.totalorder %s8496_s8, %s6520_s20 }
  0x29   : > { %v269_v13 = vrot.slane %v267_v0, 5  ;;  %v5274_v15 = vcombine.low %v2043_v2, %v2053_v11  ;;  %v255_v16 = vrot.slane %v254_v6, 4  ;;  %v2058_v17 = vshll.u32 %v5228_v60, 16  ;;  %v177_v6 = vld [vmem:[%s6682_s9 + $0x24] sm:$0xf]  ;;  %p6517_p12 = pnand %p6516_p11, %p6641_p5  ;;  %s6521_s24 = scalar_lea.vmem %s6520_s20, 4096 }
  0x2a   : > { %v2064_v18 = vshll.u32 %v6726_v1, 16  ;;  %v264_v19 = vor.u32 %v263_v12, %v259_v62  ;;  %v2057_v22 = vrot.slane %v2055_v14, 4  ;;  %v2068_v23 = vshrl.u32 %v6726_v1, 16  ;;  %p6523_p1 = scmp.lt.s32.totalorder %s6521_s24, %s6515_s17 }
  0x2b   : > { %v2074_v24 = vshll.u32 %v6734_v9, 16  ;;  %5944 = vmatprep.mubr.msk.bf16.mxu0 %vm657_vm4, %v5274_v15  ;;  %v260_v26 = vsel %vm6708_vm5, %v255_v16, %v259_v62  ;;  %v2060_v27 = vrot.slane %v2058_v17, 5  ;;  %v2781_v29 = vrot.slane %v6726_v1, 5  ;;  %v178_v15 = vld [vmem:[%s6682_s9 + $0x28] sm:$0xf]  ;;  %p6518_p13 = pneg %p6517_p12 }
  0x2c   : > { %v2066_v28 = vrot.slane %v2064_v18, 5  ;;  %v265_v31 = vrot.slane %v264_v19, 4  ;;  %v2070_v32 = vrot.slane %v2068_v23, 4  ;;  %v2784_v34 = vrot.slane %v6734_v9, 5  ;;  %v207_v23 = vld [vmem:[%s6682_s9 + $0x2c] sm:$0x1]  ;;  %p6524_p2 = por %p6523_p1, %p6522_p0 }
  0x2d   : > { %v2076_v33 = vrot.slane %v2074_v24, 5  ;;  %v2061_v35 = vor.u32 %v2060_v27, %v2057_v22  ;;  %v6750_v36 = vrot.slane %v2781_v29, 4  ;;  %v272_v39 = vshrl.u32 %v175_v25, 16 }
  0x2e   : > { %v275_v40 = vshll.u32 %v175_v25, 16  ;;  %v270_v41 = vsel %vm6708_vm5, %v265_v31, %v269_v13  ;;  %v2071_v43 = vor.u32 %v2070_v32, %v2066_v28  ;;  %v281_v44 = vshll.u32 %v176_v30, 16  ;;  %v5234_v31 = vld [vmem:[%s6682_s9 + $0x30] sm:$0xf]  ;;  %p6525_p3 = pnand %p6524_p2, %p6518_p13 }
  0x2f   : > { %v285_v45 = vshrl.u32 %v176_v30, 16  ;;  %v5048_v48 = vcombine.low %v260_v26, %v270_v41  ;;  %v2062_v49 = vrot.slane %v2061_v35, 4  ;;  %v274_v50 = vrot.slane %v272_v39, 4  ;;  %v6783_v39 = vld [vmem:[%s6682_s9 + $0x34] sm:$0xf] }
  0x30   : > { %v277_v51 = vrot.slane %v275_v40, 5  ;;  %v2072_v53 = vrot.slane %v2071_v43, 4  ;;  %v283_v54 = vrot.slane %v281_v44, 5  ;;  %v291_v56 = vshll.u32 %v206_v38, 16 }
  0x31   : > { %v287_v55 = vrot.slane %v285_v45, 4  ;;  %5809 = vmatmul.mubr.msk.bf16.vlgmr.msra.gmra.mrb[0].mxu1 %vm657_vm4, %v5048_v48  ;;  %v2067_v57 = vsel %vm6708_vm5, %v2062_v49, %v2066_v28  ;;  %v2079_v60 = vshrl.u32 %v5231_v47, 16  ;;  %v2082_v61 = vshll.u32 %v5231_v47, 16  ;;  %v6790_v47 = vld [vmem:[%s6682_s9 + $0x38] sm:$0x1] }
  0x32   : > { %v278_v58 = vor.u32 %v277_v51, %v274_v50  ;;  %5841 = vmatpush3.bf16.msra.mxu1 %v6669_v8  ;;  %v2077_v62 = vsel %vm6708_vm5, %v2072_v53, %v2076_v33  ;;  %v293_v0 = vrot.slane %v291_v56, 5  ;;  %v2088_v2 = vshll.u32 %v6757_v52, 16 }
  0x33   : > { %v288_v63 = vor.u32 %v287_v55, %v283_v54  ;;  %v5275_v11 = vcombine.low %v2067_v57, %v2077_v62  ;;  %v2081_v13 = vrot.slane %v2079_v60, 4  ;;  %v2084_v14 = vrot.slane %v2082_v61, 5  ;;  %5874 = vmatprep.subr.bf16.mxu1 %v6717_v46  ;;  %v179_v60 = vld [vmem:[%s6682_s9 + $0x30] sm:$0xf] }
  0x34   : > { %v279_v12 = vrot.slane %v278_v58, 4  ;;  %v2090_v17 = vrot.slane %v2088_v2, 5  ;;  %v2092_v8 = vshrl.u32 %v6757_v52, 16  ;;  %v2098_v18 = vshll.u32 %v6763_v59, 16  ;;  %v180_v2 = vld [vmem:[%s6682_s9 + $0x34] sm:$0xf] }
  0x35   : > { %v289_v16 = vrot.slane %v288_v63, 4  ;;  %5945 = vmatmul.mubr.msk.bf16.vlgmr.msra.gmra.mrb[0].mxu0 %vm657_vm4, %v5275_v11  ;;  %v2085_v22 = vor.u32 %v2084_v14, %v2081_v13  ;;  %v296_v24 = vshrl.u32 %v177_v6, 16  ;;  %v299_v25 = vshll.u32 %v177_v6, 16  ;;  %v208_v14 = vld [vmem:[%s6682_s9 + $0x38] sm:$0x1] }
  0x36   : > { %v284_v19 = vsel %vm6708_vm5, %v279_v12, %v283_v54  ;;  %5977 = vmatpush3.bf16.msra.mxu0 %v6675_v10  ;;  %v2094_v27 = vrot.slane %v2092_v8, 4  ;;  %v2100_v28 = vrot.slane %v2098_v18, 5  ;;  %v305_v30 = vshll.u32 %v178_v15, 16 }
  0x37   : > { %v294_v26 = vsel %vm6708_vm5, %v289_v16, %v293_v0  ;;  %v2086_v33 = vrot.slane %v2085_v22, 4  ;;  %v298_v35 = vrot.slane %v296_v24, 4  ;;  %v301_v38 = vrot.slane %v299_v25, 5  ;;  %6010 = vmatprep.subr.bf16.mxu0 %v6714_v42  ;;  %v5237_v24 = vld [vmem:[%s6682_s9 + $0x3c] sm:$0xf] }
  0x38   : > { %v5049_v32 = vcombine.low %v284_v19, %v294_v26  ;;  %v2095_v40 = vor.u32 %v2094_v27, %v2090_v17  ;;  %v307_v41 = vrot.slane %v305_v30, 5  ;;  %v309_v43 = vshrl.u32 %v178_v15, 16  ;;  %v6807_v30 = vld [vmem:[%s6682_s9 + $0x40] sm:$0xf] }
  0x39   : > { %v315_v10 = vshll.u32 %v207_v23, 16  ;;  %v2091_v44 = vsel %vm6708_vm5, %v2086_v33, %v2090_v17  ;;  %v302_v45 = vor.u32 %v301_v38, %v298_v35  ;;  %v2103_v48 = vshrl.u32 %v5234_v31, 16 }
  0x3a   : > { %5812 = vmatprep.mubr.msk.bf16.mxu1 %vm657_vm4, %v5049_v32  ;;  %v2106_v49 = vshll.u32 %v5234_v31, 16  ;;  %v2096_v50 = vrot.slane %v2095_v40, 4  ;;  %v311_v51 = vrot.slane %v309_v43, 4  ;;  %v2112_v54 = vshll.u32 %v6783_v39, 16  ;;  %v6812_v43 = vld [vmem:[%s6682_s9 + $0x44] sm:$0x1] }
  0x3b   : > { %v317_v53 = vrot.slane %v315_v10, 5  ;;  %v303_v55 = vrot.slane %v302_v45, 4  ;;  %v2105_v56 = vrot.slane %v2103_v48, 4  ;;  %v2116_v58 = vshrl.u32 %v6783_v39, 16 }
  0x3c   : > { %v2108_v57 = vrot.slane %v2106_v49, 5  ;;  %v2101_v61 = vsel %vm6708_vm5, %v2096_v50, %v2100_v28  ;;  %v312_v62 = vor.u32 %v311_v51, %v307_v41  ;;  %v2114_v63 = vrot.slane %v2112_v54, 5  ;;  %v181_v50 = vld [vmem:[%s6682_s9 + $0x3c] sm:$0xf] }
  0x3d   : > { %v2122_v0 = vshll.u32 %v6790_v47, 16  ;;  %v5276_v6 = vcombine.low %v2091_v44, %v2101_v61  ;;  %v308_v11 = vsel %vm6708_vm5, %v303_v55, %v307_v41  ;;  %v2118_v13 = vrot.slane %v2116_v58, 4 }
  0x3e   : > { %v2109_v12 = vor.u32 %v2108_v57, %v2105_v56  ;;  %v313_v15 = vrot.slane %v312_v62, 4  ;;  %v320_v17 = vshrl.u32 %v179_v60, 16  ;;  %v323_v8 = vshll.u32 %v179_v60, 16  ;;  %v182_v56 = vld [vmem:[%s6682_s9 + $0x40] sm:$0xf] }
  0x3f   : > { %v2124_v16 = vrot.slane %v2122_v0, 5  ;;  %5948 = vmatprep.mubr.msk.bf16.mxu0 %vm657_vm4, %v5276_v6  ;;  %v2119_v19 = vor.u32 %v2118_v13, %v2114_v63  ;;  %v329_v22 = vshll.u32 %v180_v2, 16  ;;  %v333_v23 = vshrl.u32 %v180_v2, 16  ;;  %v209_v13 = vld [vmem:[%s6682_s9 + $0x44] sm:$0x1] }
  0x40   : > { %v2110_v18 = vrot.slane %v2109_v12, 4  ;;  %v318_v25 = vsel %vm6708_vm5, %v313_v15, %v317_v53  ;;  %v322_v26 = vrot.slane %v320_v17, 4  ;;  %v325_v27 = vrot.slane %v323_v8, 5  ;;  %v5240_v15 = vld [vmem:[%s6682_s9 + $0x48] sm:$0xf] }
  0x41   : > { %v339_v28 = vshll.u32 %v208_v14, 16  ;;  %v5050_v31 = vcombine.low %v308_v11, %v318_v25  ;;  %v2120_v33 = vrot.slane %v2119_v19, 4  ;;  %v331_v35 = vrot.slane %v329_v22, 5  ;;  %v6830_v19 = vld [vmem:[%s6682_s9 + $0x4c] sm:$0xf] }
  0x42   : > { %v2115_v32 = vsel %vm6708_vm5, %v2110_v18, %v2114_v63  ;;  %v326_v38 = vor.u32 %v325_v27, %v322_v26  ;;  %v335_v40 = vrot.slane %v333_v23, 4  ;;  %v2127_v10 = vshrl.u32 %v5237_v24, 16 }
  0x43   : > { %v341_v41 = vrot.slane %v339_v28, 5  ;;  %5813 = vmatmul.mubr.msk.bf16.gmra.mrb[4].mxu1 %vm657_vm4, %v5050_v31  ;;  %v2125_v44 = vsel %vm6708_vm5, %v2120_v33, %v2124_v16  ;;  %v2130_v45 = vshll.u32 %v5237_v24, 16  ;;  %v2136_v48 = vshll.u32 %v6807_v30, 16 }
  0x44   : > { %v2140_v49 = vshrl.u32 %v6807_v30, 16  ;;  %v5277_v51 = vcombine.low %v2115_v32, %v2125_v44  ;;  %v327_v53 = vrot.slane %v326_v38, 4  ;;  %v336_v54 = vor.u32 %v335_v40, %v331_v35 }
  0x45   : > { %v2129_v55 = vrot.slane %v2127_v10, 4  ;;  %v2132_v57 = vrot.slane %v2130_v45, 5  ;;  %v2138_v58 = vrot.slane %v2136_v48, 5  ;;  %v2146_v61 = vshll.u32 %v6812_v43, 16 }
  0x46   : > { %v2142_v60 = vrot.slane %v2140_v49, 4  ;;  %5949 = vmatmul.mubr.msk.bf16.gmra.mrb[4].mxu0 %vm657_vm4, %v5277_v51  ;;  %v332_v62 = vsel %vm6708_vm5, %v327_v53, %v331_v35  ;;  %v337_v63 = vrot.slane %v336_v54, 4  ;;  %v344_v0 = vshrl.u32 %v181_v50, 16  ;;  %v6838_v35 = vld [vmem:[%s6682_s9 + $0x50] sm:$0x1] }
  0x47   : > { %v347_v2 = vshll.u32 %v181_v50, 16  ;;  %v2133_v6 = vor.u32 %v2132_v57, %v2129_v55  ;;  %v2148_v12 = vrot.slane %v2146_v61, 5  ;;  %v353_v14 = vshll.u32 %v182_v56, 16  ;;  %v6845_v49 = vld [vmem:[%s6682_s9 + $0x4c] sm:$0xf] }
  0x48   : > { %v2143_v11 = vor.u32 %v2142_v60, %v2138_v58  ;;  %v342_v16 = vsel %vm6708_vm5, %v337_v63, %v341_v41  ;;  %v346_v17 = vrot.slane %v344_v0, 4  ;;  %v357_v18 = vshrl.u32 %v182_v56, 16  ;;  %v6842_v41 = vld [vmem:[%s6682_s9 + $0x48] sm:$0xf] }
  0x49   : > { %v349_v8 = vrot.slane %v347_v2, 5  ;;  %v5051_v22 = vcombine.low %v332_v62, %v342_v16  ;;  %v2134_v23 = vrot.slane %v2133_v6, 4  ;;  %v355_v25 = vrot.slane %v353_v14, 5  ;;  %v5243_v2 = vld [vmem:[%s6682_s9 + $0x54] sm:$0xf] }
  0x4a   : > { %v2144_v24 = vrot.slane %v2143_v11, 4  ;;  %v359_v27 = vrot.slane %v357_v18, 4  ;;  %v363_v28 = vshll.u32 %v209_v13, 16  ;;  %v2151_v31 = vshrl.u32 %v5240_v15, 16 }
  0x4b   : > { %v350_v26 = vor.u32 %v349_v8, %v346_v17  ;;  %5816 = vmatprep.mubr.msk.bf16.mxu1 %vm657_vm4, %v5051_v22  ;;  %v2139_v32 = vsel %vm6708_vm5, %v2134_v23, %v2138_v58  ;;  %v2154_v38 = vshll.u32 %v5240_v15, 16  ;;  %v2160_v40 = vshll.u32 %v6830_v19, 16  ;;  %v210_v58 = vld [vmem:[%s6682_s9 + $0x50] sm:$0x1]  ;;  %v6861_v8 = vld [vmem:[%s6682_s9 + $0x58] sm:$0xf] }
  0x4c   : > { %v2149_v33 = vsel %vm6708_vm5, %v2144_v24, %v2148_v12  ;;  %v360_v45 = vor.u32 %v359_v27, %v355_v25  ;;  %v365_v48 = vrot.slane %v363_v28, 5  ;;  %v2153_v50 = vrot.slane %v2151_v31, 4  ;;  %v6867_v28 = vld [vmem:[%s6682_s9 + $0x5c] sm:$0x1] }
  0x4d   : > { %v5278_v10 = vcombine.low %v2139_v32, %v2149_v33  ;;  %v351_v44 = vrot.slane %v350_v26, 4  ;;  %v2156_v51 = vrot.slane %v2154_v38, 5  ;;  %v2162_v53 = vrot.slane %v2160_v40, 5 }
  0x4e   : > { %v2164_v54 = vshrl.u32 %v6830_v19, 16  ;;  %v361_v56 = vrot.slane %v360_v45, 4  ;;  %v2170_v57 = vshll.u32 %v6838_v35, 16  ;;  %v368_v60 = vshrl.u32 %v6842_v41, 16 }
  0x4f   : > { %5952 = vmatprep.mubr.msk.bf16.mxu0 %vm657_vm4, %v5278_v10  ;;  %v356_v55 = vsel %vm6708_vm5, %v351_v44, %v355_v25  ;;  %v2157_v61 = vor.u32 %v2156_v51, %v2153_v50  ;;  %v371_v63 = vshll.u32 %v6842_v41, 16  ;;  %v377_v0 = vshll.u32 %v6845_v49, 16  ;;  %v6871_v10 = vld [vmem:[%s6682_s9 + $0x54] sm:$0xf]  ;;  %v6877_v51 = vld [vmem:[%s6682_s9 + $0x58] sm:$0xf] }
  0x50   : > { %v2166_v62 = vrot.slane %v2164_v54, 4  ;;  %v366_v6 = vsel %vm6708_vm5, %v361_v56, %v365_v48  ;;  %v2172_v11 = vrot.slane %v2170_v57, 5  ;;  %v370_v12 = vrot.slane %v368_v60, 4 }
  0x51   : > { %v381_v13 = vshrl.u32 %v6845_v49, 16  ;;  %v5052_v14 = vcombine.low %v356_v55, %v366_v6  ;;  %v2158_v15 = vrot.slane %v2157_v61, 4  ;;  %v373_v17 = vrot.slane %v371_v63, 5  ;;  %v211_v61 = vld [vmem:[%s6682_s9 + $0x5c] sm:$0x1] }
  0x52   : > { %v2167_v16 = vor.u32 %v2166_v62, %v2162_v53  ;;  %v379_v18 = vrot.slane %v377_v0, 5  ;;  %v387_v23 = vshll.u32 %v210_v58, 16  ;;  %v2175_v24 = vshrl.u32 %v5243_v2, 16 }
  0x53   : > { %v383_v22 = vrot.slane %v381_v13, 4  ;;  %5817 = vmatmul.mubr.msk.bf16.gmra.mrb[8].mxu1 %vm657_vm4, %v5052_v14  ;;  %v2163_v25 = vsel %vm6708_vm5, %v2158_v15, %v2162_v53  ;;  %v374_v27 = vor.u32 %v373_v17, %v370_v12  ;;  %v2178_v31 = vshll.u32 %v5243_v2, 16 }
  0x54   : > { %v2168_v26 = vrot.slane %v2167_v16, 4  ;;  %v389_v33 = vrot.slane %v387_v23, 5  ;;  %v2177_v38 = vrot.slane %v2175_v24, 4  ;;  %v2184_v40 = vshll.u32 %v6861_v8, 16  ;;  %v6891_v16 = vld [vmem:[%s6682_s9 + $0x64] sm:$0xf] }
  0x55   : > { %v384_v32 = vor.u32 %v383_v22, %v379_v18  ;;  %v375_v45 = vrot.slane %v374_v27, 4  ;;  %v2180_v48 = vrot.slane %v2178_v31, 5  ;;  %v2188_v50 = vshrl.u32 %v6861_v8, 16 }
  0x56   : > { %v2173_v44 = vsel %vm6708_vm5, %v2168_v26, %v2172_v11  ;;  %v2186_v55 = vrot.slane %v2184_v40, 5  ;;  %v2194_v56 = vshll.u32 %v6867_v28, 16  ;;  %v392_v62 = vshrl.u32 %v6871_v10, 16  ;;  %v5246_v11 = vld [vmem:[%s6682_s9 + $0x60] sm:$0xf] }
  0x57   : > { %v5279_v53 = vcombine.low %v2163_v25, %v2173_v44  ;;  %v385_v54 = vrot.slane %v384_v32, 4  ;;  %v380_v57 = vsel %vm6708_vm5, %v375_v45, %v379_v18  ;;  %v2181_v58 = vor.u32 %v2180_v48, %v2177_v38  ;;  %v6898_v26 = vld [vmem:[%s6682_s9 + $0x68] sm:$0x1]  ;;  %v6902_v44 = vld [vmem:[%s6682_s9 + $0x60] sm:$0xf] }
  0x58   : > { %v2190_v60 = vrot.slane %v2188_v50, 4  ;;  %v2196_v0 = vrot.slane %v2194_v56, 5  ;;  %v395_v2 = vshll.u32 %v6871_v10, 16  ;;  %v401_v6 = vshll.u32 %v6877_v51, 16 }
  0x59   : > { %5953 = vmatmul.mubr.msk.bf16.gmra.mrb[8].mxu0 %vm657_vm4, %v5279_v53  ;;  %v390_v63 = vsel %vm6708_vm5, %v385_v54, %v389_v33  ;;  %v2182_v13 = vrot.slane %v2181_v58, 4  ;;  %v394_v15 = vrot.slane %v392_v62, 4  ;;  %v405_v22 = vshrl.u32 %v6877_v51, 16  ;;  %v6908_v54 = vld [vmem:[%s6682_s9 + $0x64] sm:$0xf] }
  0x5a   : > { %v5053_v12 = vcombine.low %v380_v57, %v390_v63  ;;  %v2191_v14 = vor.u32 %v2190_v60, %v2186_v55  ;;  %v397_v17 = vrot.slane %v395_v2, 5  ;;  %v403_v18 = vrot.slane %v401_v6, 5  ;;  %v212_v6 = vld [vmem:[%s6682_s9 + $0x68] sm:$0x1] }
  0x5b   : > { %v411_v23 = vshll.u32 %v211_v61, 16  ;;  %v2187_v24 = vsel %vm6708_vm5, %v2182_v13, %v2186_v55  ;;  %v2199_v27 = vshrl.u32 %v5246_v11, 16  ;;  %v2202_v31 = vshll.u32 %v5246_v11, 16 }
  0x5c   : > { %5820 = vmatprep.mubr.msk.bf16.mxu1 %vm657_vm4, %v5053_v12  ;;  %v2192_v25 = vrot.slane %v2191_v14, 4  ;;  %v398_v32 = vor.u32 %v397_v17, %v394_v15  ;;  %v407_v33 = vrot.slane %v405_v22, 4  ;;  %v2208_v40 = vshll.u32 %v6891_v16, 16  ;;  %v5306_v22 = vld [vmem:[%s6682_s9 + $0xc] sm:$0xe] }
  0x5d   : > { %v413_v38 = vrot.slane %v411_v23, 5  ;;  %v2201_v48 = vrot.slane %v2199_v27, 4  ;;  %v2204_v50 = vrot.slane %v2202_v31, 5  ;;  %v2212_v53 = vshrl.u32 %v6891_v16, 16 }
  0x5e   : > { %v2197_v45 = vsel %vm6708_vm5, %v2192_v25, %v2196_v0  ;;  %v399_v56 = vrot.slane %v398_v32, 4  ;;  %v408_v57 = vor.u32 %v407_v33, %v403_v18  ;;  %v2210_v58 = vrot.slane %v2208_v40, 5 }
  0x5f   : > { %v5280_v55 = vcombine.low %v2187_v24, %v2197_v45  ;;  %v2205_v60 = vor.u32 %v2204_v50, %v2201_v48  ;;  %v2214_v61 = vrot.slane %v2212_v53, 4  ;;  %v2218_v62 = vshll.u32 %v6898_v26, 16 }
  0x60   : > { %v416_v63 = vshrl.u32 %v6902_v44, 16  ;;  %v404_v0 = vsel %vm6708_vm5, %v399_v56, %v403_v18  ;;  %v409_v2 = vrot.slane %v408_v57, 4  ;;  %v419_v11 = vshll.u32 %v6902_v44, 16  ;;  %v6923_v18 = vld [vmem:[%s6682_s9 + $0x6c] sm:$0xf] }
  0x61   : > { %5956 = vmatprep.mubr.msk.bf16.mxu0 %vm657_vm4, %v5280_v55  ;;  %v425_v12 = vshll.u32 %v6908_v54, 16  ;;  %v2206_v13 = vrot.slane %v2205_v60, 4  ;;  %v2215_v14 = vor.u32 %v2214_v61, %v2210_v58  ;;  %v2220_v15 = vrot.slane %v2218_v62, 5  ;;  %v6936_v55 = vld [vmem:[%s6682_s9 + $0x70] sm:$0xf] }
  0x62   : > { %v418_v17 = vrot.slane %v416_v63, 4  ;;  %v414_v23 = vsel %vm6708_vm5, %v409_v2, %v413_v38  ;;  %v421_v24 = vrot.slane %v419_v11, 5  ;;  %v429_v27 = vshrl.u32 %v6908_v54, 16  ;;  %v213_v2 = vld [vmem:[%s6682_s9 + $0x74] sm:$0x1] }
  0x63   : > { %v427_v25 = vrot.slane %v425_v12, 5  ;;  %v5054_v31 = vcombine.low %v404_v0, %v414_v23  ;;  %v2211_v32 = vsel %vm6708_vm5, %v2206_v13, %v2210_v58  ;;  %v2216_v33 = vrot.slane %v2215_v14, 4  ;;  %v214_v23 = vld [vmem:[%s6682_s9 + $0x80] sm:$0x1] }
  0x64   : > { %v435_v40 = vshll.u32 %v212_v6, 16  ;;  %v422_v38 = vor.u32 %v421_v24, %v418_v17  ;;  %v431_v48 = vrot.slane %v429_v27, 4  ;;  %v5322_v50 = vrot.slane %v5306_v22, 9  ;;  %v5307_v6 = vld [vmem:[%s6682_s9 + $0x18] sm:$0xe] }
  0x65   : > { %v2776_v53 = vrot.slane %v2774_v3, 4  ;;  %5821 = vmatmul.mubr.msk.bf16.gmra.mrb[12].mxu1 %vm657_vm4, %v5054_v31  ;;  %v2221_v56 = vsel %vm6708_vm5, %v2216_v33, %v2220_v15  ;;  %v440_v58 = vshrl.u32 %v6923_v18, 16  ;;  %v443_v60 = vshll.u32 %v6923_v18, 16  ;;  %v6955_v15 = vld [vmem:[%s6682_s9 + $0x78] sm:$0xf] }
  0x66   : > { %v437_v57 = vrot.slane %v435_v40, 5  ;;  %v5281_v61 = vcombine.low %v2211_v32, %v2221_v56  ;;  %v423_v62 = vrot.slane %v422_v38, 4  ;;  %v432_v63 = vor.u32 %v431_v48, %v427_v25  ;;  %v5308_v38 = vld [vmem:[%s6682_s9 + $0x24] sm:$0xe] }
  0x67   : > { %v2775_v0 = vsel %vm6929_vm8, %v5322_v50, %v2774_v3  ;;  %v2778_v11 = vsel %vm6929_vm8, %v2776_v53, %v2777_v5  ;;  %v442_v12 = vrot.slane %v440_v58, 4  ;;  %v445_v13 = vrot.slane %v443_v60, 5 }
  0x68   : > { %v449_v14 = vshll.u32 %v6936_v55, 16  ;;  %5957 = vmatmul.mubr.msk.bf16.gmra.mrb[12].mxu0 %vm657_vm4, %v5281_v61  ;;  %v428_v20 = vsel %vm6708_vm5, %v423_v62, %v427_v25  ;;  %v433_v3 = vrot.slane %v432_v63, 4  ;;  %v5339_v17 = vcombine.low %v2775_v0, %v2778_v11  ;;  %v6981_v61 = vld [vmem:[%s6682_s9 + $0x84] sm:$0xf] }
  0x69   : > { %v453_v22 = vshrl.u32 %v6936_v55, 16  ;;  %v446_v5 = vor.u32 %v445_v13, %v442_v12  ;;  %v459_v27 = vshll.u32 %v213_v2, 16  ;;  %v5323_v31 = vrot.slane %v5307_v6, 9 }
  0x6a   : > { %v451_v24 = vrot.slane %v449_v14, 5  ;;  %v438_v32 = vsel %vm6708_vm5, %v433_v3, %v437_v57  ;;  %5978 = vmatprep.mubr.msk.bf16.mxu0 %vm657_vm4, %v5339_v17  ;;  %v2785_v25 = vsel %vm6929_vm8, %v6750_v36, %v2784_v34  ;;  %v464_v40 = vshrl.u32 %v6955_v15, 16 }
  0x6b   : > { %v455_v33 = vrot.slane %v453_v22, 4  ;;  %v5055_v48 = vcombine.low %v428_v20, %v438_v32  ;;  %v447_v50 = vrot.slane %v446_v5, 4  ;;  %v461_v53 = vrot.slane %v459_v27, 5  ;;  %v215_v20 = vld [vmem:[%s6682_s9 + $0x8c] sm:$0x1] }
  0x6c   : > { %v2782_v56 = vsel %vm6929_vm8, %v5323_v31, %v2781_v29  ;;  %v466_v60 = vrot.slane %v464_v40, 4  ;;  %v467_v9 = vshll.u32 %v6955_v15, 16  ;;  %v473_v36 = vshll.u32 %v6962_v21, 16  ;;  %v6989_v29 = vld [vmem:[%s6682_s9 + $0x88] sm:$0xf] }
  0x6d   : > { %v456_v57 = vor.u32 %v455_v33, %v451_v24  ;;  %v5340_v58 = vcombine.low %v2782_v56, %v2785_v25  ;;  %5824 = vmatprep.mubr.msk.bf16.mxu1 %vm657_vm4, %v5055_v48  ;;  %v452_v34 = vsel %vm6708_vm5, %v447_v50, %v451_v24  ;;  %v477_v1 = vshrl.u32 %v6962_v21, 16  ;;  %v5309_v5 = vld [vmem:[%s6682_s9 + $0x30] sm:$0xe] }
  0x6e   : > { %v483_v62 = vshll.u32 %v214_v23, 16  ;;  %v469_v0 = vrot.slane %v467_v9, 5  ;;  %v5324_v2 = vrot.slane %v5308_v38, 9  ;;  %v2788_v6 = vrot.slane %v6757_v52, 5  ;;  %v7008_v40 = vld [vmem:[%s6682_s9 + $0x90] sm:$0xf] }
  0x6f   : > { %v457_v63 = vrot.slane %v456_v57, 4  ;;  %v475_v11 = vrot.slane %v473_v36, 5  ;;  %v479_v12 = vrot.slane %v477_v1, 4  ;;  %v2791_v14 = vrot.slane %v6763_v59, 5  ;;  %v7018_v1 = vld [vmem:[%s6682_s9 + $0x94] sm:$0xf] }
  0x70   : > { %v485_v13 = vrot.slane %v483_v62, 5  ;;  %5979 = vmatmul.mubr.msk.bf16.vlgmr.msra.gmra.mrb[0].mxu0 %vm657_vm4, %v5340_v58  ;;  %v470_v17 = vor.u32 %v469_v0, %v466_v60  ;;  %v2789_v22 = vsel %vm6929_vm8, %v5324_v2, %v2788_v6  ;;  %v2790_v23 = vrot.slane %v2788_v6, 4  ;;  %v216_v62 = vld [vmem:[%s6682_s9 + $0x98] sm:$0x1] }
  0x71   : > { %v462_v3 = vsel %vm6708_vm5, %v457_v63, %v461_v53  ;;  %6011 = vmatpush3.bf16.msra.mxu0 %v6714_v42  ;;  %v480_v52 = vor.u32 %v479_v12, %v475_v11  ;;  %v488_v27 = vshrl.u32 %v6981_v61, 16  ;;  %v491_v59 = vshll.u32 %v6981_v61, 16 }
  0x72   : > { %v5056_v24 = vcombine.low %v452_v34, %v462_v3  ;;  %v471_v31 = vrot.slane %v470_v17, 4  ;;  %v2792_v32 = vsel %vm6929_vm8, %v2790_v23, %v2791_v14  ;;  %v497_v33 = vshll.u32 %v6989_v29, 16  ;;  %v7027_v3 = vld [vmem:[%s6682_s9 + $0x9c] sm:$0xf] }
  0x73   : > { %v501_v25 = vshrl.u32 %v6989_v29, 16  ;;  %v481_v42 = vrot.slane %v480_v52, 4  ;;  %v5341_v38 = vcombine.low %v2789_v22, %v2792_v32  ;;  %v490_v48 = vrot.slane %v488_v27, 4  ;;  %v7038_v27 = vld [vmem:[%s6682_s9 + $0xa0] sm:$0xf] }
  0x74   : > { %5825 = vmatmul.mubr.msk.bf16.gmra.mrb[16].mxu1 %vm657_vm4, %v5056_v24  ;;  %v493_v50 = vrot.slane %v491_v59, 5  ;;  %v476_v53 = vsel %vm6708_vm5, %v471_v31, %v475_v11  ;;  %v499_v56 = vrot.slane %v497_v33, 5  ;;  %v507_v58 = vshll.u32 %v215_v20, 16  ;;  %v5310_v11 = vld [vmem:[%s6682_s9 + $0x3c] sm:$0xe] }
  0x75   : > { %v503_v57 = vrot.slane %v501_v25, 4  ;;  %v486_v60 = vsel %vm6708_vm5, %v481_v42, %v485_v13  ;;  %5982 = vmatprep.mubr.msk.bf16.mxu0 %vm657_vm4, %v5341_v38  ;;  %v5325_v34 = vrot.slane %v5309_v5, 9  ;;  %v2795_v36 = vrot.slane %v6783_v39, 5 }
  0x76   : > { %v494_v9 = vor.u32 %v493_v50, %v490_v48  ;;  %v5057_v63 = vcombine.low %v476_v53, %v486_v60  ;;  %v509_v2 = vrot.slane %v507_v58, 5  ;;  %v2798_v6 = vrot.slane %v6790_v47, 5  ;;  %v217_v50 = vld [vmem:[%s6682_s9 + $0xa4] sm:$0x1]  ;;  %v5311_v53 = vld [vmem:[%s6682_s9 + $0x48] sm:$0xe] }
  0x77   : > { %v504_v0 = vor.u32 %v503_v57, %v499_v56  ;;  %v2796_v13 = vsel %vm6929_vm8, %v5325_v34, %v2795_v36  ;;  %v2797_v14 = vrot.slane %v2795_v36, 4  ;;  %v512_v20 = vshrl.u32 %v7008_v40, 16 }
  0x78   : > { %v495_v12 = vrot.slane %v494_v9, 4  ;;  %5828 = vmatprep.mubr.msk.bf16.mxu1 %vm657_vm4, %v5057_v63  ;;  %v515_v17 = vshll.u32 %v7008_v40, 16  ;;  %v521_v22 = vshll.u32 %v7018_v1, 16  ;;  %v525_v47 = vshrl.u32 %v7018_v1, 16 }
  0x79   : > { %v505_v39 = vrot.slane %v504_v0, 4  ;;  %v2799_v5 = vsel %vm6929_vm8, %v2797_v14, %v2798_v6  ;;  %v514_v24 = vrot.slane %v512_v20, 4  ;;  %v531_v52 = vshll.u32 %v216_v62, 16 }
  0x7a   : > { %v500_v23 = vsel %vm6708_vm5, %v495_v12, %v499_v56  ;;  %v5342_v31 = vcombine.low %v2796_v13, %v2799_v5  ;;  %v517_v32 = vrot.slane %v515_v17, 5  ;;  %v523_v33 = vrot.slane %v521_v22, 5  ;;  %v7059_v17 = vld [vmem:[%s6682_s9 + $0xa8] sm:$0xf] }
  0x7b   : > { %v510_v59 = vsel %vm6708_vm5, %v505_v39, %v509_v2  ;;  %v527_v42 = vrot.slane %v525_v47, 4  ;;  %v533_v38 = vrot.slane %v531_v52, 5  ;;  %v5326_v48 = vrot.slane %v5310_v11, 9 }
  0x7c   : > { %v5058_v25 = vcombine.low %v500_v23, %v510_v59  ;;  %5983 = vmatmul.mubr.msk.bf16.gmra.mrb[4].mxu0 %vm657_vm4, %v5342_v31  ;;  %v518_v56 = vor.u32 %v517_v32, %v514_v24  ;;  %v2802_v57 = vrot.slane %v6807_v30, 5  ;;  %v2805_v58 = vrot.slane %v6812_v43, 5  ;;  %v7064_v24 = vld [vmem:[%s6682_s9 + $0xac] sm:$0xf] }
  0x7d   : > { %v536_v60 = vshrl.u32 %v7027_v3, 16  ;;  %v528_v9 = vor.u32 %v527_v42, %v523_v33  ;;  %v539_v34 = vshll.u32 %v7027_v3, 16  ;;  %v545_v36 = vshll.u32 %v7038_v27, 16 }
  0x7e   : > { %5829 = vmatmul.mubr.msk.bf16.gmra.mrb[20].mxu1 %vm657_vm4, %v5058_v25  ;;  %v549_v62 = vshrl.u32 %v7038_v27, 16  ;;  %v519_v63 = vrot.slane %v518_v56, 4  ;;  %v2803_v0 = vsel %vm6929_vm8, %v5326_v48, %v2802_v57  ;;  %v2804_v30 = vrot.slane %v2802_v57, 4  ;;  %v5312_v25 = vld [vmem:[%s6682_s9 + $0x54] sm:$0xe] }
  0x7f   : > { %v538_v2 = vrot.slane %v536_v60, 4  ;;  %v529_v43 = vrot.slane %v528_v9, 4  ;;  %v541_v6 = vrot.slane %v539_v34, 5  ;;  %v547_v11 = vrot.slane %v545_v36, 5  ;;  %v7079_v57 = vld [vmem:[%s6682_s9 + $0xb4] sm:$0xf] }
  0x80   : > { %v551_v12 = vrot.slane %v549_v62, 4  ;;  %v524_v13 = vsel %vm6708_vm5, %v519_v63, %v523_v33  ;;  %v2806_v14 = vsel %vm6929_vm8, %v2804_v30, %v2805_v58  ;;  %v555_v20 = vshll.u32 %v217_v50, 16  ;;  %v218_v33 = vld [vmem:[%s6682_s9 + $0xb0] sm:$0x1]  ;;  %v7088_v30 = vld [vmem:[%s6682_s9 + $0xb8] sm:$0xf] }
  0x81   : > { %v5327_v39 = vrot.slane %v5311_v53, 9  ;;  %v534_v22 = vsel %vm6708_vm5, %v529_v43, %v533_v38  ;;  %v5343_v47 = vcombine.low %v2803_v0, %v2806_v14  ;;  %v542_v23 = vor.u32 %v541_v6, %v538_v2 }
  0x82   : > { %v552_v5 = vor.u32 %v551_v12, %v547_v11  ;;  %v5059_v52 = vcombine.low %v524_v13, %v534_v22  ;;  %v557_v59 = vrot.slane %v555_v20, 5  ;;  %v2809_v31 = vrot.slane %v6830_v19, 5  ;;  %v7094_v20 = vld [vmem:[%s6682_s9 + $0xbc] sm:$0x1] }
  0x83   : > { %v2812_v32 = vrot.slane %v6838_v35, 5  ;;  %5986 = vmatprep.mubr.msk.bf16.mxu0 %vm657_vm4, %v5343_v47  ;;  %v543_v42 = vrot.slane %v542_v23, 4  ;;  %v560_v38 = vshrl.u32 %v7059_v17, 16  ;;  %v563_v50 = vshll.u32 %v7059_v17, 16 }
  0x84   : > { %v553_v48 = vrot.slane %v552_v5, 4  ;;  %5832 = vmatprep.mubr.msk.bf16.mxu1 %vm657_vm4, %v5059_v52  ;;  %v2810_v53 = vsel %vm6929_vm8, %v5327_v39, %v2809_v31  ;;  %v2811_v56 = vrot.slane %v2809_v31, 4  ;;  %v569_v19 = vshll.u32 %v7064_v24, 16  ;;  %v5313_v52 = vld [vmem:[%s6682_s9 + $0x60] sm:$0xe] }
  0x85   : > { %v573_v35 = vshrl.u32 %v7064_v24, 16  ;;  %v548_v58 = vsel %vm6708_vm5, %v543_v42, %v547_v11  ;;  %v562_v9 = vrot.slane %v560_v38, 4  ;;  %v565_v34 = vrot.slane %v563_v50, 5 }
  0x86   : > { %v558_v60 = vsel %vm6708_vm5, %v553_v48, %v557_v59  ;;  %v2813_v62 = vsel %vm6929_vm8, %v2811_v56, %v2812_v32  ;;  %v571_v63 = vrot.slane %v569_v19, 5  ;;  %v579_v6 = vshll.u32 %v218_v33, 16  ;;  %v5314_v48 = vld [vmem:[%s6682_s9 + $0x6c] sm:$0xe]  ;;  %v5250_v19 = vld [vmem:[%s6682_s9 + $0x70] sm:$0xf] }
  0x87   : > { %v5060_v36 = vcombine.low %v548_v58, %v558_v60  ;;  %v575_v0 = vrot.slane %v573_v35, 4  ;;  %v5344_v2 = vcombine.low %v2810_v53, %v2813_v62  ;;  %v566_v43 = vor.u32 %v565_v34, %v562_v9  ;;  %v5251_v35 = vld [vmem:[%s6682_s9 + $0x74] sm:$0x1] }
  0x88   : > { %v5328_v12 = vrot.slane %v5312_v25, 9  ;;  %v2816_v13 = vrot.slane %v6861_v8, 5  ;;  %v2819_v14 = vrot.slane %v6867_v28, 5  ;;  %v584_v39 = vshrl.u32 %v7079_v57, 16 }
  0x89   : > { %5833 = vmatmul.mubr.msk.bf16.gmra.mrb[24].mxu1 %vm657_vm4, %v5060_v36  ;;  %v576_v11 = vor.u32 %v575_v0, %v571_v63  ;;  %5987 = vmatmul.mubr.msk.bf16.gmra.mrb[8].mxu0 %vm657_vm4, %v5344_v2  ;;  %v567_v22 = vrot.slane %v566_v43, 4  ;;  %v581_v47 = vrot.slane %v579_v6, 5  ;;  %v587_v23 = vshll.u32 %v7079_v57, 16 }
  0x8a   : > { %v593_v5 = vshll.u32 %v7088_v30, 16  ;;  %v2817_v8 = vsel %vm6929_vm8, %v5328_v12, %v2816_v13  ;;  %v2818_v28 = vrot.slane %v2816_v13, 4  ;;  %v586_v31 = vrot.slane %v584_v39, 4  ;;  %v5315_v13 = vld [vmem:[%s6682_s9 + $0x78] sm:$0xe] }
  0x8b   : > { %v577_v59 = vrot.slane %v576_v11, 4  ;;  %v572_v32 = vsel %vm6708_vm5, %v567_v22, %v571_v63  ;;  %v589_v33 = vrot.slane %v587_v23, 5  ;;  %v597_v42 = vshrl.u32 %v7088_v30, 16  ;;  %v6461_v23 = vld [vmem:[%s6682_s9] sm:$0xf] }
  0x8c   : > { %v595_v25 = vrot.slane %v593_v5, 5  ;;  %v2820_v50 = vsel %vm6929_vm8, %v2818_v28, %v2819_v14  ;;  %v603_v53 = vshll.u32 %v7094_v20, 16  ;;  %v5329_v56 = vrot.slane %v5313_v52, 9  ;;  %v7129_v5 = vld [vmem:[%s6682_s9 + $0x4] sm:$0xf] }
  0x8d   : > { %v582_v38 = vsel %vm6708_vm5, %v577_v59, %v581_v47  ;;  %v5345_v60 = vcombine.low %v2817_v8, %v2820_v50  ;;  %v590_v9 = vor.u32 %v589_v33, %v586_v31  ;;  %v599_v34 = vrot.slane %v597_v42, 4  ;;  %v7133_v59 = vld [vmem:[%s6682_s9 + $0x7c] sm:$0xf]  ;;  %v7136_v8 = vld [vmem:[%s6682_s9 + $0x80] sm:$0x1] }
  0x8e   : > { %v5061_v58 = vcombine.low %v572_v32, %v582_v38  ;;  %v605_v36 = vrot.slane %v603_v53, 5  ;;  %v2823_v62 = vrot.slane %v6891_v16, 5  ;;  %v2826_v63 = vrot.slane %v6898_v26, 5  ;;  %v5316_v28 = vld [vmem:[%s6682_s9 + $0x84] sm:$0xe] }
  0x8f   : > { %v5330_v0 = vrot.slane %v5314_v48, 9  ;;  %5990 = vmatprep.mubr.msk.bf16.mxu0 %vm657_vm4, %v5345_v60  ;;  %v591_v2 = vrot.slane %v590_v9, 4  ;;  %v600_v43 = vor.u32 %v599_v34, %v595_v25  ;;  %v2830_v6 = vrot.slane %v5250_v19, 5  ;;  %v5256_v42 = vld [vmem:[%s6682_s9 + $0x88] sm:$0xf] }
  0x90   : > { %5836 = vmatprep.mubr.msk.bf16.mxu1 %vm657_vm4, %v5061_v58  ;;  %v2833_v12 = vrot.slane %v5251_v35, 5  ;;  %v2824_v11 = vsel %vm6929_vm8, %v5329_v56, %v2823_v62  ;;  %v2825_v16 = vrot.slane %v2823_v62, 4  ;;  %v5079_v52 = vcombine.low %v6461_v23, %v7129_v5  ;;  %v5257_v48 = vld [vmem:[%s6682_s9 + $0x8c] sm:$0x1]  ;;  %v5259_v53 = vld [vmem:[%s6682_s9 + $0x94] sm:$0xf] }
  0x91   : > { %v596_v26 = vsel %vm6708_vm5, %v591_v2, %v595_v25  ;;  %v601_v14 = vrot.slane %v600_v43, 4  ;;  %v2831_v39 = vsel %vm6929_vm8, %v5330_v0, %v2830_v6  ;;  %v2832_v22 = vrot.slane %v2830_v6, 4  ;;  %v5260_v9 = vld [vmem:[%s6682_s9 + $0x98] sm:$0x1]  ;;  %v5317_v34 = vld [vmem:[%s6682_s9 + $0x90] sm:$0xe] }
  0x92   : > { %v2827_v47 = vsel %vm6929_vm8, %v2825_v16, %v2826_v63  ;;  %v5331_v25 = vrot.slane %v5315_v13, 9  ;;  %v2837_v56 = vrot.slane %v7133_v59, 5  ;;  %v2840_v19 = vrot.slane %v7136_v8, 5  ;;  %v5262_v0 = vld [vmem:[%s6682_s9 + $0xa0] sm:$0xf] }
  0x93   : > { %v606_v31 = vsel %vm6708_vm5, %v601_v14, %v605_v36  ;;  %v5346_v32 = vcombine.low %v2824_v11, %v2827_v47  ;;  %v2834_v33 = vsel %vm6929_vm8, %v2832_v22, %v2833_v12  ;;  %v5332_v35 = vrot.slane %v5316_v28, 9  ;;  %v5263_v6 = vld [vmem:[%s6682_s9 + $0xa4] sm:$0x1]  ;;  %v5318_v12 = vld [vmem:[%s6682_s9 + $0x9c] sm:$0xe] }
  0x94   : > { %v5062_v38 = vcombine.low %v596_v26, %v606_v31  ;;  %v5347_v50 = vcombine.low %v2831_v39, %v2834_v33  ;;  %v2844_v58 = vrot.slane %v5256_v42, 5  ;;  %v2847_v60 = vrot.slane %v5257_v48, 5  ;;  %v6463_v11 = vld [vmem:[%s6682_s9 + $0xc] sm:$0xf]  ;;  %v7163_v16 = vld [vmem:[%s6682_s9 + $0x10] sm:$0xf] }
  0x95   : > { %5991 = vmatmul.mubr.msk.bf16.gmra.mrb[12].mxu0 %vm657_vm4, %v5346_v32  ;;  %v2838_v36 = vsel %vm6929_vm8, %v5331_v25, %v2837_v56  ;;  %v2839_v62 = vrot.slane %v2837_v56, 4  ;;  %v2851_v63 = vrot.slane %v5259_v53, 5  ;;  %v5080_v13 = vcombine.low %v6463_v11, %v7163_v16  ;;  %v6465_v28 = vld [vmem:[%s6682_s9 + $0x18] sm:$0xf]  ;;  %v7172_v31 = vld [vmem:[%s6682_s9 + $0x1c] sm:$0xf] }
  0x96   : > { %5837 = vmatmul.mubr.msk.bf16.gmra.mrb[28].mxu1 %vm657_vm4, %v5062_v38  ;;  %5994 = vmatprep.mubr.msk.bf16.mxu0 %vm657_vm4, %v5347_v50  ;;  %v2845_v2 = vsel %vm6929_vm8, %v5332_v35, %v2844_v58  ;;  %v2846_v43 = vrot.slane %v2844_v58, 4  ;;  %v5333_v14 = vrot.slane %v5317_v34, 9  ;;  %v2854_v39 = vrot.slane %v5260_v9, 5  ;;  %v5265_v48 = vld [vmem:[%s6682_s9 + $0xac] sm:$0xf] }
  0x97   : > { %5842 = vmatprep.mubr.msk.bf16.mxu1 %vm657_vm4, %v5079_v52  ;;  %v2841_v26 = vsel %vm6929_vm8, %v2839_v62, %v2840_v19  ;;  %v2853_v23 = vrot.slane %v2851_v63, 4  ;;  %v2858_v52 = vrot.slane %v5262_v0, 5  ;;  %v5081_v32 = vcombine.low %v6465_v28, %v7172_v31  ;;  %v5268_v50 = vld [vmem:[%s6682_s9 + $0xb8] sm:$0xf]  ;;  %v5266_v53 = vld [vmem:[%s6682_s9 + $0xb0] sm:$0x1] }
  0x98   : > { %v5348_v22 = vcombine.low %v2838_v36, %v2841_v26  ;;  %v2848_v47 = vsel %vm6929_vm8, %v2846_v43, %v2847_v60  ;;  %v5334_v25 = vrot.slane %v5318_v12, 9  ;;  %v2861_v42 = vrot.slane %v5263_v6, 5  ;;  %v5319_v56 = vld [vmem:[%s6682_s9 + $0xa8] sm:$0xe]  ;;  %v5484_v60 = vld [vmem:[%s8548_s1 + $0xe] sm:$0x3] }
  0x99   : > { %v5349_v33 = vcombine.low %v2845_v2, %v2848_v47  ;;  %v2860_v38 = vrot.slane %v2858_v52, 4  ;;  %v2852_v19 = vsel %vm6929_vm8, %v5333_v14, %v2851_v63  ;;  %v2855_v35 = vsel %vm6929_vm8, %v2853_v23, %v2854_v39  ;;  %v5320_v36 = vld [vmem:[%s6682_s9 + $0xb4] sm:$0xe]  ;;  %v5269_v63 = vld [vmem:[%s6682_s9 + $0xbc] sm:$0x1] }
  0x9a   : > { %v2865_v58 = vrot.slane %v5265_v48, 5  ;;  %v2859_v9 = vsel %vm6929_vm8, %v5334_v25, %v2858_v52  ;;  %v2872_v62 = vrot.slane %v5268_v50, 5  ;;  %v6467_v0 = vld [vmem:[%s6682_s9 + $0x24] sm:$0xf]  ;;  %v7199_v2 = vld [vmem:[%s6682_s9 + $0x28] sm:$0xf]  ;;  %v5350_v6 = vcombine.low %v2852_v19, %v2855_v35 }
  0x9b   : > { %v2862_v34 = vsel %vm6929_vm8, %v2860_v38, %v2861_v42  ;;  %v5082_v43 = vcombine.low %v6467_v0, %v7199_v2  ;;  %v5271_v12 = vld [vmem:[%s6682_s9 + $0xc4] sm:$0xf]  ;;  %v7204_v11 = vand.u32 %v5484_v60, %v6658_v4  ;;  %v2868_v14 = vrot.slane %v5266_v53, 5  ;;  %v6469_v47 = vld [vmem:[%s6682_s9 + $0x30] sm:$0xf] }
  0x9c   : > { %v2867_v26 = vrot.slane %v2865_v58, 4  ;;  %v5336_v39 = vrot.slane %v5320_v36, 9  ;;  %v7211_v23 = vld [vmem:[%s6682_s9 + $0x34] sm:$0xf]  ;;  %v2874_v28 = vrot.slane %v2872_v62, 4  ;;  %v2879_v48 = vrot.slane %v5271_v12, 5 }
  0x9d   : > { %5995 = vmatmul.mubr.msk.bf16.gmra.mrb[16].mxu0 %vm657_vm4, %v5348_v22  ;;  %v5192_v22 = vld [vmem:[%s8548_s1 + $0x6] sm:$0x3]  ;;  %v5083_v52 = vcombine.low %v6469_v47, %v7211_v23  ;;  %6044 = vmatprep.subr.bf16.mxu0 %v7204_v11  ;;  %v5272_v53 = vld [vmem:[%s6682_s9 + $0xc8] sm:$0x1]  ;;  %v6471_v19 = vld [vmem:[%s6682_s9 + $0x3c] sm:$0xf] }
  0x9e   : > { %5843 = vmatmul.mubr.msk.bf16.vlgmr.msra.gmra.mrb[0].mxu1 %vm657_vm4, %v5080_v13  ;;  %5998 = vmatprep.mubr.msk.bf16.mxu0 %vm657_vm4, %v5349_v33  ;;  %v5351_v13 = vcombine.low %v2859_v9, %v2862_v34  ;;  %v7217_v33 = vand.u32 %v5192_v22, %v6658_v4  ;;  %v2869_v42 = vsel %vm6929_vm8, %v2867_v26, %v2868_v14  ;;  %v7235_v35 = vld [vmem:[%s6682_s9 + $0x40] sm:$0xf]  ;;  %v2881_v36 = vrot.slane %v2879_v48, 4  ;;  %v6422_v12 = vld [vmem:[%s6682_s9 + $0x18] sm:$0xff]   ;;  %v6473_v47 = vld [vmem:[%s6682_s9 + $0x8] sm:$0x1] }
  0x9f   : > { %5875 = vmatpush3.bf16.msra.mxu1 %v6717_v46  ;;  %5846 = vmatprep.mubr.msk.bf16.mxu1 %vm657_vm4, %v5081_v32  ;;  %v5335_v46 = vrot.slane %v5319_v56, 9  ;;  %v2875_v32 = vrot.slane %v5269_v63, 5  ;;  %v2873_v38 = vsel %vm6929_vm8, %v5336_v39, %v2872_v62  ;;  %v5321_v56 = vld [vmem:[%s6682_s9 + $0xc0] sm:$0xe]  ;;  %v2882_v63 = vrot.slane %v5272_v53, 5 }
  0xa0   : > { %5908 = vmatprep.subr.bf16.mxu1 %v7217_v33  ;;  %v5337_v34 = vrot.slane %v5321_v56, 9  ;;  %v5085_v62 = vcombine.low %v6842_v41, %v6845_v49  ;;  %v2260_v41 = vshrl.u32 %v7133_v59, 16  ;;  %v5087_v26 = vcombine.low %v6902_v44, %v6908_v54  ;;  %v1166_v22 = vld [vmem:[%s6682_s9] sm:$0xe]  ;;  %v6474_v44 = vld [vmem:[%s6682_s9 + $0x14] sm:$0x1] }
  0xa1   : > { %v2866_v25 = vsel %vm6929_vm8, %v5335_v46, %v2865_v58  ;;  %v2876_v50 = vsel %vm6929_vm8, %v2874_v28, %v2875_v32  ;;  %v5084_v58 = vcombine.low %v6471_v19, %v7235_v35  ;;  %v5086_v46 = vcombine.low %v6871_v10, %v6877_v51  ;;  %v1168_v51 = vld [vmem:[%s6682_s9 + $0x18] sm:$0xe]  ;;  %v1170_v53 = vld [vmem:[%s6682_s9 + $0x30] sm:$0xe] }
  0xa2   : > { %v5352_v60 = vcombine.low %v2866_v25, %v2869_v42  ;;  %v5353_v9 = vcombine.low %v2873_v38, %v2876_v50  ;;  %v2880_v0 = vsel %vm6929_vm8, %v5337_v34, %v2879_v48  ;;  %v2262_v39 = vrot.slane %v2260_v41, 4  ;;  %v1169_v25 = vld [vmem:[%s6682_s9 + $0x24] sm:$0xe]  ;;  %v6426_v56 = vld [vmem:[%s6682_s9 + $0x30] sm:$0xff]  }
  0xa3   : > { %v1219_v10 = vrot.slane %v7129_v5, 5  ;;  %v1229_v54 = vrot.slane %v6474_v44, 5  ;;  %v5111_v28 = vrot.slane %v1166_v22, 9  ;;  %v1233_v32 = vrot.slane %v7172_v31, 5  ;;  %v6424_v38 = vld [vmem:[%s6682_s9 + $0x24] sm:$0xff]  }
  0xa4   : > { %v5088_v48 = vcombine.low %v6923_v18, %v6936_v55  ;;  %v1240_v50 = vrot.slane %v7199_v2, 5  ;;  %v5090_v31 = vcombine.low %v6981_v61, %v6989_v29  ;;  %v5549_v18 = vld [vmem:[%s8548_s1 + $0x10] sm:$0x3]  ;;  %v5113_v2 = vrot.slane %v1168_v51, 9  ;;  %v6478_v22 = vld [vmem:[%s6682_s9 + $0x4c] sm:$0xf] }
  0xa5   : > { %5999 = vmatmul.mubr.msk.bf16.gmra.mrb[20].mxu0 %vm657_vm4, %v5350_v6  ;;  %v2256_v6 = vshll.u32 %v7133_v59, 16  ;;  %v1167_v59 = vld [vmem:[%s6682_s9 + $0xc] sm:$0xe]  ;;  %v1221_v55 = vrot.slane %v1219_v10, 4  ;;  %v5114_v34 = vrot.slane %v1169_v25, 9  ;;  %v6428_v25 = vld [vmem:[%s6682_s9 + $0x3c] sm:$0xff]  }
  0xa6   : > { %5847 = vmatmul.mubr.msk.bf16.gmra.mrb[4].mxu1 %vm657_vm4, %v5082_v43  ;;  %6002 = vmatprep.mubr.msk.bf16.mxu0 %vm657_vm4, %v5351_v13  ;;  %v2883_v43 = vsel %vm6929_vm8, %v2881_v36, %v2882_v63  ;;  %v1226_v13 = vrot.slane %v7163_v16, 5  ;;  %v2266_v16 = vshll.u32 %v7136_v8, 16  ;;  %v5112_v5 = vrot.slane %v1167_v59, 9  ;;  %v1171_v63 = vld [vmem:[%s6682_s9 + $0x3c] sm:$0xe] }
  0xa7   : > { %5850 = vmatprep.mubr.msk.bf16.mxu1 %vm657_vm4, %v5083_v52  ;;  %v5354_v49 = vcombine.low %v2880_v0, %v2883_v43  ;;  %v7256_v14 = vrot.slane %v2256_v6, 5  ;;  %v1222_v52 = vrot.slane %v6473_v47, 5  ;;  %v5089_v8 = vcombine.low %v6955_v15, %v6962_v21  ;;  %v6476_v6 = vld [vmem:[%s6682_s9 + $0x2c] sm:$0x1]  ;;  %v6484_v61 = vld [vmem:[%s6682_s9 + $0x68] sm:$0x1] }
  0xa8   : > { %v1228_v19 = vrot.slane %v1226_v13, 4  ;;  %v5091_v15 = vcombine.low %v7008_v40, %v7018_v1  ;;  %v7291_v21 = vsel %vm6929_vm8, %v5111_v28, %v1219_v10  ;;  %v1235_v36 = vrot.slane %v1233_v32, 4 }
  0xa9   : > { %8574 = vst [vmem:[#allocation6_spill] sm:$0xff] %v7256_v14  ;;  %v2263_v42 = vor.u32 %v2262_v39, %v7256_v14  ;;  %v7297_v0 = vsel %vm6929_vm8, %v5112_v5, %v1226_v13  ;;  %v1242_v43 = vrot.slane %v1240_v50, 4  ;;  %v1243_v41 = vrot.slane %v6476_v6, 5  ;;  %v6480_v5 = vld [vmem:[%s6682_s9 + $0x50] sm:$0x1] }
  0xaa   : > { %v1254_v39 = vrot.slane %v7235_v35, 5  ;;  %v1261_v59 = vrot.slane %v6478_v22, 5  ;;  %v7307_v47 = vrot.slane %v2266_v16, 5  ;;  %v7317_v13 = vsel %vm6929_vm8, %v1228_v19, %v1229_v54  ;;  %v6479_v16 = vld [vmem:[%s6682_s9 + $0x44] sm:$0x1] }
  0xab   : > { %v7321_v35 = vsel %vm6929_vm8, %v5113_v2, %v1233_v32  ;;  %v7323_v10 = vrot.slane %v2263_v42, 4  ;;  %v7341_v44 = vsel %vm6929_vm8, %v1242_v43, %v1243_v41  ;;  %v5116_v54 = vrot.slane %v1171_v63, 9 }
  0xac   : > { %8575 = vst [vmem:[#allocation7_spill] sm:$0xff] %v7307_v47  ;;  %v1257_v28 = vrot.slane %v6479_v16, 5  ;;  %v1278_v29 = vrot.slane %v6484_v61, 5  ;;  %v6434_v61 = vld [vmem:[%s6682_s9 + $0x60] sm:$0xff]  }
  0xad   : > { %6003 = vmatmul.mubr.msk.bf16.gmra.mrb[24].mxu0 %vm657_vm4, %v5352_v60  ;;  %v6475_v60 = vld [vmem:[%s6682_s9 + $0x20] sm:$0x1]  ;;  %8576 = vst [vmem:[#allocation8_spill] sm:$0xff] %v7323_v10  ;;  %v7375_v6 = vsel %vm6929_vm8, %v5116_v54, %v1254_v39  ;;  %v5439_v54 = vld [vmem:[%s6682_s9 + $0x24] sm:$0xf] }
  0xae   : > { %5851 = vmatmul.mubr.msk.bf16.gmra.mrb[8].mxu1 %vm657_vm4, %v5084_v58  ;;  %6006 = vmatprep.mubr.msk.bf16.mxu0 %vm657_vm4, %v5353_v9  ;;  %v1247_v58 = vrot.slane %v7211_v23, 5  ;;  %v1236_v9 = vrot.slane %v6475_v60, 5  ;;  %v5115_v23 = vrot.slane %v1170_v53, 9  ;;  %v6430_v53 = vld [vmem:[%s6682_s9 + $0x48] sm:$0xff]   ;;  %v3613_v40 = vshll.u32 %v5439_v54, 16 }
  0xaf   : > { %5854 = vmatprep.mubr.msk.bf16.mxu1 %vm657_vm4, %v5085_v62  ;;  %v1172_v62 = vld [vmem:[%s6682_s9 + $0x48] sm:$0xe]  ;;  %v1177_v10 = vld [vmem:[%s6682_s9 + $0x84] sm:$0xe] }
  0xb0   : > { %v7337_v51 = vsel %vm6929_vm8, %v5115_v23, %v1247_v58  ;;  %v5117_v32 = vrot.slane %v1172_v62, 9  ;;  %v6482_v23 = vld [vmem:[%s6682_s9 + $0x64] sm:$0xf]  ;;  %v6485_v62 = vld [vmem:[%s6682_s9 + $0x70] sm:$0xf] }
  0xb1   : > { %v1275_v63 = vrot.slane %v6482_v23, 5 }
  0xb2   : > { %v7379_v41 = vsel %vm6929_vm8, %v5117_v32, %v1261_v59 }
  0xb5   : > { %6007 = vmatmul.mubr.msk.bf16.gmra.mrb[28].mxu0 %vm657_vm4, %v5354_v49  ;;  %v7301_v49 = vand.u32 %v5549_v18, %v6658_v4  ;;  %v7313_v4 = vsel %vm6929_vm8, %v1221_v55, %v1222_v52  ;;  %v7333_v52 = vsel %vm6929_vm8, %v5114_v34, %v1240_v50  ;;  %v1264_v50 = vrot.slane %v6480_v5, 5  ;;  %v5436_v55 = vld [vmem:[%s6682_s9 + $0x18] sm:$0xf]  ;;  %v1173_v34 = vld [vmem:[%s6682_s9 + $0x54] sm:$0xe] }
  0xb6   : > { %5855 = vmatmul.mubr.msk.bf16.gmra.mrb[12].mxu1 %vm657_vm4, %v5086_v46  ;;  %6012 = vmatprep.mubr.msk.bf16.mxu0 %vm657_vm4, %v6422_v12  ;;  %v1249_v46 = vrot.slane %v1247_v58, 4  ;;  %v6477_v12 = vld [vmem:[%s6682_s9 + $0x38] sm:$0x1]  ;;  %v3589_v22 = vshll.u32 %v5436_v55, 16  ;;  %v5438_v5 = vld [vmem:[%s6682_s9 + $0x20] sm:$0x1] }
  0xb7   : > { %5858 = vmatprep.mubr.msk.bf16.mxu1 %vm657_vm4, %v5087_v26  ;;  %v1250_v26 = vrot.slane %v6477_v12, 5  ;;  %v6481_v58 = vld [vmem:[%s6682_s9 + $0x58] sm:$0xf] }
  0xb8   : > { %v1268_v18 = vrot.slane %v6481_v58, 5 }
  0xb9   : > { %v7348_v42 = vsel %vm6929_vm8, %v1249_v46, %v1250_v26  ;;  %v5437_v46 = vld [vmem:[%s6682_s9 + $0x1c] sm:$0xf] }
  0xba   : > { %v1270_v16 = vrot.slane %v1268_v18, 4 }
  0xbd   : > { %6013 = vmatmul.mubr.msk.bf16.vlgmr.msra.gmra.mrb[0].mxu0 %vm657_vm4, %v6424_v38  ;;  %v1263_v38 = vrot.slane %v1261_v59, 4  ;;  %v5118_v59 = vrot.slane %v1173_v34, 9  ;;  %v3610_v34 = vshrl.u32 %v5439_v54, 16  ;;  %v1175_v54 = vld [vmem:[%s6682_s9 + $0x6c] sm:$0xe] }
  0xbe   : > { %5859 = vmatmul.mubr.msk.bf16.gmra.mrb[16].mxu1 %vm657_vm4, %v5088_v48  ;;  %6045 = vmatpush3.bf16.msra.mxu0 %v7204_v11  ;;  %v7329_v11 = vsel %vm6929_vm8, %v1235_v36, %v1236_v9  ;;  %v1256_v48 = vrot.slane %v1254_v39, 4  ;;  %v1174_v36 = vld [vmem:[%s6682_s9 + $0x60] sm:$0xe]  ;;  %v3586_v39 = vshrl.u32 %v5436_v55, 16  ;;  %v5441_v9 = vld [vmem:[%s6682_s9 + $0x2c] sm:$0x1] }
  0xbf   : > { %5862 = vmatprep.mubr.msk.bf16.mxu1 %vm657_vm4, %v5089_v8  ;;  %6016 = vmatprep.mubr.msk.bf16.mxu0 %vm657_vm4, %v6426_v56  ;;  %v5092_v8 = vcombine.low %v7027_v3, %v7038_v27  ;;  %v5093_v56 = vcombine.low %v7059_v17, %v7064_v24  ;;  %v7389_v26 = vsel %vm6929_vm8, %v1263_v38, %v1264_v50  ;;  %v1277_v38 = vrot.slane %v1275_v63, 4 }
  0xc0   : > { %6078 = vmatprep.subr.bf16.mxu0 %v7301_v49  ;;  %v7385_v12 = vsel %vm6929_vm8, %v1256_v48, %v1257_v28  ;;  %v6483_v28 = vld [vmem:[%s6682_s9 + $0x5c] sm:$0x1]  ;;  %v5440_v48 = vld [vmem:[%s6682_s9 + $0x28] sm:$0xf]  ;;  %v3599_v50 = vshrl.u32 %v5437_v46, 16  ;;  %v3588_v1 = vrot.slane %v3586_v39, 4 }
  0xc1   : > { %v1271_v32 = vrot.slane %v6483_v28, 5  ;;  %v3623_v23 = vshrl.u32 %v5440_v48, 16  ;;  %v5442_v28 = vld [vmem:[%s6682_s9 + $0x30] sm:$0xf]  ;;  %v3605_v39 = vshll.u32 %v5438_v5, 16  ;;  %v3612_v60 = vrot.slane %v3610_v34, 4 }
  0xc2   : > { %v3601_v43 = vrot.slane %v3599_v50, 4  ;;  %v3637_v2 = vshll.u32 %v5442_v28, 16  ;;  %v3629_v34 = vshll.u32 %v5441_v9, 16  ;;  %v7463_v9 = vld [vmem:[%s6682_s9 + $0x38] sm:$0x1] }
  0xc3   : > { %v7418_v58 = vsel %vm6929_vm8, %v1270_v16, %v1271_v32  ;;  %v3615_v16 = vrot.slane %v3613_v40, 5  ;;  %v3634_v32 = vshrl.u32 %v5442_v28, 16  ;;  %v5445_v40 = vld [vmem:[%s6682_s9 + $0x3c] sm:$0xf]  ;;  %8577 = vst [vmem:[#allocation9_spill] sm:$0xff] %v7463_v9  ;;  %v3653_v14 = vshll.u32 %v7463_v9, 16 }
  0xc4   : > { %v6443_v9 = vld [vmem:[%s6682_s9 + $0xc0] sm:$0xff]  }
  0xc5   : > { %6017 = vmatmul.mubr.msk.bf16.gmra.mrb[4].mxu0 %vm657_vm4, %v6428_v25  ;;  %v5119_v25 = vrot.slane %v1174_v36, 9  ;;  %v3619_v36 = vshll.u32 %v5440_v48, 16  ;;  %v3636_v28 = vrot.slane %v3634_v32, 4  ;;  %v3661_v32 = vshll.u32 %v5445_v40, 16 }
  0xc6   : > { %5863 = vmatmul.mubr.msk.bf16.gmra.mrb[20].mxu1 %vm657_vm4, %v5090_v31  ;;  %6020 = vmatprep.mubr.msk.bf16.mxu0 %vm657_vm4, %v6430_v53  ;;  %v3595_v31 = vshll.u32 %v5437_v46, 16  ;;  %v6432_v53 = vld [vmem:[%s6682_s9 + $0x54] sm:$0xff]   ;;  %v7414_v46 = vsel %vm6929_vm8, %v5118_v59, %v1268_v18  ;;  %v1282_v18 = vrot.slane %v6485_v62, 5  ;;  %v6488_v62 = vld [vmem:[%s6682_s9 + $0x80] sm:$0x1] }
  0xc7   : > { %5866 = vmatprep.mubr.msk.bf16.mxu1 %vm657_vm4, %v5091_v15  ;;  %v3591_v15 = vrot.slane %v3589_v22, 5  ;;  %v7422_v55 = vsel %vm6929_vm8, %v5119_v25, %v1275_v63  ;;  %v7427_v22 = vsel %vm6929_vm8, %v1277_v38, %v1278_v29  ;;  %v5443_v59 = vld [vmem:[%s6682_s9 + $0x34] sm:$0xf]  ;;  %v5120_v25 = vrot.slane %v1175_v54, 9  ;;  %v6436_v54 = vld [vmem:[%s6682_s9 + $0x6c] sm:$0xff]  }
  0xc8   : > { %v7429_v48 = vrot.slane %v3595_v31, 5  ;;  %v7435_v5 = vrot.slane %v3619_v36, 5  ;;  %v3625_v38 = vrot.slane %v3623_v23, 4  ;;  %v3643_v31 = vshll.u32 %v5443_v59, 16  ;;  %v6487_v36 = vld [vmem:[%s6682_s9 + $0x7c] sm:$0xf] }
  0xc9   : > { %v3592_v63 = vor.u32 %v3591_v15, %v3588_v1  ;;  %v3647_v50 = vshrl.u32 %v5443_v59, 16  ;;  %v1284_v27 = vrot.slane %v1282_v18, 4  ;;  %v3616_v1 = vor.u32 %v3615_v16, %v3612_v60  ;;  %v1176_v15 = vld [vmem:[%s6682_s9 + $0x78] sm:$0xe]  ;;  %v7468_v16 = vld [vmem:[%s6682_s9 + $0x40] sm:$0xf] }
  0xca   : > { %v3602_v3 = vor.u32 %v3601_v43, %v7429_v48  ;;  %v1289_v23 = vrot.slane %v6487_v36, 5  ;;  %v6437_v59 = vld [vmem:[%s6682_s9 + $0x78] sm:$0xff]   ;;  %v7459_v43 = vsel %vm6929_vm8, %v5120_v25, %v1282_v18  ;;  %v7465_v29 = vrot.slane %v3643_v31, 5  ;;  %8578 = vst [vmem:[#allocation10_spill] sm:$0xff] %v7468_v16 }
  0xcb   : > { %v3593_v17 = vrot.slane %v3592_v63, 4  ;;  %v3649_v60 = vrot.slane %v3647_v50, 4  ;;  %v3631_v63 = vrot.slane %v3629_v34, 5  ;;  %v5121_v18 = vrot.slane %v1176_v15, 9 }
  0xcc   : > { %v3603_v36 = vrot.slane %v3602_v3, 4  ;;  %v3617_v25 = vrot.slane %v3616_v1, 4  ;;  %v1292_v19 = vrot.slane %v6488_v62, 5  ;;  %v3667_v3 = vshll.u32 %v7468_v16, 16 }
  0xcd   : > { %6021 = vmatmul.mubr.msk.bf16.gmra.mrb[8].mxu0 %vm657_vm4, %v6432_v53  ;;  %v3650_v62 = vor.u32 %v3649_v60, %v7465_v29  ;;  %v3663_v15 = vrot.slane %v3661_v32, 5  ;;  %v6438_v60 = vld [vmem:[%s6682_s9 + $0x84] sm:$0xff]  }
  0xce   : > { %5867 = vmatmul.mubr.msk.bf16.gmra.mrb[24].mxu1 %vm657_vm4, %v5092_v8  ;;  %6024 = vmatprep.mubr.msk.bf16.mxu0 %vm657_vm4, %v6434_v61  ;;  %v6486_v8 = vld [vmem:[%s6682_s9 + $0x74] sm:$0x1]  ;;  %v3639_v61 = vrot.slane %v3637_v2, 5  ;;  %v3658_v2 = vshrl.u32 %v5445_v40, 16  ;;  %v3671_v40 = vshrl.u32 %v7468_v16, 16  ;;  %v7516_v32 = vrot.slane %v3667_v3, 5 }
  0xcf   : > { %5870 = vmatprep.mubr.msk.bf16.mxu1 %vm657_vm4, %v5093_v56  ;;  %v1285_v53 = vrot.slane %v6486_v8, 5  ;;  %v3607_v56 = vrot.slane %v3605_v39, 5  ;;  %v3626_v8 = vor.u32 %v3625_v38, %v7435_v5  ;;  %v1291_v38 = vrot.slane %v1289_v23, 4 }
  0xd0   : > { %v3640_v31 = vor.u32 %v3639_v61, %v3636_v28  ;;  %v3660_v1 = vrot.slane %v3658_v2, 4  ;;  %v8580_v28 = vcombine.low %v7291_v21, %v7313_v4  ;;  %v3622_v21 = vsel %vm6708_vm5, %v3617_v25, %v7435_v5  ;;  %v6439_v5 = vld [vmem:[%s6682_s9 + $0x90] sm:$0xff]   ;;  %v6490_v25 = vld [vmem:[%s6682_s9 + $0x8c] sm:$0x1] }
  0xd1   : > { %v7472_v39 = vsel %vm6929_vm8, %v1284_v27, %v1285_v53  ;;  %v3627_v50 = vrot.slane %v3626_v8, 4  ;;  %v8579_v27 = vcombine.low %v7079_v57, %v7088_v30  ;;  %v6489_v53 = vld [vmem:[%s6682_s9 + $0x88] sm:$0xf]  ;;  %v3598_v57 = vsel %vm6708_vm5, %v3593_v17, %v7429_v48 }
  0xd2   : > { %v1296_v34 = vrot.slane %v6489_v53, 5  ;;  %v3608_v61 = vsel %vm6708_vm5, %v3603_v36, %v3607_v56  ;;  %v7507_v4 = vsel %vm6929_vm8, %v1291_v38, %v1292_v19  ;;  %v3641_v48 = vrot.slane %v3640_v31, 4  ;;  %v7510_v56 = vld [vmem:[%s6682_s9 + $0x44] sm:$0x1]  ;;  %v5448_v8 = vld [vmem:[%s6682_s9 + $0x48] sm:$0xf] }
  0xd3   : > { %v5122_v17 = vrot.slane %v1177_v10, 9  ;;  %8581 = vst [vmem:[#allocation11_spill] sm:$0xff] %v7510_v56  ;;  %v3655_v2 = vrot.slane %v3653_v14, 5  ;;  %v3673_v36 = vrot.slane %v3671_v40, 4  ;;  %v1299_v38 = vrot.slane %v6490_v25, 5 }
  0xd4   : > { %v1298_v19 = vrot.slane %v1296_v34, 4  ;;  %v3664_v10 = vor.u32 %v3663_v15, %v3660_v1  ;;  %v7521_v31 = vld [vmem:[%s6682_s9 + $0x4c] sm:$0xf]  ;;  %v3677_v53 = vshll.u32 %v7510_v56, 16  ;;  %v3682_v14 = vshrl.u32 %v5448_v8, 16 }
  0xd5   : > { %6025 = vmatmul.mubr.msk.bf16.gmra.mrb[12].mxu0 %vm657_vm4, %v6436_v54  ;;  %v7536_v1 = vsel %vm6929_vm8, %v5122_v17, %v1296_v34  ;;  %v5451_v15 = vld [vmem:[%s6682_s9 + $0x54] sm:$0xf] }
  0xd6   : > { %5871 = vmatmul.mubr.msk.bf16.gmra.mrb[28].mxu1 %vm657_vm4, %v8579_v27  ;;  %6028 = vmatprep.mubr.msk.bf16.mxu0 %vm657_vm4, %v6437_v59  ;;  %v7500_v59 = vsel %vm6929_vm8, %v5121_v18, %v1289_v23  ;;  %v3632_v23 = vsel %vm6708_vm5, %v3627_v50, %v3631_v63  ;;  %v3651_v18 = vrot.slane %v3650_v62, 4  ;;  %v7523_v27 = vcombine.low %v3598_v57, %v3608_v61  ;;  %v1178_v63 = vld [vmem:[%s6682_s9 + $0x90] sm:$0xe]  ;;  %v6491_v57 = vld [vmem:[%s6682_s9 + $0x94] sm:$0xf] }
  0xd7   : > { %5876 = vmatprep.mubr.msk.bf16.mxu1 %vm657_vm4, %v8580_v28  ;;  %v3685_v50 = vshll.u32 %v5448_v8, 16  ;;  %v7527_v3 = vcombine.low %v3622_v21, %v3632_v23  ;;  %v3646_v62 = vsel %vm6708_vm5, %v3641_v48, %v7465_v29  ;;  %v3674_v28 = vor.u32 %v3673_v36, %v7516_v32  ;;  %v7545_v23 = vld [vmem:[%s6682_s9 + $0x58] sm:$0xf] }
  0xd8   : > { %v1303_v61 = vrot.slane %v6491_v57, 5  ;;  %v3691_v21 = vshll.u32 %v7521_v31, 16  ;;  %v3695_v8 = vshrl.u32 %v7521_v31, 16  ;;  %v8582_v29 = vcombine.low %v7297_v0, %v7317_v13  ;;  %v6492_v36 = vld [vmem:[%s6682_s9 + $0x98] sm:$0x1] }
  0xd9   : > { %v3656_v34 = vsel %vm6708_vm5, %v3651_v18, %v3655_v2  ;;  %v7556_v48 = vsel %vm6929_vm8, %v1298_v19, %v1299_v38  ;;  %v7558_v17 = vrot.slane %v3664_v10, 4  ;;  %v8583_v0 = vcombine.low %v7321_v35, %v7329_v11  ;;  %v5454_v10 = vld [vmem:[%s6682_s9 + $0x60] sm:$0xf] }
  0xda   : > { %v7565_v13 = vrot.slane %v3677_v53, 5  ;;  %v1306_v2 = vrot.slane %v6492_v36, 5  ;;  %v3687_v18 = vrot.slane %v3685_v50, 5  ;;  %v3706_v19 = vshrl.u32 %v5451_v15, 16  ;;  %v6440_v35 = vld [vmem:[%s6682_s9 + $0x9c] sm:$0xff]   ;;  %v6441_v50 = vld [vmem:[%s6682_s9 + $0xa8] sm:$0xff]  }
  0xdb   : > { %v3709_v25 = vshll.u32 %v5451_v15, 16  ;;  %v3715_v38 = vshll.u32 %v7545_v23, 16  ;;  %v7573_v11 = vrot.slane %v3674_v28, 4  ;;  %v1305_v53 = vrot.slane %v1303_v61, 4  ;;  %v7591_v28 = vld [vmem:[%s6682_s9 + $0x50] sm:$0x1] }
  0xdc   : > { %v7578_v57 = vcombine.low %v3646_v62, %v3656_v34  ;;  %v6493_v36 = vld [vmem:[%s6682_s9 + $0xa0] sm:$0xf]  ;;  %v7596_v34 = vld [vmem:[%s6682_s9 + $0x64] sm:$0xf]  ;;  %v3730_v15 = vshrl.u32 %v5454_v10, 16  ;;  %v3733_v40 = vshll.u32 %v5454_v10, 16 }
  0xdd   : > { %6029 = vmatmul.mubr.msk.bf16.gmra.mrb[16].mxu0 %vm657_vm4, %v6438_v60  ;;  %v5123_v60 = vrot.slane %v1178_v63, 9  ;;  %v7575_v63 = vrot.slane %v3691_v21, 5  ;;  %v1179_v21 = vld [vmem:[%s6682_s9 + $0x9c] sm:$0xe]  ;;  %v1310_v62 = vrot.slane %v6493_v36, 5  ;;  %8584 = vst [vmem:[#allocation12_spill] sm:$0xff] %v7596_v34 }
  0xde   : > { %5877 = vmatmul.mubr.msk.bf16.vlgmr.msra.gmra.mrb[0].mxu1 %vm657_vm4, %v8582_v29  ;;  %6032 = vmatprep.mubr.msk.bf16.mxu0 %vm657_vm4, %v6439_v5  ;;  %v3684_v5 = vrot.slane %v3682_v14, 4  ;;  %v3697_v14 = vrot.slane %v3695_v8, 4  ;;  %v3708_v54 = vrot.slane %v3706_v19, 4  ;;  %v3711_v56 = vrot.slane %v3709_v25, 5  ;;  %v7612_v19 = vld [vmem:[%s6682_s9 + $0x5c] sm:$0x1] }
  0xdf   : > { %5909 = vmatpush3.bf16.msra.mxu1 %v7217_v33  ;;  %5880 = vmatprep.mubr.msk.bf16.mxu1 %vm657_vm4, %v8583_v0  ;;  %v3719_v33 = vshrl.u32 %v7545_v23, 16  ;;  %v7588_v0 = vsel %vm6929_vm8, %v5123_v60, %v1303_v61  ;;  %v7598_v16 = vrot.slane %v3715_v38, 5  ;;  %v3680_v61 = vsel %vm6708_vm5, %v7573_v11, %v7565_v13  ;;  %v1180_v13 = vld [vmem:[%s6682_s9 + $0xa8] sm:$0xe] }
  0xe0   : > { %6112 = vmatprep.subr.bf16.mxu1 %v6666_v7  ;;  %v3688_v8 = vor.u32 %v3687_v18, %v3684_v5  ;;  %v7607_v60 = vsel %vm6929_vm8, %v1305_v53, %v1306_v2  ;;  %v3698_v5 = vor.u32 %v3697_v14, %v7575_v63  ;;  %v3701_v18 = vshll.u32 %v7591_v28, 16  ;;  %v7635_v7 = vld [vmem:[%s6682_s9 + $0x68] sm:$0x1] }
  0xe1   : > { %v3721_v29 = vrot.slane %v3719_v33, 4  ;;  %v8585_v25 = vcombine.low %v7333_v52, %v7341_v44  ;;  %v5124_v38 = vrot.slane %v1179_v21, 9  ;;  %v1317_v2 = vrot.slane %v7064_v24, 5  ;;  %v6494_v44 = vld [vmem:[%s6682_s9 + $0xa4] sm:$0x1]  ;;  %8587 = vst [vmem:[#allocation13_spill] sm:$0xff] %v7635_v7 }
  0xe2   : > { %v3739_v33 = vshll.u32 %v7596_v34, 16  ;;  %v3743_v10 = vshrl.u32 %v7596_v34, 16  ;;  %v3689_v52 = vrot.slane %v3688_v8, 4  ;;  %v1313_v11 = vrot.slane %v6494_v44, 5 }
  0xe3   : > { %v3732_v53 = vrot.slane %v3730_v15, 4  ;;  %v3735_v14 = vrot.slane %v3733_v40, 5  ;;  %v1312_v21 = vrot.slane %v1310_v62, 4  ;;  %v3712_v24 = vor.u32 %v3711_v56, %v3708_v54  ;;  %v6495_v40 = vld [vmem:[%s6682_s9 + $0xb0] sm:$0x1] }
  0xe4   : > { %v3722_v36 = vor.u32 %v3721_v29, %v7598_v16  ;;  %v3703_v8 = vrot.slane %v3701_v18, 5  ;;  %v1319_v15 = vrot.slane %v1317_v2, 4  ;;  %v1320_v44 = vrot.slane %v6495_v40, 5  ;;  %v1181_v56 = vld [vmem:[%s6682_s9 + $0xb4] sm:$0xe] }
  0xe5   : > { %6033 = vmatmul.mubr.msk.bf16.gmra.mrb[20].mxu0 %vm657_vm4, %v6440_v35  ;;  %v8586_v35 = vcombine.low %v7337_v51, %v7348_v42  ;;  %v3699_v42 = vrot.slane %v3698_v5, 4  ;;  %v7638_v47 = vrot.slane %v3739_v33, 5  ;;  %v3745_v54 = vrot.slane %v3743_v10, 4 }
  0xe6   : > { %5881 = vmatmul.mubr.msk.bf16.gmra.mrb[4].mxu1 %vm657_vm4, %v8585_v25  ;;  %6036 = vmatprep.mubr.msk.bf16.mxu0 %vm657_vm4, %v6441_v50  ;;  %v6442_v50 = vld [vmem:[%s6682_s9 + $0xb4] sm:$0xff]   ;;  %v3725_v25 = vshll.u32 %v7612_v19, 16  ;;  %v3694_v29 = vsel %vm6708_vm5, %v3689_v52, %v7575_v63  ;;  %v7646_v34 = vsel %vm6929_vm8, %v5124_v38, %v1310_v62  ;;  %v3736_v5 = vor.u32 %v3735_v14, %v3732_v53 }
  0xe7   : > { %5884 = vmatprep.mubr.msk.bf16.mxu1 %vm657_vm4, %v8586_v35  ;;  %v5125_v35 = vrot.slane %v1180_v13, 9  ;;  %v1324_v18 = vrot.slane %v7088_v30, 5  ;;  %v5457_v13 = vld [vmem:[%s6682_s9 + $0x6c] sm:$0xf]  ;;  %v7652_v40 = vsel %vm6929_vm8, %v1312_v21, %v1313_v11  ;;  %v7654_v33 = vrot.slane %v3712_v24, 4 }
  0xe8   : > { %8588 = vst [vmem:[#allocation14_spill] sm:$0xff] %v7652_v40  ;;  %v7656_v10 = vrot.slane %v3722_v36, 4  ;;  %v7658_v51 = vrot.slane %v3725_v25, 5  ;;  %v3704_v63 = vsel %vm6708_vm5, %v3699_v42, %v3703_v8  ;;  %v3749_v62 = vshll.u32 %v7635_v7, 16  ;;  %v6444_v25 = vld [vmem:[%s6682_s9 + $0xcc] sm:$0xff]  }
  0xe9   : > { %v7665_v30 = vsel %vm6929_vm8, %v5125_v35, %v1317_v2  ;;  %v5126_v38 = vrot.slane %v1181_v56, 9  ;;  %v8590_v52 = vcombine.low %v7375_v6, %v7385_v12  ;;  %v7675_v11 = vsel %vm6929_vm8, %v1319_v15, %v1320_v44  ;;  %v7679_v2 = vld [vmem:[%s6682_s9 + $0x70] sm:$0xf]  ;;  %v7722_v44 = vld [vmem:[%s6682_s9 + $0x7c] sm:$0xf] }
  0xea   : > { %8589 = vst [vmem:[#allocation15_spill] sm:$0xff] %v7665_v30  ;;  %8591 = vst [vmem:[#allocation16_spill] sm:$0xff] %v7675_v11  ;;  %v3746_v53 = vor.u32 %v3745_v54, %v7638_v47  ;;  %v3754_v14 = vshrl.u32 %v5457_v13, 16  ;;  %v8593_v21 = vcombine.low %v7379_v41, %v7389_v26  ;;  %v8594_v6 = vsel %vm6708_vm5, %v7558_v17, %v7516_v32  ;;  %v7709_v17 = vld [vmem:[%s6682_s9 + $0x74] sm:$0x1] }
  0xeb   : > { %8592 = vst [vmem:[#allocation17_spill] sm:$0xff] %v7679_v2  ;;  %v7690_v12 = vcombine.low %v8594_v6, %v3680_v61  ;;  %v1326_v24 = vrot.slane %v1324_v18, 4  ;;  %v1327_v36 = vrot.slane %v7094_v20, 5  ;;  %v7696_v42 = vcombine.low %v3694_v29, %v3704_v63  ;;  %8595 = vst [vmem:[#allocation18_spill] sm:$0xff] %v7709_v17  ;;  %v5460_v20 = vld [vmem:[%s6682_s9 + $0x78] sm:$0xf] }
  0xec   : > { %v7714_v8 = vrot.slane %v3749_v62, 5  ;;  %v7718_v35 = vsel %vm6929_vm8, %v5126_v38, %v1324_v18  ;;  %v3763_v15 = vshll.u32 %v7679_v2, 16  ;;  %8596 = vst [vmem:[#allocation19_spill] sm:$0xff] %v7722_v44  ;;  %v5463_v54 = vld [vmem:[%s6682_s9 + $0x84] sm:$0xf]  ;;  %v7725_v56 = vrot.slane %v3746_v53, 4 }
  0xed   : > { %6037 = vmatmul.mubr.msk.bf16.gmra.mrb[24].mxu0 %vm657_vm4, %v6442_v50  ;;  %v3757_v50 = vshll.u32 %v5457_v13, 16  ;;  %v7727_v29 = vrot.slane %v3754_v14, 4  ;;  %v3767_v13 = vshrl.u32 %v7679_v2, 16  ;;  %v7733_v63 = vld [vmem:[%s6682_s9 + $0x88] sm:$0xf]  ;;  %v7741_v62 = vsel %vm6929_vm8, %v1326_v24, %v1327_v36 }
  0xee   : > { %5885 = vmatmul.mubr.msk.bf16.gmra.mrb[8].mxu1 %vm657_vm4, %v8590_v52  ;;  %6040 = vmatprep.mubr.msk.bf16.mxu0 %vm657_vm4, %v6443_v9  ;;  %v7692_v9 = vrot.slane %v3736_v5, 4  ;;  %8597 = vst [vmem:[#allocation20_spill] sm:$0xff] %v7733_v63  ;;  %v3778_v38 = vshrl.u32 %v5460_v20, 16  ;;  %v3781_v52 = vshll.u32 %v5460_v20, 16  ;;  %v5466_v53 = vld [vmem:[%s6682_s9 + $0x90] sm:$0xf]  ;;  %v8599_v18 = vcombine.low %v7414_v46, %v7418_v58 }
  0xef   : > { %5888 = vmatprep.mubr.msk.bf16.mxu1 %vm657_vm4, %v8593_v21  ;;  %v7729_v5 = vrot.slane %v3757_v50, 5  ;;  %v7745_v14 = vld [vmem:[%s6682_s9 + $0x94] sm:$0xf]  ;;  %v3787_v50 = vshll.u32 %v7722_v44, 16  ;;  %v3791_v21 = vshrl.u32 %v7722_v44, 16  ;;  %v3802_v6 = vshrl.u32 %v5463_v54, 16 }
  0xf0   : > { %8598 = vst [vmem:[#allocation21_spill] sm:$0xff] %v7745_v14  ;;  %v3805_v61 = vshll.u32 %v5463_v54, 16  ;;  %v7750_v41 = vrot.slane %v3763_v15, 5  ;;  %v3773_v24 = vshll.u32 %v7709_v17, 16  ;;  %v3811_v36 = vshll.u32 %v7733_v63, 16 }
  0xf1   : > { %v3815_v20 = vshrl.u32 %v7733_v63, 16  ;;  %v3826_v54 = vshrl.u32 %v5466_v53, 16  ;;  %v3835_v15 = vshll.u32 %v7745_v14, 16  ;;  %v3839_v26 = vshrl.u32 %v7745_v14, 16  ;;  %v5469_v32 = vld [vmem:[%s6682_s9 + $0x9c] sm:$0xf] }
  0xf2   : > { %v8600_v44 = vcombine.low %v7422_v55, %v7427_v22  ;;  %v3769_v46 = vrot.slane %v3767_v13, 4  ;;  %v7775_v63 = vrot.slane %v3787_v50, 5  ;;  %v3793_v14 = vrot.slane %v3791_v21, 4  ;;  %v7778_v55 = vld [vmem:[%s6682_s9 + $0x8c] sm:$0x1] }
  0xf3   : > { %v3804_v17 = vrot.slane %v3802_v6, 4  ;;  %v3807_v2 = vrot.slane %v3805_v61, 5  ;;  %v7780_v22 = vrot.slane %v3811_v36, 5  ;;  %v3850_v7 = vshrl.u32 %v5469_v32, 16  ;;  %v7783_v58 = vld [vmem:[%s6682_s9 + $0x98] sm:$0x1] }
  0xf4   : > { %v3853_v11 = vshll.u32 %v5469_v32, 16  ;;  %v3828_v13 = vrot.slane %v3826_v54, 4  ;;  %v3841_v50 = vrot.slane %v3839_v26, 4  ;;  %v3760_v21 = vor.u32 %v7729_v5, %v7727_v29 }
  0xf5   : > { %6041 = vmatmul.mubr.msk.bf16.gmra.mrb[28].mxu0 %vm657_vm4, %v6444_v25  ;;  %v3829_v25 = vshll.u32 %v5466_v53, 16  ;;  %v7773_v53 = vld [vmem:[%s6682_s9 + $0x80] sm:$0x1]  ;;  %v3770_v61 = vor.u32 %v3769_v46, %v7750_v41  ;;  %v7790_v6 = vrot.slane %v3773_v24, 5  ;;  %v3794_v32 = vor.u32 %v3793_v14, %v7775_v63 }
  0xf6   : > { %5889 = vmatmul.mubr.msk.bf16.gmra.mrb[12].mxu1 %vm657_vm4, %v8599_v18  ;;  %6046 = vmatprep.mubr.msk.bf16.mxu0 %vm657_vm4, %v7523_v27  ;;  %v3780_v27 = vrot.slane %v3778_v38, 4  ;;  %v3783_v18 = vrot.slane %v3781_v52, 5  ;;  %v7785_v52 = vrot.slane %v3835_v15, 5  ;;  %v3797_v36 = vshll.u32 %v7773_v53, 16 }
  0xf7   : > { %5892 = vmatprep.mubr.msk.bf16.mxu1 %vm657_vm4, %v8600_v44  ;;  %v3817_v44 = vrot.slane %v3815_v20, 4  ;;  %v3831_v38 = vrot.slane %v3829_v25, 5  ;;  %v7794_v20 = vld [vmem:[%s6682_s9 + $0xa0] sm:$0xf]  ;;  %v3808_v40 = vor.u32 %v3807_v2, %v3804_v17  ;;  %v3821_v54 = vshll.u32 %v7778_v55, 16 }
  0xf8   : > { %8601 = vst [vmem:[#allocation22_spill] sm:$0xff] %v7794_v20  ;;  %v3784_v30 = vor.u32 %v3783_v18, %v3780_v27  ;;  %v5472_v25 = vld [vmem:[%s6682_s9 + $0xa8] sm:$0xf]  ;;  %v3845_v29 = vshll.u32 %v7783_v58, 16  ;;  %v3852_v5 = vrot.slane %v3850_v7, 4  ;;  %v3855_v24 = vrot.slane %v3853_v11, 5 }
  0xf9   : > { %v3818_v26 = vor.u32 %v3817_v44, %v7780_v22  ;;  %v8602_v15 = vcombine.low %v7459_v43, %v7472_v39  ;;  %v3832_v2 = vor.u32 %v3831_v38, %v3828_v13  ;;  %v3842_v17 = vor.u32 %v3841_v50, %v7785_v52 }
  0xfa   : > { %v3859_v14 = vshll.u32 %v7794_v20, 16  ;;  %v8603_v46 = vcombine.low %v7500_v59, %v7507_v4  ;;  %v3761_v7 = vrot.slane %v3760_v21, 4  ;;  %v3771_v43 = vrot.slane %v3770_v61, 4  ;;  %v7823_v21 = vld [vmem:[%s6682_s9 + $0xac] sm:$0xf] }
  0xfb   : > { %v3877_v39 = vshll.u32 %v5472_v25, 16  ;;  %v3785_v11 = vrot.slane %v3784_v30, 4  ;;  %v3795_v27 = vrot.slane %v3794_v32, 4  ;;  %v3799_v18 = vrot.slane %v3797_v36, 5  ;;  %v7832_v61 = vld [vmem:[%s6682_s9 + $0xb0] sm:$0x1] }
  0xfc   : > { %v3809_v44 = vrot.slane %v3808_v40, 4  ;;  %v3819_v13 = vrot.slane %v3818_v26, 4  ;;  %v3823_v38 = vrot.slane %v3821_v54, 5  ;;  %v3847_v50 = vrot.slane %v3845_v29, 5 }
  0xfd   : > { %6047 = vmatmul.mubr.msk.bf16.vlgmr.msra.gmra.mrb[0].mxu0 %vm657_vm4, %v7527_v3  ;;  %v3863_v3 = vshrl.u32 %v7794_v20, 16  ;;  %v3856_v59 = vor.u32 %v3855_v24, %v3852_v5  ;;  %v3833_v4 = vrot.slane %v3832_v2, 4  ;;  %v7820_v20 = vrot.slane %v3859_v14, 5 }
  0xfe   : > { %5893 = vmatmul.mubr.msk.bf16.gmra.mrb[16].mxu1 %vm657_vm4, %v8602_v15  ;;  %6079 = vmatpush3.bf16.msra.mxu0 %v7301_v49  ;;  %v3874_v49 = vshrl.u32 %v5472_v25, 16  ;;  %v7818_v15 = vld [vmem:[%s6682_s9 + $0xa4] sm:$0x1]  ;;  %v3766_v30 = vsel %vm6708_vm5, %v3761_v7, %v7750_v41  ;;  %v3776_v40 = vsel %vm6708_vm5, %v3771_v43, %v7790_v6  ;;  %v3879_v32 = vrot.slane %v3877_v39, 5 }
  0xff   : > { %5896 = vmatprep.mubr.msk.bf16.mxu1 %vm657_vm4, %v8603_v46  ;;  %6050 = vmatprep.mubr.msk.bf16.mxu0 %vm657_vm4, %v7578_v57  ;;  %v3843_v46 = vrot.slane %v3842_v17, 4  ;;  %v3865_v57 = vrot.slane %v3863_v3, 4  ;;  %v3790_v54 = vsel %vm6708_vm5, %v3785_v11, %v7775_v63  ;;  %v3800_v25 = vsel %vm6708_vm5, %v3795_v27, %v3799_v18  ;;  %v5475_v3 = vld [vmem:[%s6682_s9 + $0xb4] sm:$0xf] }
 0x100   : > { %v3876_v36 = vrot.slane %v3874_v49, 4  ;;  %v3814_v26 = vsel %vm6708_vm5, %v3809_v44, %v7780_v22  ;;  %v3869_v41 = vshll.u32 %v7818_v15, 16  ;;  %v3824_v6 = vsel %vm6708_vm5, %v3819_v13, %v3823_v38  ;;  %v5522_v11 = vld [vmem:[%s6682_s9 + $0x54] sm:$0xe]  ;;  %v5523_v38 = vld [vmem:[%s6682_s9 + $0x60] sm:$0xe] }
 0x101   : > { %v7847_v29 = vrot.slane %v3856_v59, 4  ;;  %v3883_v63 = vshll.u32 %v7823_v21, 16  ;;  %v3887_v5 = vshrl.u32 %v7823_v21, 16  ;;  %v8604_v24 = vcombine.low %v7536_v1, %v7556_v48 }
 0x102   : > { %v3848_v22 = vsel %vm6708_vm5, %v3843_v46, %v3847_v50  ;;  %v3866_v2 = vor.u32 %v3865_v57, %v7820_v20  ;;  %v3893_v17 = vshll.u32 %v7832_v61, 16  ;;  %v8605_v1 = vcombine.low %v7588_v0, %v7607_v60 }
 0x103   : > { %v8606_v48 = vsel %vm6708_vm5, %v7656_v10, %v7658_v51  ;;  %v8608_v14 = vsel %vm6708_vm5, %v7725_v56, %v7714_v8  ;;  %v8609_v0 = vsel %vm6708_vm5, %v7692_v9, %v7638_v47  ;;  %v5143_v51 = vcombine.low %v7718_v35, %v7741_v62  ;;  %v7901_v56 = vld [vmem:[%s6682_s9 + $0xb8] sm:$0xf] }
 0x104   : > { %v5491_v60 = vcombine.low %v8609_v0, %v8608_v14  ;;  %v3880_v10 = vor.u32 %v3879_v32, %v3876_v36  ;;  %v7894_v7 = vcombine.low %v3790_v54, %v3800_v25  ;;  %v7896_v43 = vcombine.low %v3814_v26, %v3824_v6  ;;  %v5524_v32 = vld [vmem:[%s6682_s9 + $0x6c] sm:$0xe] }
 0x105   : > { %6051 = vmatmul.mubr.msk.bf16.gmra.mrb[4].mxu0 %vm657_vm4, %v7690_v12  ;;  %v3838_v12 = vsel %vm6708_vm5, %v3833_v4, %v7785_v52  ;;  %v7898_v8 = vrot.slane %v3869_v41, 5  ;;  %v3862_v47 = vsel %vm6708_vm5, %v7847_v29, %v7820_v20  ;;  %v7909_v9 = vrot.slane %v3883_v63, 5  ;;  %v8612_v63 = vld [vmem:[#allocation12_spill] sm:$0xff] }
 0x106   : > { %5897 = vmatmul.mubr.msk.bf16.gmra.mrb[20].mxu1 %vm657_vm4, %v8604_v24  ;;  %6054 = vmatprep.mubr.msk.bf16.mxu0 %vm657_vm4, %v7696_v42  ;;  %v8607_v42 = vsel %vm6708_vm5, %v7654_v33, %v7598_v16  ;;  %v5521_v16 = vld [vmem:[%s6682_s9 + $0x48] sm:$0xe]  ;;  %v7892_v33 = vcombine.low %v3766_v30, %v3776_v40  ;;  %v7903_v49 = vcombine.low %v3838_v12, %v3848_v22  ;;  %v3889_v39 = vrot.slane %v3887_v5, 4  ;;  %v8613_v24 = vld [vmem:[#allocation15_spill] sm:$0xff]  ;;  %v5481_v29 = vld [vmem:[%s6682_s9 + $0xcc] sm:$0xf] }
 0x107   : > { %5900 = vmatprep.mubr.msk.bf16.mxu1 %vm657_vm4, %v8605_v1  ;;  %v5490_v52 = vcombine.low %v8607_v42, %v8606_v48  ;;  %v7912_v27 = vrot.slane %v3866_v2, 4  ;;  %v7914_v18 = vrot.slane %v3893_v17, 5  ;;  %v3898_v44 = vshrl.u32 %v5475_v3, 16  ;;  %v8614_v12 = vld [vmem:[#allocation16_spill] sm:$0xff]  ;;  %v8616_v2 = vld [vmem:[#allocation13_spill] sm:$0xff] }
 0x108   : > { %v5537_v13 = vrot.slane %v5521_v16, 9  ;;  %v7917_v50 = vrot.slane %v3880_v10, 4  ;;  %v3901_v59 = vshll.u32 %v5475_v3, 16  ;;  %v3907_v4 = vshll.u32 %v7901_v56, 16  ;;  %v8617_v48 = vld [vmem:[#allocation17_spill] sm:$0xff] }
 0x109   : > { %v4357_v46 = vrot.slane %v7521_v31, 5  ;;  %v4360_v57 = vrot.slane %v7591_v28, 5  ;;  %v5538_v30 = vrot.slane %v5522_v11, 9  ;;  %v4364_v40 = vrot.slane %v7545_v23, 5  ;;  %v8610_v31 = vld [vmem:[#allocation14_spill] sm:$0xff] }
 0x10a   : > { %v4367_v36 = vrot.slane %v7612_v19, 5  ;;  %v3890_v54 = vor.u32 %v3889_v39, %v7909_v9  ;;  %v5539_v41 = vrot.slane %v5523_v38, 9  ;;  %v8611_v28 = vcombine.low %v7646_v34, %v8610_v31  ;;  %v7964_v3 = vld [vmem:[%s6682_s9 + $0xbc] sm:$0x1] }
 0x10b   : > { %v7929_v25 = vsel %vm6929_vm8, %v5537_v13, %v4357_v46  ;;  %v4359_v26 = vrot.slane %v4357_v46, 4  ;;  %v3911_v23 = vshrl.u32 %v7901_v56, 16  ;;  %v7939_v19 = vsel %vm6929_vm8, %v5538_v30, %v4364_v40  ;;  %v8618_v13 = vld [vmem:[#allocation18_spill] sm:$0xff] }
 0x10c   : > { %v4366_v6 = vrot.slane %v4364_v40, 4  ;;  %v4371_v5 = vrot.slane %v8612_v63, 5  ;;  %v8615_v22 = vcombine.low %v8613_v24, %v8614_v12  ;;  %v4374_v17 = vrot.slane %v8616_v2, 5  ;;  %v7982_v40 = vld [vmem:[%s6682_s9 + $0xc4] sm:$0xf] }
 0x10d   : > { %6055 = vmatmul.mubr.msk.bf16.gmra.mrb[8].mxu0 %vm657_vm4, %v5490_v52  ;;  %v7948_v34 = vsel %vm6929_vm8, %v4359_v26, %v4360_v57  ;;  %v5540_v1 = vrot.slane %v5524_v32, 9  ;;  %v4378_v42 = vrot.slane %v8617_v48, 5  ;;  %v5478_v52 = vld [vmem:[%s6682_s9 + $0xc0] sm:$0xf]  ;;  %v4381_v38 = vrot.slane %v8618_v13, 5  ;;  %v6445_v26 = vld [vmem:[%s6682_s9 + $0xc] sm:$0xff]  }
 0x10e   : > { %5901 = vmatmul.mubr.msk.bf16.gmra.mrb[24].mxu1 %vm657_vm4, %v8611_v28  ;;  %6058 = vmatprep.mubr.msk.bf16.mxu0 %vm657_vm4, %v5491_v60  ;;  %v5554_v14 = vcombine.low %v7929_v25, %v7948_v34  ;;  %v7957_v0 = vsel %vm6929_vm8, %v4366_v6, %v4367_v36  ;;  %v7961_v60 = vsel %vm6929_vm8, %v5539_v41, %v4371_v5  ;;  %v4373_v10 = vrot.slane %v4371_v5, 4  ;;  %v5525_v32 = vld [vmem:[%s6682_s9 + $0x78] sm:$0xe]  ;;  %v8619_v12 = vld [vmem:[#allocation19_spill] sm:$0xff]  ;;  %v8621_v48 = vld [vmem:[#allocation8_spill] sm:$0xff] }
 0x10f   : > { %5904 = vmatprep.mubr.msk.bf16.mxu1 %vm657_vm4, %v8615_v22  ;;  %v5555_v16 = vcombine.low %v7939_v19, %v7957_v0  ;;  %v7970_v39 = vsel %vm6929_vm8, %v5540_v1, %v4378_v42  ;;  %v4380_v11 = vrot.slane %v4378_v42, 4  ;;  %v3872_v46 = vsel %vm6708_vm5, %v7912_v27, %v7898_v8  ;;  %v5252_v27 = vld [vmem:[%s6682_s9 + $0x78] sm:$0xf]  ;;  %v5526_v2 = vld [vmem:[%s6682_s9 + $0x84] sm:$0xe] }
 0x110   : > { %v7977_v57 = vrot.slane %v3898_v44, 4  ;;  %v7979_v30 = vrot.slane %v3901_v59, 5  ;;  %v7986_v36 = vsel %vm6929_vm8, %v4373_v10, %v4374_v17  ;;  %v7990_v41 = vrot.slane %v3907_v4, 5  ;;  %v6506_v0 = vld [vmem:[%s6682_s9 + $0xa0] sm:$0xf] }
 0x111   : > { %v3922_v31 = vshrl.u32 %v5478_v52, 16  ;;  %v5556_v28 = vcombine.low %v7961_v60, %v7986_v36  ;;  %v7996_v8 = vsel %vm6929_vm8, %v4380_v11, %v4381_v38  ;;  %v7999_v44 = vrot.slane %v3890_v54, 4  ;;  %v8622_v38 = vld [vmem:[#allocation20_spill] sm:$0xff] }
 0x112   : > { %v3917_v59 = vshll.u32 %v7964_v3, 16  ;;  %v3925_v6 = vshll.u32 %v5478_v52, 16  ;;  %v5557_v63 = vcombine.low %v7970_v39, %v7996_v8  ;;  %v8006_v4 = vrot.slane %v3911_v23, 4  ;;  %v6509_v8 = vld [vmem:[%s6682_s9 + $0xac] sm:$0xf] }
 0x113   : > { %v3931_v5 = vshll.u32 %v7982_v40, 16  ;;  %v5541_v24 = vrot.slane %v5525_v32, 9  ;;  %v4385_v22 = vrot.slane %v8619_v12, 5  ;;  %v3935_v54 = vshrl.u32 %v7982_v40, 16 }
 0x114   : > { %v2247_v23 = vshrl.u32 %v5252_v27, 16  ;;  %v2250_v17 = vshll.u32 %v5252_v27, 16  ;;  %v3924_v1 = vrot.slane %v3922_v31, 4  ;;  %v5542_v10 = vrot.slane %v5526_v2, 9  ;;  %v6446_v31 = vld [vmem:[%s6682_s9 + $0x18] sm:$0xff]  }
 0x115   : > { %6059 = vmatmul.mubr.msk.bf16.gmra.mrb[12].mxu0 %vm657_vm4, %v7892_v33  ;;  %v4388_v33 = vrot.slane %v7773_v53, 5  ;;  %v8022_v35 = vsel %vm6929_vm8, %v5541_v24, %v4385_v22  ;;  %v4387_v62 = vrot.slane %v4385_v22, 4  ;;  %v3927_v53 = vrot.slane %v3925_v6, 5  ;;  %v6447_v24 = vld [vmem:[%s6682_s9 + $0x24] sm:$0xff]  }
 0x116   : > { %5905 = vmatmul.mubr.msk.bf16.gmra.mrb[28].mxu1 %vm657_vm4, %v5143_v51  ;;  %6062 = vmatprep.mubr.msk.bf16.mxu0 %vm657_vm4, %v7894_v7  ;;  %v8620_v51 = vld [vmem:[#allocation7_spill] sm:$0xff]  ;;  %v2249_v42 = vrot.slane %v2247_v23, 4  ;;  %v2252_v52 = vrot.slane %v2250_v17, 5  ;;  %v5496_v11 = vcombine.low %v3862_v47, %v3872_v46  ;;  %v4392_v32 = vrot.slane %v8622_v38, 5  ;;  %v8048_v47 = vld [vmem:[%s6682_s9 + $0xd0] sm:$0xf] }
 0x117   : > { %5910 = vmatprep.mubr.msk.bf16.mxu1 %vm657_vm4, %v6445_v26  ;;  %v2269_v7 = vsel %vm6708_vm5, %v8621_v48, %v8620_v51  ;;  %v8035_v13 = vsel %vm6929_vm8, %v4387_v62, %v4388_v33  ;;  %v4395_v26 = vrot.slane %v7778_v55, 5  ;;  %v3886_v27 = vsel %vm6708_vm5, %v7917_v50, %v7909_v9  ;;  %v5527_v9 = vld [vmem:[%s6682_s9 + $0x90] sm:$0xe] }
 0x118   : > { %v3904_v20 = vor.u32 %v7979_v30, %v7977_v57  ;;  %v5558_v46 = vcombine.low %v8022_v35, %v8035_v13  ;;  %v2253_v6 = vor.u32 %v2252_v52, %v2249_v42  ;;  %v8053_v12 = vrot.slane %v3931_v5, 5  ;;  %v8067_v30 = vld [vmem:[%s6682_s9 + $0xc8] sm:$0x1]  ;;  %v8624_v51 = vld [vmem:[#allocation5_spill] sm:$0xff] }
 0x119   : > { %v3937_v55 = vrot.slane %v3935_v54, 4  ;;  %v8057_v22 = vsel %vm6929_vm8, %v5542_v10, %v4392_v32  ;;  %v4394_v2 = vrot.slane %v4392_v32, 4  ;;  %v3896_v50 = vsel %vm6708_vm5, %v7999_v44, %v7914_v18  ;;  %v8623_v44 = vld [vmem:[#allocation6_spill] sm:$0xff]  ;;  %v8625_v38 = vld [vmem:[#allocation21_spill] sm:$0xff] }
 0x11a   : > { %v3914_v57 = vor.u32 %v8006_v4, %v7990_v41  ;;  %v3928_v33 = vor.u32 %v3927_v53, %v3924_v1  ;;  %v2254_v5 = vrot.slane %v2253_v6, 4  ;;  %v3946_v54 = vshrl.u32 %v5481_v29, 16 }
 0x11b   : > { %v3949_v23 = vshll.u32 %v5481_v29, 16  ;;  %v3955_v17 = vshll.u32 %v8048_v47, 16  ;;  %v8074_v62 = vsel %vm6929_vm8, %v4394_v2, %v4395_v26  ;;  %v3959_v18 = vshrl.u32 %v8048_v47, 16 }
 0x11c   : > { %v2259_v4 = vsel %vm6708_vm5, %v2254_v5, %v8623_v44  ;;  %v5543_v1 = vrot.slane %v5527_v9, 9  ;;  %v3919_v48 = vrot.slane %v3917_v59, 5  ;;  %v3941_v53 = vshll.u32 %v8067_v30, 16  ;;  %v5528_v9 = vld [vmem:[%s6682_s9 + $0x9c] sm:$0xe] }
 0x11d   : > { %6063 = vmatmul.mubr.msk.bf16.gmra.mrb[16].mxu0 %vm657_vm4, %v7896_v43  ;;  %v5559_v43 = vcombine.low %v8057_v22, %v8074_v62  ;;  %v8089_v42 = vcombine.low %v2259_v4, %v2269_v7  ;;  %v5497_v52 = vcombine.low %v3886_v27, %v3896_v50  ;;  %v3905_v10 = vrot.slane %v3904_v20, 4  ;;  %v8096_v59 = vld [vmem:[%s6682_s9 + $0xd4] sm:$0x1]  ;;  %v6449_v20 = vld [vmem:[%s6682_s9 + $0x3c] sm:$0xff]  }
 0x11e   : > { %5911 = vmatmul.mubr.msk.bf16.vlgmr.msra.gmra.mrb[0].mxu1 %vm657_vm4, %v6446_v31  ;;  %6066 = vmatprep.mubr.msk.bf16.mxu0 %vm657_vm4, %v7903_v49  ;;  %v3938_v49 = vor.u32 %v3937_v55, %v8053_v12  ;;  %v4399_v32 = vrot.slane %v8625_v38, 5  ;;  %v4402_v26 = vrot.slane %v7783_v58, 5  ;;  %v3915_v31 = vrot.slane %v3914_v57, 4  ;;  %v8626_v44 = vld [vmem:[#allocation22_spill] sm:$0xff]  ;;  %v5529_v38 = vld [vmem:[%s6682_s9 + $0xa8] sm:$0xe] }
 0x11f   : > { %6113 = vmatpush3.bf16.msra.mxu1 %v8624_v51  ;;  %5914 = vmatprep.mubr.msk.bf16.mxu1 %vm657_vm4, %v6447_v24  ;;  %v3929_v29 = vrot.slane %v3928_v33, 4  ;;  %v3948_v6 = vrot.slane %v3946_v54, 4  ;;  %v3951_v2 = vrot.slane %v3949_v23, 5  ;;  %v6448_v24 = vld [vmem:[%s6682_s9 + $0x30] sm:$0xff]   ;;  %v8098_v55 = vrot.slane %v3955_v17, 5 }
 0x120   : > { %v3961_v5 = vrot.slane %v3959_v18, 4  ;;  %v8102_v7 = vsel %vm6929_vm8, %v5543_v1, %v4399_v32  ;;  %v4401_v27 = vrot.slane %v4399_v32, 4  ;;  %v3939_v50 = vrot.slane %v3938_v49, 4  ;;  %v5517_v51 = vld [vmem:[%s6682_s9 + $0x18] sm:$0xe] }
 0x121   : > { %v3943_v58 = vrot.slane %v3941_v53, 5  ;;  %v3910_v57 = vsel %vm6708_vm5, %v3905_v10, %v7990_v41  ;;  %v5544_v54 = vrot.slane %v5528_v9, 9  ;;  %v3920_v23 = vsel %vm6708_vm5, %v3915_v31, %v3919_v48  ;;  %v6496_v53 = vld [vmem:[%s6682_s9 + $0x1c] sm:$0xf] }
 0x122   : > { %v8110_v33 = vsel %vm6929_vm8, %v4401_v27, %v4402_v26  ;;  %v3965_v17 = vshll.u32 %v8096_v59, 16  ;;  %v4406_v4 = vrot.slane %v8626_v44, 5  ;;  %v3934_v41 = vsel %vm6708_vm5, %v3929_v29, %v8053_v12  ;;  %v6450_v29 = vld [vmem:[%s6682_s9 + $0x48] sm:$0xff]  }
 0x123   : > { %v5560_v18 = vcombine.low %v8102_v7, %v8110_v33  ;;  %v3962_v1 = vor.u32 %v3961_v5, %v8098_v55  ;;  %v4409_v48 = vrot.slane %v7818_v15, 5  ;;  %v3944_v49 = vsel %vm6708_vm5, %v3939_v50, %v3943_v58  ;;  %v6451_v5 = vld [vmem:[%s6682_s9 + $0x54] sm:$0xff]  }
 0x124   : > { %v8133_v10 = vsel %vm6929_vm8, %v5544_v54, %v4406_v4  ;;  %v4408_v12 = vrot.slane %v4406_v4, 4  ;;  %v5498_v32 = vcombine.low %v3910_v57, %v3920_v23  ;;  %v3967_v26 = vrot.slane %v3965_v17, 5  ;;  %v5518_v23 = vld [vmem:[%s6682_s9 + $0x24] sm:$0xe]  ;;  %v6498_v4 = vld [vmem:[%s6682_s9 + $0x28] sm:$0xf] }
 0x125   : > { %6067 = vmatmul.mubr.msk.bf16.gmra.mrb[20].mxu0 %vm657_vm4, %v5496_v11  ;;  %v3952_v11 = vor.u32 %v3951_v2, %v3948_v6  ;;  %v5533_v31 = vrot.slane %v5517_v51, 9  ;;  %v5499_v6 = vcombine.low %v3934_v41, %v3944_v49  ;;  %v3963_v9 = vrot.slane %v3962_v1, 4  ;;  %v6499_v49 = vld [vmem:[%s6682_s9 + $0x34] sm:$0xf] }
 0x126   : > { %5915 = vmatmul.mubr.msk.bf16.gmra.mrb[4].mxu1 %vm657_vm4, %v6448_v24  ;;  %6070 = vmatprep.mubr.msk.bf16.mxu0 %vm657_vm4, %v5497_v52  ;;  %v4329_v52 = vrot.slane %v6496_v53, 5  ;;  %v8138_v15 = vsel %vm6929_vm8, %v4408_v12, %v4409_v48  ;;  %v5545_v58 = vrot.slane %v5529_v38, 9  ;;  %v4413_v57 = vrot.slane %v7823_v21, 5  ;;  %v5519_v48 = vld [vmem:[%s6682_s9 + $0x30] sm:$0xe] }
 0x127   : > { %5918 = vmatprep.mubr.msk.bf16.mxu1 %vm657_vm4, %v6449_v20  ;;  %v3953_v2 = vrot.slane %v3952_v11, 4  ;;  %v5561_v24 = vcombine.low %v8133_v10, %v8138_v15  ;;  %v6497_v20 = vld [vmem:[%s6682_s9 + $0x20] sm:$0x1]  ;;  %v4416_v54 = vrot.slane %v7832_v61, 5  ;;  %v3968_v61 = vsel %vm6708_vm5, %v3963_v9, %v3967_v26  ;;  %v5530_v11 = vld [vmem:[%s6682_s9 + $0xb4] sm:$0xe] }
 0x128   : > { %v4331_v27 = vrot.slane %v4329_v52, 4  ;;  %v4332_v50 = vrot.slane %v6497_v20, 5  ;;  %v8151_v17 = vsel %vm6929_vm8, %v5545_v58, %v4413_v57  ;;  %v4415_v44 = vrot.slane %v4413_v57, 4  ;;  %v6500_v26 = vld [vmem:[%s6682_s9 + $0x2c] sm:$0x1]  ;;  %v8627_v58 = vld [vmem:[#allocation9_spill] sm:$0xff] }
 0x129   : > { %v3958_v21 = vsel %vm6708_vm5, %v3953_v2, %v8098_v55  ;;  %v4336_v41 = vrot.slane %v6498_v4, 5  ;;  %v4330_v1 = vsel %vm6929_vm8, %v5533_v31, %v4329_v52  ;;  %v4343_v53 = vrot.slane %v6499_v49, 5  ;;  %v6453_v20 = vld [vmem:[%s6682_s9 + $0x6c] sm:$0xff]   ;;  %v6514_v10 = vld [vmem:[%s6682_s9 + $0xc8] sm:$0x1] }
 0x12a   : > { %v4333_v51 = vsel %vm6929_vm8, %v4331_v27, %v4332_v50  ;;  %v8171_v55 = vsel %vm6929_vm8, %v4415_v44, %v4416_v54  ;;  %v5534_v12 = vrot.slane %v5518_v23, 9  ;;  %v5546_v52 = vrot.slane %v5530_v11, 9  ;;  %v5531_v44 = vld [vmem:[%s6682_s9 + $0xc0] sm:$0xe]  ;;  %v5520_v11 = vld [vmem:[%s6682_s9 + $0x3c] sm:$0xe] }
 0x12b   : > { %v5562_v38 = vcombine.low %v8151_v17, %v8171_v55  ;;  %v4420_v31 = vrot.slane %v7901_v56, 5  ;;  %v5550_v2 = vcombine.low %v4330_v1, %v4333_v51  ;;  %v4338_v9 = vrot.slane %v4336_v41, 4  ;;  %v8628_v56 = vld [vmem:[#allocation10_spill] sm:$0xff] }
 0x12c   : > { %v4423_v27 = vrot.slane %v7964_v3, 5  ;;  %v4345_v50 = vrot.slane %v4343_v53, 4  ;;  %v4346_v57 = vrot.slane %v8627_v58, 5  ;;  %v4337_v3 = vsel %vm6929_vm8, %v5534_v12, %v4336_v41 }
 0x12d   : > { %6071 = vmatmul.mubr.msk.bf16.gmra.mrb[24].mxu0 %vm657_vm4, %v5498_v32  ;;  %v5500_v32 = vcombine.low %v3958_v21, %v3968_v61  ;;  %v8183_v54 = vsel %vm6929_vm8, %v5546_v52, %v4420_v31  ;;  %v4422_v23 = vrot.slane %v4420_v31, 4  ;;  %v4350_v21 = vrot.slane %v8628_v56, 5  ;;  %v8629_v31 = vld [vmem:[#allocation11_spill] sm:$0xff]  ;;  %v6501_v56 = vld [vmem:[%s6682_s9 + $0x70] sm:$0xf] }
 0x12e   : > { %5919 = vmatmul.mubr.msk.bf16.gmra.mrb[8].mxu1 %vm657_vm4, %v6450_v29  ;;  %6074 = vmatprep.mubr.msk.bf16.mxu0 %vm657_vm4, %v5499_v6  ;;  %v4339_v29 = vrot.slane %v6500_v26, 5  ;;  %v6452_v6 = vld [vmem:[%s6682_s9 + $0x60] sm:$0xff]   ;;  %v5547_v49 = vrot.slane %v5531_v44, 9  ;;  %v4427_v41 = vrot.slane %v7982_v40, 5  ;;  %v4430_v12 = vrot.slane %v8067_v30, 5 }
 0x12f   : > { %5922 = vmatprep.mubr.msk.bf16.mxu1 %vm657_vm4, %v6451_v5  ;;  %v5535_v5 = vrot.slane %v5519_v48, 9  ;;  %v8190_v61 = vsel %vm6929_vm8, %v4422_v23, %v4423_v27  ;;  %v4347_v48 = vsel %vm6929_vm8, %v4345_v50, %v4346_v57  ;;  %v4352_v52 = vrot.slane %v4350_v21, 4 }
 0x130   : > { %v4340_v4 = vsel %vm6929_vm8, %v4338_v9, %v4339_v29  ;;  %v5563_v1 = vcombine.low %v8183_v54, %v8190_v61  ;;  %v5536_v29 = vrot.slane %v5520_v11, 9  ;;  %v6454_v9 = vld [vmem:[%s6682_s9 + $0x78] sm:$0xff]   ;;  %v4434_v11 = vrot.slane %v8048_v47, 5 }
 0x131   : > { %v4344_v51 = vsel %vm6929_vm8, %v5535_v5, %v4343_v53  ;;  %v5551_v26 = vcombine.low %v4337_v3, %v4340_v4  ;;  %v8214_v53 = vsel %vm6929_vm8, %v5547_v49, %v4427_v41  ;;  %v4429_v5 = vrot.slane %v4427_v41, 4 }
 0x132   : > { %v5552_v27 = vcombine.low %v4344_v51, %v4347_v48  ;;  %v4351_v57 = vsel %vm6929_vm8, %v5536_v29, %v4350_v21  ;;  %v2232_v3 = vshll.u32 %v6501_v56, 16  ;;  %v2236_v4 = vshrl.u32 %v6501_v56, 16 }
 0x133   : > { %v8219_v40 = vsel %vm6929_vm8, %v4429_v5, %v4430_v12  ;;  %v4437_v21 = vrot.slane %v8096_v59, 5  ;;  %v6456_v12 = vld [vmem:[%s6682_s9 + $0x90] sm:$0xff]   ;;  %v6457_v59 = vld [vmem:[%s6682_s9 + $0x9c] sm:$0xff]   ;;  %v2410_v15 = vshll.u32 %v6514_v10, 16 }
 0x134   : > { %v5564_v44 = vcombine.low %v8214_v53, %v8219_v40  ;;  %v2238_v29 = vrot.slane %v2236_v4, 4  ;;  %v6459_v4 = vld [vmem:[%s6682_s9 + $0xb4] sm:$0xff]  }
 0x135   : > { %6075 = vmatmul.mubr.msk.bf16.gmra.mrb[28].mxu0 %vm657_vm4, %v5500_v32  ;;  %v5249_v32 = vld [vmem:[%s6682_s9 + $0x6c] sm:$0xf] }
 0x136   : > { %5923 = vmatmul.mubr.msk.bf16.gmra.mrb[12].mxu1 %vm657_vm4, %v6452_v6  ;;  %6080 = vmatprep.mubr.msk.bf16.mxu0 %vm657_vm4, %v5550_v2  ;;  %v4353_v6 = vrot.slane %v8629_v31, 5  ;;  %v5532_v2 = vld [vmem:[%s6682_s9 + $0xcc] sm:$0xe]  ;;  %v2223_v50 = vshrl.u32 %v5249_v32, 16  ;;  %v2226_v58 = vshll.u32 %v5249_v32, 16  ;;  %v4436_v32 = vrot.slane %v4434_v11, 4 }
 0x137   : > { %5926 = vmatprep.mubr.msk.bf16.mxu1 %vm657_vm4, %v6453_v20  ;;  %v6455_v20 = vld [vmem:[%s6682_s9 + $0x84] sm:$0xff]   ;;  %v5548_v30 = vrot.slane %v5532_v2, 9  ;;  %v6502_v2 = vld [vmem:[%s6682_s9 + $0x74] sm:$0x1] }
 0x138   : > { %v4354_v23 = vsel %vm6929_vm8, %v4352_v52, %v4353_v6  ;;  %v2225_v51 = vrot.slane %v2223_v50, 4  ;;  %v2228_v48 = vrot.slane %v2226_v58, 5  ;;  %v8241_v47 = vsel %vm6929_vm8, %v4436_v32, %v4437_v21  ;;  %v5255_v52 = vld [vmem:[%s6682_s9 + $0x84] sm:$0xf] }
 0x139   : > { %v8236_v49 = vsel %vm6929_vm8, %v5548_v30, %v4434_v11  ;;  %v5553_v41 = vcombine.low %v4351_v57, %v4354_v23  ;;  %v2274_v5 = vshll.u32 %v5255_v52, 16  ;;  %v5258_v57 = vld [vmem:[%s6682_s9 + $0x90] sm:$0xf]  ;;  %v6458_v23 = vld [vmem:[%s6682_s9 + $0xa8] sm:$0xff]  }
 0x13a   : > { %v5565_v31 = vcombine.low %v8236_v49, %v8241_v47  ;;  %v2229_v6 = vor.u32 %v2228_v48, %v2225_v51  ;;  %v2295_v51 = vshrl.u32 %v5258_v57, 16  ;;  %v2298_v48 = vshll.u32 %v5258_v57, 16 }
 0x13c   : > { %v2230_v30 = vrot.slane %v2229_v6, 4  ;;  %v6505_v6 = vld [vmem:[%s6682_s9 + $0x8c] sm:$0x1]  ;;  %v2300_v60 = vrot.slane %v2298_v48, 5  ;;  %v6508_v48 = vld [vmem:[%s6682_s9 + $0xa4] sm:$0x1] }
 0x13d   : > { %6081 = vmatmul.mubr.msk.bf16.vlgmr.msra.gmra.mrb[0].mxu0 %vm657_vm4, %v5551_v26  ;;  %v2234_v26 = vrot.slane %v2232_v3, 5  ;;  %v5261_v3 = vld [vmem:[%s6682_s9 + $0x9c] sm:$0xf]  ;;  %v2290_v19 = vshll.u32 %v6505_v6, 16 }
 0x13e   : > { %5927 = vmatmul.mubr.msk.bf16.gmra.mrb[16].mxu1 %vm657_vm4, %v6454_v9  ;;  %6084 = vmatprep.mubr.msk.bf16.mxu0 %vm657_vm4, %v5552_v27  ;;  %v2242_v9 = vshll.u32 %v6502_v2, 16  ;;  %v2271_v27 = vshrl.u32 %v5255_v52, 16  ;;  %v2322_v52 = vshll.u32 %v5261_v3, 16 }
 0x13f   : > { %5930 = vmatprep.mubr.msk.bf16.mxu1 %vm657_vm4, %v6455_v20  ;;  %v2239_v45 = vor.u32 %v2238_v29, %v2234_v26  ;;  %v6503_v20 = vld [vmem:[%s6682_s9 + $0x88] sm:$0xf]  ;;  %v2235_v32 = vsel %vm6708_vm5, %v2230_v30, %v2234_v26  ;;  %v2292_v30 = vrot.slane %v2290_v19, 5 }
 0x140   : > { %v2280_v50 = vshll.u32 %v6503_v20, 16  ;;  %v2284_v58 = vshrl.u32 %v6503_v20, 16  ;;  %v2244_v25 = vrot.slane %v2242_v9, 5  ;;  %v2273_v34 = vrot.slane %v2271_v27, 4 }
 0x141   : > { %v2240_v56 = vrot.slane %v2239_v45, 4  ;;  %v2332_v45 = vshrl.u32 %v6506_v0, 16  ;;  %v2297_v27 = vrot.slane %v2295_v51, 4  ;;  %v2324_v20 = vrot.slane %v2322_v52, 5 }
 0x142   : > { %v8260_v11 = vrot.slane %v2280_v50, 5  ;;  %v2286_v21 = vrot.slane %v2284_v58, 4  ;;  %v6460_v50 = vld [vmem:[%s6682_s9 + $0xc0] sm:$0xff]  }
 0x143   : > { %v2245_v26 = vsel %vm6708_vm5, %v2240_v56, %v2244_v25  ;;  %v5264_v56 = vld [vmem:[%s6682_s9 + $0xa8] sm:$0xf] }
 0x144   : > { %v2287_v9 = vor.u32 %v2286_v21, %v8260_v11  ;;  %v5282_v58 = vcombine.low %v2235_v32, %v2245_v26  ;;  %v2338_v32 = vshll.u32 %v6508_v48, 16  ;;  %v2346_v39 = vshll.u32 %v5264_v56, 16 }
 0x145   : > { %6085 = vmatmul.mubr.msk.bf16.gmra.mrb[4].mxu0 %vm657_vm4, %v5553_v41  ;;  %v6504_v41 = vld [vmem:[%s6682_s9 + $0x94] sm:$0xf] }
 0x146   : > { %5931 = vmatmul.mubr.msk.bf16.gmra.mrb[20].mxu1 %vm657_vm4, %v6456_v12  ;;  %6088 = vmatprep.mubr.msk.bf16.mxu0 %vm657_vm4, %v5554_v14  ;;  %v2276_v14 = vrot.slane %v2274_v5, 5  ;;  %v2304_v12 = vshll.u32 %v6504_v41, 16  ;;  %v2308_v29 = vshrl.u32 %v6504_v41, 16  ;;  %v2343_v41 = vshrl.u32 %v5264_v56, 16  ;;  %v5270_v56 = vld [vmem:[%s6682_s9 + $0xc0] sm:$0xf] }
 0x147   : > { %5934 = vmatprep.mubr.msk.bf16.mxu1 %vm657_vm4, %v6457_v59  ;;  %v2319_v59 = vshrl.u32 %v5261_v3, 16  ;;  %v6507_v3 = vld [vmem:[%s6682_s9 + $0x98] sm:$0x1] }
 0x148   : > { %v2277_v2 = vor.u32 %v2276_v14, %v2273_v34  ;;  %v8280_v36 = vrot.slane %v2304_v12, 5  ;;  %v2288_v34 = vrot.slane %v2287_v9, 4  ;;  %v2301_v14 = vor.u32 %v2300_v60, %v2297_v27  ;;  %v5267_v12 = vld [vmem:[%s6682_s9 + $0xb4] sm:$0xf] }
 0x149   : > { %v2321_v5 = vrot.slane %v2319_v59, 4  ;;  %v2356_v59 = vshrl.u32 %v6509_v8, 16  ;;  %v2367_v35 = vshrl.u32 %v5267_v12, 16  ;;  %v2370_v13 = vshll.u32 %v5267_v12, 16 }
 0x14a   : > { %v2278_v25 = vrot.slane %v2277_v2, 4  ;;  %v2293_v26 = vsel %vm6708_vm5, %v2288_v34, %v2292_v30  ;;  %v2302_v6 = vrot.slane %v2301_v14, 4  ;;  %v2340_v9 = vrot.slane %v2338_v32, 5 }
 0x14b   : > { %v2325_v51 = vor.u32 %v2324_v20, %v2321_v5  ;;  %v2345_v27 = vrot.slane %v2343_v41, 4  ;;  %v2358_v20 = vrot.slane %v2356_v59, 4  ;;  %v6513_v41 = vld [vmem:[%s6682_s9 + $0xbc] sm:$0x1] }
 0x14c   : > { %v2283_v52 = vsel %vm6708_vm5, %v2278_v25, %v8260_v11  ;;  %v2307_v25 = vsel %vm6708_vm5, %v2302_v6, %v8280_v36  ;;  %v2386_v7 = vshll.u32 %v6513_v41, 16 }
 0x14d   : > { %6089 = vmatmul.mubr.msk.bf16.gmra.mrb[8].mxu0 %vm657_vm4, %v5555_v16  ;;  %v2328_v16 = vshll.u32 %v6506_v0, 16  ;;  %v2326_v2 = vrot.slane %v2325_v51, 4  ;;  %v5284_v11 = vcombine.low %v2283_v52, %v2293_v26 }
 0x14e   : > { %5935 = vmatmul.mubr.msk.bf16.gmra.mrb[24].mxu1 %vm657_vm4, %v6458_v23  ;;  %6092 = vmatprep.mubr.msk.bf16.mxu0 %vm657_vm4, %v5556_v28  ;;  %v2310_v28 = vrot.slane %v2308_v29, 4  ;;  %v2334_v23 = vrot.slane %v2332_v45, 4 }
 0x14f   : > { %5938 = vmatprep.mubr.msk.bf16.mxu1 %vm657_vm4, %v6459_v4  ;;  %v8283_v57 = vrot.slane %v2328_v16, 5  ;;  %v2314_v4 = vshll.u32 %v6507_v3, 16 }
 0x150   : > { %v2311_v21 = vor.u32 %v2310_v28, %v8280_v36  ;;  %v2348_v28 = vrot.slane %v2346_v39, 5  ;;  %v6511_v36 = vld [vmem:[%s6682_s9 + $0xb0] sm:$0x1] }
 0x151   : > { %v2335_v29 = vor.u32 %v2334_v23, %v8283_v57  ;;  %v2316_v19 = vrot.slane %v2314_v4, 5  ;;  %v2331_v14 = vsel %vm6708_vm5, %v2326_v2, %v8283_v57  ;;  %v2362_v3 = vshll.u32 %v6511_v36, 16 }
 0x152   : > { %v2312_v45 = vrot.slane %v2311_v21, 4  ;;  %v2349_v62 = vor.u32 %v2348_v28, %v2345_v27  ;;  %v2391_v4 = vshrl.u32 %v5270_v56, 16  ;;  %v2394_v57 = vshll.u32 %v5270_v56, 16  ;;  %v6512_v21 = vld [vmem:[%s6682_s9 + $0xc4] sm:$0xf] }
 0x153   : > { %v2336_v60 = vrot.slane %v2335_v29, 4  ;;  %v2400_v51 = vshll.u32 %v6512_v21, 16  ;;  %v2404_v48 = vshrl.u32 %v6512_v21, 16  ;;  %v2364_v39 = vrot.slane %v2362_v3, 5 }
 0x154   : > { %v2317_v34 = vsel %vm6708_vm5, %v2312_v45, %v2316_v19  ;;  %v2350_v12 = vrot.slane %v2349_v62, 4  ;;  %v2388_v19 = vrot.slane %v2386_v7, 5  ;;  %v2412_v2 = vrot.slane %v2410_v15, 5 }
 0x155   : > { %6093 = vmatmul.mubr.msk.bf16.gmra.mrb[12].mxu0 %vm657_vm4, %v5557_v63  ;;  %v2352_v63 = vshll.u32 %v6509_v8, 16  ;;  %v2341_v22 = vsel %vm6708_vm5, %v2336_v60, %v2340_v9  ;;  %v5285_v33 = vcombine.low %v2307_v25, %v2317_v34  ;;  %v2393_v8 = vrot.slane %v2391_v4, 4 }
 0x156   : > { %5939 = vmatmul.mubr.msk.bf16.gmra.mrb[28].mxu1 %vm657_vm4, %v6460_v50  ;;  %6096 = vmatprep.mubr.msk.bf16.mxu0 %vm657_vm4, %v5558_v46  ;;  %v6510_v46 = vld [vmem:[%s6682_s9 + $0xb8] sm:$0xf]  ;;  %v2369_v50 = vrot.slane %v2367_v35, 4  ;;  %v2402_v59 = vrot.slane %v2400_v51, 5  ;;  %v2406_v52 = vrot.slane %v2404_v48, 4 }
 0x157   : > { %5960 = vmatprep.mubr.msk.bf16.mxu1 %vm657_vm4, %v5282_v58  ;;  %v2376_v0 = vshll.u32 %v6510_v46, 16  ;;  %v2380_v16 = vshrl.u32 %v6510_v46, 16  ;;  %v2354_v5 = vrot.slane %v2352_v63, 5  ;;  %v2372_v58 = vrot.slane %v2370_v13, 5 }
 0x158   : > { %v2396_v63 = vrot.slane %v2394_v57, 5 }
 0x159   : > { %v2378_v30 = vrot.slane %v2376_v0, 5  ;;  %v2382_v23 = vrot.slane %v2380_v16, 4  ;;  %v2355_v35 = vsel %vm6708_vm5, %v2350_v12, %v2354_v5  ;;  %v2407_v0 = vor.u32 %v2406_v52, %v2402_v59 }
 0x15a   : > { %v2397_v46 = vor.u32 %v2396_v63, %v2393_v8 }
 0x15b   : > { %v2383_v32 = vor.u32 %v2382_v23, %v2378_v30  ;;  %v2408_v45 = vrot.slane %v2407_v0, 4 }
 0x15c   : > { %v2398_v16 = vrot.slane %v2397_v46, 4 }
 0x15d   : > { %6097 = vmatmul.mubr.msk.bf16.gmra.mrb[16].mxu0 %vm657_vm4, %v5559_v43  ;;  %v2359_v43 = vor.u32 %v2358_v20, %v2354_v5  ;;  %v2384_v6 = vrot.slane %v2383_v32, 4  ;;  %v2413_v27 = vsel %vm6708_vm5, %v2408_v45, %v2412_v2 }
 0x15e   : > { %5961 = vmatmul.mubr.msk.bf16.vlgmr.msra.gmra.mrb[16].mxu1 %vm657_vm4, %v8089_v42  ;;  %6100 = vmatprep.mubr.msk.bf16.mxu0 %vm657_vm4, %v5560_v18  ;;  %v2373_v42 = vor.u32 %v2372_v58, %v2369_v50  ;;  %v5286_v18 = vcombine.low %v2331_v14, %v2341_v22  ;;  %v2403_v9 = vsel %vm6708_vm5, %v2398_v16, %v2402_v59 }
 0x15f   : > { %5964 = vmatprep.mubr.msk.bf16.mxu1 %vm657_vm4, %v5284_v11  ;;  %v2360_v29 = vrot.slane %v2359_v43, 4  ;;  %v2389_v17 = vsel %vm6708_vm5, %v2384_v6, %v2388_v19  ;;  %v5289_v60 = vcombine.low %v2403_v9, %v2413_v27 }
 0x160   : > { %v2374_v26 = vrot.slane %v2373_v42, 4 }
 0x161   : > { %v2365_v13 = vsel %vm6708_vm5, %v2360_v29, %v2364_v39 }
 0x162   : > { %v5287_v55 = vcombine.low %v2355_v35, %v2365_v13 }
 0x165   : > { %6101 = vmatmul.mubr.msk.bf16.gmra.mrb[20].mxu0 %vm657_vm4, %v5561_v24  ;;  %v2379_v24 = vsel %vm6708_vm5, %v2374_v26, %v2378_v30  ;;  %v8387_v30 = vld [vmem:[%s8549_s2] ss:$0 sm:$0xff] }
 0x166   : > { %5965 = vmatmul.mubr.msk.bf16.gmra.mrb[20].mxu1 %vm657_vm4, %v5285_v33  ;;  %6104 = vmatprep.mubr.msk.bf16.mxu0 %vm657_vm4, %v5562_v38  ;;  %v5288_v38 = vcombine.low %v2379_v24, %v2389_v17 }
 0x167   : > { %5968 = vmatprep.mubr.msk.bf16.mxu1 %vm657_vm4, %v5286_v18 }
 0x16d   : > { %6105 = vmatmul.mubr.msk.bf16.gmra.mrb[24].mxu0 %vm657_vm4, %v5563_v1 }
 0x16e   : > { %5969 = vmatmul.mubr.msk.bf16.gmra.mrb[24].mxu1 %vm657_vm4, %v5287_v55  ;;  %6108 = vmatprep.mubr.msk.bf16.mxu0 %vm657_vm4, %v5564_v44 }
 0x16f   : > { %5972 = vmatprep.mubr.msk.bf16.mxu1 %vm657_vm4, %v5288_v38 }
 0x175   : > { %6109 = vmatmul.mubr.msk.bf16.gmra.mrb[28].mxu0 %vm657_vm4, %v5565_v31 }
 0x176   : > { %5973 = vmatmul.mubr.msk.bf16.gmra.mrb[28].mxu1 %vm657_vm4, %v5289_v60 }
 0x1f1   : > { %v5912_v54 = vpop.f32.mrb[0].mxu1 }
 0x1f2   : > { %v1823_v61 = vpop.f32.mrb[1].mxu1 }
 0x1f3   : > { %v5913_v1 = vpop.f32.mrb[2].mxu1 }
 0x1f4   : > { %v1826_v53 = vpop.f32.mrb[3].mxu1 }
 0x1f9   : > { %v5916_v40 = vpop.f32.mrb[4].mxu1 }
 0x1fa   : > { %v1839_v44 = vpop.f32.mrb[5].mxu1 }
 0x1fb   : > { %v5917_v28 = vpop.f32.mrb[6].mxu1 }
 0x1fc   : > { %v1842_v5 = vpop.f32.mrb[7].mxu1 }
 0x201   : > { %v5920_v37 = vpop.f32.mrb[8].mxu1 }
 0x202   : > { %v1855_v20 = vpop.f32.mrb[9].mxu1 }
 0x203   : > { %v8371_v11 = vpop.f32.mrb[10].mxu1 }
 0x204   : > { %v8373_v50 = vpop.f32.mrb[11].mxu1 }
 0x209   : > { %v8375_v49 = vpop.f32.mrb[12].mxu1 }
 0x20a   : > { %v8377_v47 = vpop.f32.mrb[13].mxu1 }
 0x20b   : > { %v8379_v31 = vpop.f32.mrb[14].mxu1 }
 0x20c   : > { %v8381_v58 = vpop.f32.mrb[15].mxu1 }
 0x210   : > { %v6082_v23 = vpop.f32.mrb[0].mxu0 }
 0x211   : > { %v6114_v56 = vadd.f32 %v6082_v23, %v5912_v54  ;;  %v4574_v25 = vpop.f32.mrb[1].mxu0 }
 0x212   : > { %v6115_v34 = vadd.f32 %v4574_v25, %v1823_v61  ;;  %v6083_v14 = vpop.f32.mrb[2].mxu0 }
 0x213   : > { %v4741_v22 = vadd.f32 %v6114_v56, %v8387_v30  ;;  %v6116_v62 = vadd.f32 %v6083_v14, %v5913_v1  ;;  %v4577_v43 = vpop.f32.mrb[3].mxu0 }
 0x214   : > { %v4739_v36 = vadd.f32 %v6115_v34, %v8387_v30  ;;  %v6117_v3 = vadd.f32 %v4577_v43, %v1826_v53 }
 0x215   : > { %v4773_v4 = vmax.f32 %v4741_v22, 0.0  ;;  %v4742_v57 = vadd.f32 %v6116_v62, %v8387_v30 }
 0x216   : > { %v4771_v21 = vmax.f32 %v4739_v36, 0.0  ;;  %v4740_v51 = vadd.f32 %v6117_v3, %v8387_v30 }
 0x217   : > { %v5622_v48 = vpack.c.bf16 %v4773_v4, %v4773_v4  ;;  %v4774_v42 = vmax.f32 %v4742_v57, 0.0 }
 0x218   : > { %v5620_v32 = vpack.c.bf16 %v4771_v21, %v4771_v21  ;;  %v4772_v41 = vmax.f32 %v4740_v51, 0.0  ;;  %v6086_v7 = vpop.f32.mrb[4].mxu0 }
 0x219   : > { %4934 = vst.msk [vmem:[%s8395_s6 + $0x8] sm:$0xf] %vm4931_vm9, %v5622_v48  ;;  %v5623_v33 = vpack.c.bf16 %v4774_v42, %v4774_v42  ;;  %v6118_v18 = vadd.f32 %v6086_v7, %v5916_v40  ;;  %v4590_v12 = vpop.f32.mrb[5].mxu0 }
 0x21a   : > { %4932 = vst.msk [vmem:[%s8395_s6] sm:$0xf] %vm4931_vm9, %v5620_v32  ;;  %v5621_v29 = vpack.c.bf16 %v4772_v41, %v4772_v41  ;;  %v6119_v39 = vadd.f32 %v4590_v12, %v1839_v44  ;;  %v6087_v8 = vpop.f32.mrb[6].mxu0 }
 0x21b   : > { %4935 = vst.msk [vmem:[%s8395_s6 + $0xc] sm:$0xf] %vm4931_vm9, %v5623_v33  ;;  %v4745_v63 = vadd.f32 %v6118_v18, %v8387_v30  ;;  %v6120_v59 = vadd.f32 %v6087_v8, %v5917_v28  ;;  %v4593_v52 = vpop.f32.mrb[7].mxu0 }
 0x21c   : > { %4933 = vst.msk [vmem:[%s8395_s6 + $0x4] sm:$0xf] %vm4931_vm9, %v5621_v29  ;;  %v4743_v26 = vadd.f32 %v6119_v39, %v8387_v30  ;;  %v6121_v6 = vadd.f32 %v4593_v52, %v1842_v5 }
 0x21d   : > { %v4777_v19 = vmax.f32 %v4745_v63, 0.0  ;;  %v4746_v35 = vadd.f32 %v6120_v59, %v8387_v30 }
 0x21e   : > { %v4775_v13 = vmax.f32 %v4743_v26, 0.0  ;;  %v4744_v46 = vadd.f32 %v6121_v6, %v8387_v30 }
 0x21f   : > { %v5626_v0 = vpack.c.bf16 %v4777_v19, %v4777_v19  ;;  %v4778_v10 = vmax.f32 %v4746_v35, 0.0 }
 0x220   : > { %v5624_v15 = vpack.c.bf16 %v4775_v13, %v4775_v13  ;;  %v4776_v24 = vmax.f32 %v4744_v46, 0.0  ;;  %v6090_v17 = vpop.f32.mrb[8].mxu0 }
 0x221   : > { %4938 = vst.msk [vmem:[%s8395_s6 + $0x18] sm:$0xf] %vm4931_vm9, %v5626_v0  ;;  %v5627_v55 = vpack.c.bf16 %v4778_v10, %v4778_v10  ;;  %v6122_v38 = vadd.f32 %v6090_v17, %v5920_v37  ;;  %v4606_v16 = vpop.f32.mrb[9].mxu0 }
 0x222   : > { %4936 = vst.msk [vmem:[%s8395_s6 + $0x10] sm:$0xf] %vm4931_vm9, %v5624_v15  ;;  %v5625_v45 = vpack.c.bf16 %v4776_v24, %v4776_v24  ;;  %v6123_v2 = vadd.f32 %v4606_v16, %v1855_v20  ;;  %v6091_v9 = vpop.f32.mrb[10].mxu0 }
 0x223   : > { %4939 = vst.msk [vmem:[%s8395_s6 + $0x1c] sm:$0xf] %vm4931_vm9, %v5627_v55  ;;  %v4749_v27 = vadd.f32 %v6122_v38, %v8387_v30  ;;  %v6124_v60 = vadd.f32 %v6091_v9, %v8371_v11  ;;  %v4609_v54 = vpop.f32.mrb[11].mxu0 }
 0x224   : > { %4937 = vst.msk [vmem:[%s8395_s6 + $0x14] sm:$0xf] %vm4931_vm9, %v5625_v45  ;;  %v4747_v61 = vadd.f32 %v6123_v2, %v8387_v30  ;;  %v6125_v1 = vadd.f32 %v4609_v54, %v8373_v50 }
 0x225   : > { %v4781_v53 = vmax.f32 %v4749_v27, 0.0  ;;  %v4750_v40 = vadd.f32 %v6124_v60, %v8387_v30 }
 0x226   : > { %v4779_v44 = vmax.f32 %v4747_v61, 0.0  ;;  %v4748_v28 = vadd.f32 %v6125_v1, %v8387_v30 }
 0x227   : > { %v5630_v5 = vpack.c.bf16 %v4781_v53, %v4781_v53  ;;  %v4782_v37 = vmax.f32 %v4750_v40, 0.0 }
 0x228   : > { %v5628_v20 = vpack.c.bf16 %v4779_v44, %v4779_v44  ;;  %v4780_v11 = vmax.f32 %v4748_v28, 0.0  ;;  %v6094_v23 = vpop.f32.mrb[12].mxu0 }
 0x229   : > { %4942 = vst.msk [vmem:[%s8395_s6 + $0x28] sm:$0xf] %vm4931_vm9, %v5630_v5  ;;  %v5631_v56 = vpack.c.bf16 %v4782_v37, %v4782_v37  ;;  %v6126_v25 = vadd.f32 %v6094_v23, %v8375_v49  ;;  %v4622_v34 = vpop.f32.mrb[13].mxu0 }
 0x22a   : > { %4940 = vst.msk [vmem:[%s8395_s6 + $0x20] sm:$0xf] %vm4931_vm9, %v5628_v20  ;;  %v5629_v50 = vpack.c.bf16 %v4780_v11, %v4780_v11  ;;  %v6127_v14 = vadd.f32 %v4622_v34, %v8377_v47  ;;  %v6095_v22 = vpop.f32.mrb[14].mxu0 }
 0x22b   : > { %4943 = vst.msk [vmem:[%s8395_s6 + $0x2c] sm:$0xf] %vm4931_vm9, %v5631_v56  ;;  %v4753_v62 = vadd.f32 %v6126_v25, %v8387_v30  ;;  %v6128_v43 = vadd.f32 %v6095_v22, %v8379_v31  ;;  %v4625_v36 = vpop.f32.mrb[15].mxu0 }
 0x22c   : > { %4941 = vst.msk [vmem:[%s8395_s6 + $0x24] sm:$0xf] %vm4931_vm9, %v5629_v50  ;;  %v4751_v49 = vadd.f32 %v6127_v14, %v8387_v30  ;;  %v6129_v3 = vadd.f32 %v4625_v36, %v8381_v58 }
 0x22d   : > { %v4785_v4 = vmax.f32 %v4753_v62, 0.0  ;;  %v4754_v57 = vadd.f32 %v6128_v43, %v8387_v30 }
 0x22e   : > { %v4783_v47 = vmax.f32 %v4751_v49, 0.0  ;;  %v4752_v21 = vadd.f32 %v6129_v3, %v8387_v30 }
 0x22f   : > { %v5634_v51 = vpack.c.bf16 %v4785_v4, %v4785_v4  ;;  %v4786_v48 = vmax.f32 %v4754_v57, 0.0 }
 0x230   : > { %v5632_v42 = vpack.c.bf16 %v4783_v47, %v4783_v47  ;;  %v4784_v31 = vmax.f32 %v4752_v21, 0.0  ;;  %v6098_v32 = vpop.f32.mrb[16].mxu0 }
 0x231   : > { %4946 = vst.msk [vmem:[%s8395_s6 + $0x38] sm:$0xf] %vm4931_vm9, %v5634_v51  ;;  %v5635_v41 = vpack.c.bf16 %v4786_v48, %v4786_v48  ;;  %v5962_v7 = vpop.f32.mrb[16].mxu1  ;;  %v4638_v33 = vpop.f32.mrb[17].mxu0 }
 0x232   : > { %4944 = vst.msk [vmem:[%s8395_s6 + $0x30] sm:$0xf] %vm4931_vm9, %v5632_v42  ;;  %v5633_v58 = vpack.c.bf16 %v4784_v31, %v4784_v31  ;;  %v6130_v18 = vadd.f32 %v6098_v32, %v5962_v7  ;;  %v2613_v12 = vpop.f32.mrb[17].mxu1  ;;  %v6099_v29 = vpop.f32.mrb[18].mxu0 }
 0x233   : > { %4947 = vst.msk [vmem:[%s8395_s6 + $0x3c] sm:$0xf] %vm4931_vm9, %v5635_v41  ;;  %v6131_v39 = vadd.f32 %v4638_v33, %v2613_v12  ;;  %v5963_v8 = vpop.f32.mrb[18].mxu1  ;;  %v4641_v63 = vpop.f32.mrb[19].mxu0 }
 0x234   : > { %4945 = vst.msk [vmem:[%s8395_s6 + $0x34] sm:$0xf] %vm4931_vm9, %v5633_v58  ;;  %v4757_v59 = vadd.f32 %v6130_v18, %v8387_v30  ;;  %v6132_v52 = vadd.f32 %v6099_v29, %v5963_v8  ;;  %v2616_v26 = vpop.f32.mrb[19].mxu1 }
 0x235   : > { %v4755_v6 = vadd.f32 %v6131_v39, %v8387_v30  ;;  %v6133_v19 = vadd.f32 %v4641_v63, %v2616_v26 }
 0x236   : > { %v4789_v35 = vmax.f32 %v4757_v59, 0.0  ;;  %v4758_v13 = vadd.f32 %v6132_v52, %v8387_v30 }
 0x237   : > { %v4787_v46 = vmax.f32 %v4755_v6, 0.0  ;;  %v4756_v0 = vadd.f32 %v6133_v19, %v8387_v30 }
 0x238   : > { %v5638_v10 = vpack.c.bf16 %v4789_v35, %v4789_v35  ;;  %v4790_v15 = vmax.f32 %v4758_v13, 0.0  ;;  %v6102_v24 = vpop.f32.mrb[20].mxu0 }
 0x239   : > { %v5636_v17 = vpack.c.bf16 %v4787_v46, %v4787_v46  ;;  %v4788_v55 = vmax.f32 %v4756_v0, 0.0  ;;  %v5966_v38 = vpop.f32.mrb[20].mxu1  ;;  %v4654_v16 = vpop.f32.mrb[21].mxu0 }
 0x23a   : > { %4950 = vst.msk [vmem:[%s8395_s6 + $0x48] sm:$0xf] %vm4931_vm9, %v5638_v10  ;;  %v5639_v45 = vpack.c.bf16 %v4790_v15, %v4790_v15  ;;  %v6134_v2 = vadd.f32 %v6102_v24, %v5966_v38  ;;  %v2629_v9 = vpop.f32.mrb[21].mxu1  ;;  %v6103_v27 = vpop.f32.mrb[22].mxu0 }
 0x23b   : > { %4948 = vst.msk [vmem:[%s8395_s6 + $0x40] sm:$0xf] %vm4931_vm9, %v5636_v17  ;;  %v5637_v60 = vpack.c.bf16 %v4788_v55, %v4788_v55  ;;  %v6135_v54 = vadd.f32 %v4654_v16, %v2629_v9  ;;  %v5967_v61 = vpop.f32.mrb[22].mxu1  ;;  %v4657_v1 = vpop.f32.mrb[23].mxu0 }
 0x23c   : > { %4951 = vst.msk [vmem:[%s8395_s6 + $0x4c] sm:$0xf] %vm4931_vm9, %v5639_v45  ;;  %v4761_v53 = vadd.f32 %v6134_v2, %v8387_v30  ;;  %v6136_v40 = vadd.f32 %v6103_v27, %v5967_v61  ;;  %v2632_v44 = vpop.f32.mrb[23].mxu1 }
 0x23d   : > { %4949 = vst.msk [vmem:[%s8395_s6 + $0x44] sm:$0xf] %vm4931_vm9, %v5637_v60  ;;  %v4759_v28 = vadd.f32 %v6135_v54, %v8387_v30  ;;  %v6137_v5 = vadd.f32 %v4657_v1, %v2632_v44 }
 0x23e   : > { %v4793_v37 = vmax.f32 %v4761_v53, 0.0  ;;  %v4762_v20 = vadd.f32 %v6136_v40, %v8387_v30 }
 0x23f   : > { %v4791_v11 = vmax.f32 %v4759_v28, 0.0  ;;  %v4760_v23 = vadd.f32 %v6137_v5, %v8387_v30 }
 0x240   : > { %v5642_v56 = vpack.c.bf16 %v4793_v37, %v4793_v37  ;;  %v4794_v25 = vmax.f32 %v4762_v20, 0.0  ;;  %v6106_v34 = vpop.f32.mrb[24].mxu0 }
 0x241   : > { %v5640_v50 = vpack.c.bf16 %v4791_v11, %v4791_v11  ;;  %v4792_v14 = vmax.f32 %v4760_v23, 0.0  ;;  %v5970_v22 = vpop.f32.mrb[24].mxu1  ;;  %v4670_v62 = vpop.f32.mrb[25].mxu0 }
 0x242   : > { %4954 = vst.msk [vmem:[%s8395_s6 + $0x58] sm:$0xf] %vm4931_vm9, %v5642_v56  ;;  %v5643_v43 = vpack.c.bf16 %v4794_v25, %v4794_v25  ;;  %v6138_v36 = vadd.f32 %v6106_v34, %v5970_v22  ;;  %v2645_v49 = vpop.f32.mrb[25].mxu1  ;;  %v6107_v3 = vpop.f32.mrb[26].mxu0 }
 0x243   : > { %4952 = vst.msk [vmem:[%s8395_s6 + $0x50] sm:$0xf] %vm4931_vm9, %v5640_v50  ;;  %v5641_v4 = vpack.c.bf16 %v4792_v14, %v4792_v14  ;;  %v6139_v57 = vadd.f32 %v4670_v62, %v2645_v49  ;;  %v5971_v47 = vpop.f32.mrb[26].mxu1  ;;  %v4673_v21 = vpop.f32.mrb[27].mxu0 }
 0x244   : > { %4955 = vst.msk [vmem:[%s8395_s6 + $0x5c] sm:$0xf] %vm4931_vm9, %v5643_v43  ;;  %v4765_v51 = vadd.f32 %v6138_v36, %v8387_v30  ;;  %v6140_v48 = vadd.f32 %v6107_v3, %v5971_v47  ;;  %v2648_v42 = vpop.f32.mrb[27].mxu1 }
 0x245   : > { %4953 = vst.msk [vmem:[%s8395_s6 + $0x54] sm:$0xf] %vm4931_vm9, %v5641_v4  ;;  %v4763_v31 = vadd.f32 %v6139_v57, %v8387_v30  ;;  %v6141_v32 = vadd.f32 %v4673_v21, %v2648_v42 }
 0x246   : > { %v4797_v41 = vmax.f32 %v4765_v51, 0.0  ;;  %v4766_v7 = vadd.f32 %v6140_v48, %v8387_v30 }
 0x247   : > { %v4795_v33 = vmax.f32 %v4763_v31, 0.0  ;;  %v4764_v58 = vadd.f32 %v6141_v32, %v8387_v30 }
 0x248   : > { %v5646_v18 = vpack.c.bf16 %v4797_v41, %v4797_v41  ;;  %v4798_v12 = vmax.f32 %v4766_v7, 0.0  ;;  %v6110_v29 = vpop.f32.mrb[28].mxu0 }
 0x249   : > { %v5644_v39 = vpack.c.bf16 %v4795_v33, %v4795_v33  ;;  %v4796_v8 = vmax.f32 %v4764_v58, 0.0  ;;  %v5974_v63 = vpop.f32.mrb[28].mxu1  ;;  %v4686_v59 = vpop.f32.mrb[29].mxu0 }
 0x24a   : > { %4958 = vst.msk [vmem:[%s8395_s6 + $0x68] sm:$0xf] %vm4931_vm9, %v5646_v18  ;;  %v5647_v52 = vpack.c.bf16 %v4798_v12, %v4798_v12  ;;  %v6142_v26 = vadd.f32 %v6110_v29, %v5974_v63  ;;  %v2661_v6 = vpop.f32.mrb[29].mxu1  ;;  %v6111_v19 = vpop.f32.mrb[30].mxu0 }
 0x24b   : > { %4956 = vst.msk [vmem:[%s8395_s6 + $0x60] sm:$0xf] %vm4931_vm9, %v5644_v39  ;;  %v5645_v35 = vpack.c.bf16 %v4796_v8, %v4796_v8  ;;  %v6143_v13 = vadd.f32 %v4686_v59, %v2661_v6  ;;  %v5975_v46 = vpop.f32.mrb[30].mxu1  ;;  %v4689_v0 = vpop.f32.mrb[31].mxu0 }
 0x24c   : > { %4959 = vst.msk [vmem:[%s8395_s6 + $0x6c] sm:$0xf] %vm4931_vm9, %v5647_v52  ;;  %v4769_v10 = vadd.f32 %v6142_v26, %v8387_v30  ;;  %v6144_v15 = vadd.f32 %v6111_v19, %v5975_v46  ;;  %v2664_v24 = vpop.f32.mrb[31].mxu1 }
 0x24d   : > { %4957 = vst.msk [vmem:[%s8395_s6 + $0x64] sm:$0xf] %vm4931_vm9, %v5645_v35  ;;  %v4767_v17 = vadd.f32 %v6143_v13, %v8387_v30  ;;  %v6145_v55 = vadd.f32 %v4689_v0, %v2664_v24 }
 0x24e   : > { %v4801_v38 = vmax.f32 %v4769_v10, 0.0  ;;  %v4770_v16 = vadd.f32 %v6144_v15, %v8387_v30 }
 0x24f   : > { %v4799_v45 = vmax.f32 %v4767_v17, 0.0  ;;  %v4768_v2 = vadd.f32 %v6145_v55, %v8387_v30 }
 0x250   : > { %v5650_v9 = vpack.c.bf16 %v4801_v38, %v4801_v38  ;;  %v4802_v27 = vmax.f32 %v4770_v16, 0.0 }
 0x251   : > { %v5648_v60 = vpack.c.bf16 %v4799_v45, %v4799_v45  ;;  %v4800_v54 = vmax.f32 %v4768_v2, 0.0 }
 0x252   : > { %4962 = vst.msk [vmem:[%s8395_s6 + $0x78] sm:$0xf] %vm4931_vm9, %v5650_v9  ;;  %v5651_v61 = vpack.c.bf16 %v4802_v27, %v4802_v27 }
 0x253   : > { %4960 = vst.msk [vmem:[%s8395_s6 + $0x70] sm:$0xf] %vm4931_vm9, %v5648_v60  ;;  %v5649_v30 = vpack.c.bf16 %v4800_v54, %v4800_v54 }
 0x254   : > { %4963 = vst.msk [vmem:[%s8395_s6 + $0x7c] sm:$0xf] %vm4931_vm9, %v5651_v61 }
 0x255   : > { %4961 = vst.msk [vmem:[%s8395_s6 + $0x74] sm:$0xf] %vm4931_vm9, %v5649_v30 }
 0x256   : > { %6528 = shalt.err (!%p6525_p3)
}
 0x257   : > { %s6529_s25 = scalar_lea.hbm %s8494_s11, 2048  ;;  %s6533_s28 = scalar_lea.hbm %s8550_s3, 4096 }
 0x258   : > { %p6530_p4 = scmp.ne.s32.totalorder %s8494_s11, %s6529_s25  ;;  %p6534_p9 = scmp.lt.u32.totalorder %s8494_s11, %s8550_s3 }
 0x259   : > { %p6535_p10 = scmp.lt.u32.totalorder %s6533_s28, %s6529_s25  ;;  %p6537_p12 = scmp.lt.u32.totalorder %s6529_s25, %s8494_s11 }
 0x25a   : > { %p6531_p7 = pnand %p6530_p4, %p6641_p5 }
 0x25b   : > { %p6536_p11 = por %p6535_p10, %p6534_p9 }
 0x25c   : > { %p6532_p8 = pneg %p6531_p7 }
 0x25d   : > { %p6538_p13 = por %p6537_p12, %p6536_p11 }
 0x25f   : > { %p6539_p0 = pnand %p6538_p13, %p6532_p8 }
 0x261   : > { %6542 = shalt.err (!%p6539_p0)
}
 0x262   : > { %s6581_s4 = smov 64   ;;  %s6582_s5 = smov 4  }
 0x263   : > { %6371 = dma.vmem_to_hbm [thread:$0]  (%p6641_p5), %s8496_s8, 2048, %s8494_s11, %s8506_s16, %s6581_s4, %s6581_s4, %s6582_s5  }
 0x264 PF: > { %p6377_p1 = scmp.ge.s32.totalorder %s6577_s15, 2  ;;  %s4993_s6 = sand.u32 1, %s6565_s12  }
 0x265   : > { %s4994_s7 = scalar_lea.sflag [#allocation3], %s4993_s6 }
 0x266   : > { %p6374_p2 = pnand %p6377_p1, %p6645_p6 }
 0x268   : > { %6560 = dma.done.wait (!%p6374_p2), %s4994_s7, 2048  }
 0x269   : > { %6562 = vsyncadd (!%p6374_p2), %s4994_s7, 4294965248  ;;  %p13_p3 = scmp.ge.s32.totalorder %s6628_s18, 4   ;;  %s8630_s12 = smov %s6569_s13 }
 0x26a   : > { %s8631_s13 = smov %s6573_s14  ;;  %s8632_s14 = smov %s6639_s21 }
 0x26b   : > { %s8633_s15 = smov %s6628_s18  ;;  %15 = sbr.rel (!%p13_p3) target bundleno = 3 (0x3), region = 77 }
 0x272   :  { %4999 = vsyncpa [#allocation3], 1 }
 0x273   :  { %5001 = vsyncpa [#allocation3 + $0x1], 1 }

</bundles_post_ra>
